<compile_context>
chip_gen: v6e
topology: v6e:2x2x1
jax: 0.10.0
libtpu: 0.0.40
codegen_flags: <defaults>
</compile_context>

<pallas_src>
import functools
import math

import numpy as np
import jax
import jax.numpy as jnp
from jax.experimental import pallas as pl
from jax.experimental.pallas import tpu as pltpu


# ----------------------------------------------------------------------------- config
class Config:
    seed = 0
    # audio encoder
    audio_vocab_size = 32
    audio_embd = 32
    audio_block_size = 8
    audio_head = 2
    audio_ff = 64
    audio_layer = 2
    audio_dropout = 0.0
    audio_activation = "relu"
    # meta branch
    meta_enable = True
    meta_features = 8
    meta_fc = 8          # NOTE: torch code sizes audio_projection with meta_features,
                         # so forward only works when meta_fc == meta_features.
    meta_activation = "relu"
    meta_dropout = 0.0
    # hits decoder
    hits_vocab_size = 16
    hits_embd = 32
    hits_block_size = 8
    hits_head = 2
    hits_ff = 64
    hits_layer = 1
    hits_dropout = 0.0
    hits_activation = "relu"
    hits_mask = True
    # output head
    output_tracks = 2
    output_fc = 32
    output_activation = "relu"
    output_dropout = 0.0
    output_bins = 4


# ----------------------------------------------------------------------------- in-kernel helpers
def _act(x, kind):
    if kind == "relu":
        return jnp.maximum(x, 0.0)
    return jax.nn.gelu(x, approximate=False)   # statically dead for this config


def _layernorm(x, g, b, eps=1e-5):
    mu = jnp.mean(x, axis=-1, keepdims=True)
    var = jnp.mean(jnp.square(x - mu), axis=-1, keepdims=True)
    return (x - mu) * jax.lax.rsqrt(var + eps) * g + b


def _softmax_rows(s):
    m = jnp.max(s, axis=-1, keepdims=True)
    p = jnp.exp(s - m)
    return p / jnp.sum(p, axis=-1, keepdims=True)


def _self_attention(x, wqkv, bqkv, wo, bo, n_heads, mask):
    # fused QKV projection: one (S,E) @ (E,3E) matmul, heads sliced from the result
    S, E = x.shape
    Dh = E // n_heads
    scale = 1.0 / math.sqrt(Dh)
    qkv = jnp.dot(x, wqkv, preferred_element_type=jnp.float32) + bqkv     # (S, 3E)
    heads = []
    for h in range(n_heads):
        q = qkv[:, h * Dh:(h + 1) * Dh]
        k = qkv[:, E + h * Dh:E + (h + 1) * Dh]
        v = qkv[:, 2 * E + h * Dh:2 * E + (h + 1) * Dh]
        s = jax.lax.dot_general(q, k, (((1,), (1,)), ((), ())),
                                preferred_element_type=jnp.float32) * scale
        if mask is not None:
            s = s + mask
        heads.append(jnp.dot(_softmax_rows(s), v, preferred_element_type=jnp.float32))
    ctx = jnp.concatenate(heads, axis=-1)                                  # (S, E)
    return jnp.dot(ctx, wo, preferred_element_type=jnp.float32) + bo


def _cross_attention(x, mem, wq, bq, wkv, bkv, wo, bo, n_heads):
    Sq, E = x.shape
    Dh = E // n_heads
    scale = 1.0 / math.sqrt(Dh)
    q = jnp.dot(x, wq, preferred_element_type=jnp.float32) + bq            # (Sq, E)
    kv = jnp.dot(mem, wkv, preferred_element_type=jnp.float32) + bkv       # (Sk, 2E)
    heads = []
    for h in range(n_heads):
        qh = q[:, h * Dh:(h + 1) * Dh]
        kh = kv[:, h * Dh:(h + 1) * Dh]
        vh = kv[:, E + h * Dh:E + (h + 1) * Dh]
        s = jax.lax.dot_general(qh, kh, (((1,), (1,)), ((), ())),
                                preferred_element_type=jnp.float32) * scale
        heads.append(jnp.dot(_softmax_rows(s), vh, preferred_element_type=jnp.float32))
    ctx = jnp.concatenate(heads, axis=-1)
    return jnp.dot(ctx, wo, preferred_element_type=jnp.float32) + bo


def _ffn(x, w1, b1, w2, b2, act):
    h = _act(jnp.dot(x, w1, preferred_element_type=jnp.float32) + b1, act)
    return jnp.dot(h, w2, preferred_element_type=jnp.float32) + b2


def _flatten_to(scr_ref, x):
    # (R, C) value -> (1, R*C) value, via static row->lane-range stores into scratch
    r, c = x.shape
    for i in range(r):
        scr_ref[:, i * c:(i + 1) * c] = x[i:i + 1, :]
    return scr_ref[...]


def _unflatten_to(scr_ref, xf, rows, cols):
    # (1, rows*cols) value -> (rows, cols) value, via static lane-slice -> row stores
    for i in range(rows):
        scr_ref[i:i + 1, :] = xf[:, i * cols:(i + 1) * cols]
    return scr_ref[...]


# ----------------------------------------------------------------------------- fused kernel
_W_KEYS = (
    # audio encoder (leading dim = layer)
    "e_wqkv", "e_bqkv", "e_wo", "e_bo", "e_ln1g", "e_ln1b",
    "e_w1", "e_b1", "e_w2", "e_b2", "e_ln2g", "e_ln2b",
    # meta MLP + audio projection
    "meta_w", "meta_b", "proj_wa", "proj_wm",
    # hits decoders (leading dims = track, layer)
    "d_swqkv", "d_sbqkv", "d_swo", "d_sbo",
    "d_cwq", "d_cbq", "d_cwkv", "d_cbkv", "d_cwo", "d_cbo",
    "d_ln1g", "d_ln1b", "d_ln2g", "d_ln2b", "d_ln3g", "d_ln3b",
    "d_w1", "d_b1", "d_w2", "d_b2",
    # output head
    "out_lng", "out_lnb", "out_fcw", "out_fcb", "out_hw",
)


def _fused_forward_kernel(*refs, n_enc_layers, n_enc_heads, enc_act,
                          n_dec_layers, n_dec_heads, dec_act,
                          n_tracks, meta_enable, meta_act, out_act,
                          n_tail, sh, eh):
    # one grid step == one batch element; the whole forward stays in VMEM/vregs
    audio_ref, meta_ref, hits_ref, mask_ref = refs[0], refs[1], refs[2], refs[3]
    nw = len(_W_KEYS)
    w = dict(zip(_W_KEYS, refs[4:4 + nw]))
    o_ref = refs[4 + nw]
    af_scr, of_scr, mem_scr = refs[4 + nw + 1], refs[4 + nw + 2], refs[4 + nw + 3]

    # ---- audio transformer encoder stack (post-LN, torch default) ----
    x = audio_ref[0]                                            # (Sa, Ea)
    for l in range(n_enc_layers):
        a = _self_attention(x, w["e_wqkv"][l], w["e_bqkv"][l],
                            w["e_wo"][l], w["e_bo"][l], n_enc_heads, None)
        x = _layernorm(x + a, w["e_ln1g"][l], w["e_ln1b"][l])
        f = _ffn(x, w["e_w1"][l], w["e_b1"][l], w["e_w2"][l], w["e_b2"][l], enc_act)
        x = _layernorm(x + f, w["e_ln2g"][l], w["e_ln2b"][l])

    # ---- meta MLP + audio projection -> encoder memory ----
    # audio_projection([audio_flat | meta_out]) == audio_flat @ Wa + meta_out @ Wm
    audio_flat = _flatten_to(af_scr, x)                         # (1, Sa*Ea)
    enc_flat = jnp.dot(audio_flat, w["proj_wa"][...],
                       preferred_element_type=jnp.float32)      # (1, Sh*Eh)
    if meta_enable:
        m = meta_ref[0]                                         # (1, Mf)
        m = _act(jnp.dot(m, w["meta_w"][...], preferred_element_type=jnp.float32)
                 + w["meta_b"][...], meta_act)
        enc_flat = enc_flat + jnp.dot(m, w["proj_wm"][...],
                                      preferred_element_type=jnp.float32)
    memory = _unflatten_to(mem_scr, enc_flat, sh, eh)           # (Sh, Eh)

    # ---- hits transformer decoders, summed over tracks ----
    mask = mask_ref[...]                                        # (Sh, Sh), finite -1e9 mask
    hits_acc = jnp.zeros((sh, eh), jnp.float32)
    for t in range(n_tracks):
        h = hits_ref[0, t]                                      # (Sh, Eh)
        for l in range(n_dec_layers):
            a = _self_attention(h, w["d_swqkv"][t, l], w["d_sbqkv"][t, l],
                                w["d_swo"][t, l], w["d_sbo"][t, l], n_dec_heads, mask)
            h = _layernorm(h + a, w["d_ln1g"][t, l], w["d_ln1b"][t, l])
            a = _cross_attention(h, memory, w["d_cwq"][t, l], w["d_cbq"][t, l],
                                 w["d_cwkv"][t, l], w["d_cbkv"][t, l],
                                 w["d_cwo"][t, l], w["d_cbo"][t, l], n_dec_heads)
            h = _layernorm(h + a, w["d_ln2g"][t, l], w["d_ln2b"][t, l])
            f = _ffn(h, w["d_w1"][t, l], w["d_b1"][t, l],
                     w["d_w2"][t, l], w["d_b2"][t, l], dec_act)
            h = _layernorm(h + f, w["d_ln3g"][t, l], w["d_ln3b"][t, l])
        hits_acc = hits_acc + h

    # ---- track-sum + residual + LayerNorm + FC + head + sigmoid/exp split ----
    all_flat = _flatten_to(of_scr, hits_acc + memory)           # (1, Sh*Eh)
    y = _layernorm(all_flat, w["out_lng"][...], w["out_lnb"][...])
    y = _act(jnp.dot(y, w["out_fcw"][...], preferred_element_type=jnp.float32)
             + w["out_fcb"][...], out_act)
    logits = jnp.dot(y, w["out_hw"][...], preferred_element_type=jnp.float32)  # (1, n_out)
    n_cols = logits.shape[-1]
    col = jax.lax.broadcasted_iota(jnp.int32, logits.shape, 1)
    keep = col < (n_cols - n_tail)
    # only exponentiate the tail columns (avoid inf in the discarded branch)
    exp_tail = jnp.exp(jnp.where(keep, 0.0, logits))
    o_ref[0] = jnp.where(keep, jax.nn.sigmoid(logits), exp_tail)


# ----------------------------------------------------------------------------- wrapper
def pallas_fused_forward(audio_emb, meta3, hits_emb, mask, weights, cfg):
    B, Sa, Ea = audio_emb.shape
    _, T, Sh, Eh = hits_emb.shape
    Mf = meta3.shape[-1]
    n_out = cfg.output_bins * cfg.output_tracks + 2

    data_specs = [
        pl.BlockSpec((1, Sa, Ea), lambda b: (b, 0, 0)),
        pl.BlockSpec((1, 1, Mf), lambda b: (b, 0, 0)),
        pl.BlockSpec((1, T, Sh, Eh), lambda b: (b, 0, 0, 0)),
        pl.BlockSpec((Sh, Sh), lambda b: (0, 0)),
    ]
    # full-block weights with constant index maps -> DMA once, resident over batch
    w_specs = [pl.BlockSpec(w.shape, lambda b, nd=w.ndim: (0,) * nd) for w in weights]

    kernel = functools.partial(
        _fused_forward_kernel,
        n_enc_layers=cfg.audio_layer, n_enc_heads=cfg.audio_head,
        enc_act=cfg.audio_activation,
        n_dec_layers=cfg.hits_layer, n_dec_heads=cfg.hits_head,
        dec_act=cfg.hits_activation,
        n_tracks=cfg.output_tracks, meta_enable=cfg.meta_enable,
        meta_act=cfg.meta_activation, out_act=cfg.output_activation,
        n_tail=2, sh=Sh, eh=Eh,
    )

    out3 = pl.pallas_call(
        kernel,
        grid=(B,),
        in_specs=data_specs + w_specs,
        out_specs=pl.BlockSpec((1, 1, n_out), lambda b: (b, 0, 0)),
        out_shape=jax.ShapeDtypeStruct((B, 1, n_out), jnp.float32),
        scratch_shapes=[
            pltpu.VMEM((1, Sa * Ea), jnp.float32),   # audio flatten buffer
            pltpu.VMEM((1, Sh * Eh), jnp.float32),   # output flatten buffer
            pltpu.VMEM((Sh, Eh), jnp.float32),       # encoder-memory unflatten buffer
        ],
        compiler_params=pltpu.CompilerParams(dimension_semantics=("parallel",)),
    )(audio_emb, meta3, hits_emb, mask, *weights)
    return out3.reshape(B, n_out)


# ----------------------------------------------------------------------------- glue
def causal_mask(S, neg=-1e9):
    # finite negative instead of -inf (robust if rows ever become fully masked)
    i = jnp.arange(S)
    return jnp.where(i[None, :] > i[:, None], jnp.float32(neg), jnp.float32(0.0))


def sinusoidal_pe(block_size, n_embd):
    position = np.arange(block_size, dtype=np.float32)[:, None]
    div_term = np.exp(np.arange(0, n_embd, 2, dtype=np.float32) * (-np.log(10000.0) / n_embd))
    pe = np.zeros((block_size, n_embd), dtype=np.float32)
    pe[:, 0::2] = np.sin(position * div_term)
    pe[:, 1::2] = np.cos(position * div_term)
    return jnp.asarray(pe)


# ----------------------------------------------------------------------------- parameters
def init_params(cfg, key):
    keys = iter(jax.random.split(key, 64))

    def w(shape):
        return 0.03 * jax.random.normal(next(keys), shape, jnp.float32)

    def zeros(*s):
        return jnp.zeros(s, jnp.float32)

    def ones(*s):
        return jnp.ones(s, jnp.float32)

    E, FF, L = cfg.audio_embd, cfg.audio_ff, cfg.audio_layer
    Eh, FFh, Lh, T = cfg.hits_embd, cfg.hits_ff, cfg.hits_layer, cfg.output_tracks
    HF = cfg.hits_block_size * cfg.hits_embd
    AF = cfg.audio_block_size * cfg.audio_embd
    n_out = cfg.output_bins * T + 2
    assert cfg.meta_fc == cfg.meta_features  # required for audio_projection dims to line up

    return dict(
        audio_tok_emb=w((cfg.audio_vocab_size, E)),
        audio_pe=sinusoidal_pe(cfg.audio_block_size, E),
        hits_tok_emb=w((cfg.hits_vocab_size, Eh)),   # tied across tracks (torch shares weight)
        hits_pe=sinusoidal_pe(cfg.hits_block_size, Eh),
        # audio encoder
        e_wqkv=w((L, E, 3 * E)), e_bqkv=zeros(L, 1, 3 * E),
        e_wo=w((L, E, E)), e_bo=zeros(L, 1, E),
        e_ln1g=ones(L, 1, E), e_ln1b=zeros(L, 1, E),
        e_w1=w((L, E, FF)), e_b1=zeros(L, 1, FF),
        e_w2=w((L, FF, E)), e_b2=zeros(L, 1, E),
        e_ln2g=ones(L, 1, E), e_ln2b=zeros(L, 1, E),
        # meta MLP + bias-free audio projection (split into audio / meta halves)
        meta_w=w((cfg.meta_features, cfg.meta_fc)), meta_b=zeros(1, cfg.meta_fc),
        proj_wa=w((AF, HF)), proj_wm=w((cfg.meta_fc, HF)),
        # hits decoders
        d_swqkv=w((T, Lh, Eh, 3 * Eh)), d_sbqkv=zeros(T, Lh, 1, 3 * Eh),
        d_swo=w((T, Lh, Eh, Eh)), d_sbo=zeros(T, Lh, 1, Eh),
        d_cwq=w((T, Lh, Eh, Eh)), d_cbq=zeros(T, Lh, 1, Eh),
        d_cwkv=w((T, Lh, Eh, 2 * Eh)), d_cbkv=zeros(T, Lh, 1, 2 * Eh),
        d_cwo=w((T, Lh, Eh, Eh)), d_cbo=zeros(T, Lh, 1, Eh),
        d_ln1g=ones(T, Lh, 1, Eh), d_ln1b=zeros(T, Lh, 1, Eh),
        d_ln2g=ones(T, Lh, 1, Eh), d_ln2b=zeros(T, Lh, 1, Eh),
        d_ln3g=ones(T, Lh, 1, Eh), d_ln3b=zeros(T, Lh, 1, Eh),
        d_w1=w((T, Lh, Eh, FFh)), d_b1=zeros(T, Lh, 1, FFh),
        d_w2=w((T, Lh, FFh, Eh)), d_b2=zeros(T, Lh, 1, Eh),
        # output head
        out_lng=ones(1, HF), out_lnb=zeros(1, HF),
        out_fcw=w((HF, cfg.output_fc)), out_fcb=zeros(1, cfg.output_fc),
        out_hw=w((cfg.output_fc, n_out)),
    )


# ----------------------------------------------------------------------------- forward
def forward(params, cfg, audio_tokens, hits_tokens=None, meta_data=None):
    B, AT = audio_tokens.shape
    assert AT == cfg.audio_block_size
    assert cfg.output_tracks >= 1
    T = cfg.output_tracks
    Sh, Eh = cfg.hits_block_size, cfg.hits_embd

    # audio token embedding + positional encoding (gather glue kept in XLA; dropout=identity)
    audio_emb = params["audio_tok_emb"][audio_tokens] + params["audio_pe"][None, :, :]

    if meta_data is None:
        meta_data = jnp.zeros((B, cfg.meta_features), jnp.float32)
    meta3 = meta_data.astype(jnp.float32).reshape(B, 1, cfg.meta_features)

    if hits_tokens is None:
        hits_tokens = jnp.zeros((B, T, Sh), jnp.int32)
    hits_emb = params["hits_tok_emb"][hits_tokens] + params["hits_pe"][None, None, :, :]

    mask = causal_mask(Sh) if cfg.hits_mask else jnp.zeros((Sh, Sh), jnp.float32)

    weights = [params[k] for k in _W_KEYS]
    out = pallas_fused_forward(audio_emb, meta3, hits_emb, mask, weights, cfg)

    # TODO(synk): targets/weights loss path (BCEWithLogits + MSE) not implemented; loss=None here.
    return out, None


# ----------------------------------------------------------------------------- main
if __name__ == "__main__":
    cfg = Config()
    key = jax.random.PRNGKey(0)
    pkey, akey, hkey, mkey = jax.random.split(key, 4)

    params = init_params(cfg, pkey)
    batch = 2
    audio_tokens = jax.random.randint(akey, (batch, cfg.audio_block_size), 0,
                                      cfg.audio_vocab_size, dtype=jnp.int32)
    hits_tokens = jax.random.randint(hkey, (batch, cfg.output_tracks, cfg.hits_block_size), 0,
                                     cfg.hits_vocab_size, dtype=jnp.int32)
    meta_data = jax.random.normal(mkey, (batch, cfg.meta_features), jnp.float32)

    fwd = jax.jit(lambda prm, a, h, m: forward(prm, cfg, a, h, m)[0])
    probs = fwd(params, audio_tokens, hits_tokens, meta_data)
    jax.block_until_ready(probs)

    expected = (batch, cfg.output_bins * cfg.output_tracks + 2)
    assert probs.shape == expected, (probs.shape, expected)
    assert bool(jnp.all(jnp.isfinite(probs)))
    # first output_bins*output_tracks columns are sigmoid probabilities in (0, 1)
    assert bool(jnp.all((probs[:, :-2] > 0) & (probs[:, :-2] < 1)))
    print("KERNEL_OK")
</pallas_src>

<mosaic_0001>
module attributes {stable_mosaic.version = 11 : i64} {
  func.func @_fused_forward_kernel(%arg0: i32, %arg1: memref<1x8x32xf32, #tpu.memory_space<vmem>>, %arg2: memref<1x1x8xf32, #tpu.memory_space<vmem>>, %arg3: memref<1x2x8x32xf32, #tpu.memory_space<vmem>>, %arg4: memref<8x8xf32, #tpu.memory_space<vmem>>, %arg5: memref<2x32x96xf32, #tpu.memory_space<vmem>>, %arg6: memref<2x1x96xf32, #tpu.memory_space<vmem>>, %arg7: memref<2x32x32xf32, #tpu.memory_space<vmem>>, %arg8: memref<2x1x32xf32, #tpu.memory_space<vmem>>, %arg9: memref<2x1x32xf32, #tpu.memory_space<vmem>>, %arg10: memref<2x1x32xf32, #tpu.memory_space<vmem>>, %arg11: memref<2x32x64xf32, #tpu.memory_space<vmem>>, %arg12: memref<2x1x64xf32, #tpu.memory_space<vmem>>, %arg13: memref<2x64x32xf32, #tpu.memory_space<vmem>>, %arg14: memref<2x1x32xf32, #tpu.memory_space<vmem>>, %arg15: memref<2x1x32xf32, #tpu.memory_space<vmem>>, %arg16: memref<2x1x32xf32, #tpu.memory_space<vmem>>, %arg17: memref<8x8xf32, #tpu.memory_space<vmem>>, %arg18: memref<1x8xf32, #tpu.memory_space<vmem>>, %arg19: memref<256x256xf32, #tpu.memory_space<vmem>>, %arg20: memref<8x256xf32, #tpu.memory_space<vmem>>, %arg21: memref<2x1x32x96xf32, #tpu.memory_space<vmem>>, %arg22: memref<2x1x1x96xf32, #tpu.memory_space<vmem>>, %arg23: memref<2x1x32x32xf32, #tpu.memory_space<vmem>>, %arg24: memref<2x1x1x32xf32, #tpu.memory_space<vmem>>, %arg25: memref<2x1x32x32xf32, #tpu.memory_space<vmem>>, %arg26: memref<2x1x1x32xf32, #tpu.memory_space<vmem>>, %arg27: memref<2x1x32x64xf32, #tpu.memory_space<vmem>>, %arg28: memref<2x1x1x64xf32, #tpu.memory_space<vmem>>, %arg29: memref<2x1x32x32xf32, #tpu.memory_space<vmem>>, %arg30: memref<2x1x1x32xf32, #tpu.memory_space<vmem>>, %arg31: memref<2x1x1x32xf32, #tpu.memory_space<vmem>>, %arg32: memref<2x1x1x32xf32, #tpu.memory_space<vmem>>, %arg33: memref<2x1x1x32xf32, #tpu.memory_space<vmem>>, %arg34: memref<2x1x1x32xf32, #tpu.memory_space<vmem>>, %arg35: memref<2x1x1x32xf32, #tpu.memory_space<vmem>>, %arg36: memref<2x1x1x32xf32, #tpu.memory_space<vmem>>, %arg37: memref<2x1x32x64xf32, #tpu.memory_space<vmem>>, %arg38: memref<2x1x1x64xf32, #tpu.memory_space<vmem>>, %arg39: memref<2x1x64x32xf32, #tpu.memory_space<vmem>>, %arg40: memref<2x1x1x32xf32, #tpu.memory_space<vmem>>, %arg41: memref<1x256xf32, #tpu.memory_space<vmem>>, %arg42: memref<1x256xf32, #tpu.memory_space<vmem>>, %arg43: memref<256x32xf32, #tpu.memory_space<vmem>>, %arg44: memref<1x32xf32, #tpu.memory_space<vmem>>, %arg45: memref<32x10xf32, #tpu.memory_space<vmem>>, %arg46: memref<1x1x10xf32, #tpu.memory_space<vmem>>, %arg47: memref<1x256xf32, #tpu.memory_space<vmem>>, %arg48: memref<1x256xf32, #tpu.memory_space<vmem>>, %arg49: memref<8x32xf32, #tpu.memory_space<vmem>>) attributes {dimension_semantics = [#tpu.dimension_semantics<parallel>], iteration_bounds = array<i64: 2>, scalar_prefetch = 0 : i64, scratch_operands = 3 : i64, tpu.core_type = #tpu.core_type<tc>, window_params = [{transform_indices = @transform_0, window_bounds = array<i64: 1, 8, 32>}, {transform_indices = @transform_1, window_bounds = array<i64: 1, 1, 8>}, {transform_indices = @transform_2, window_bounds = array<i64: 1, 2, 8, 32>}, {pipeline_mode = #tpu.pipeline_mode<synchronous>, transform_indices = @transform_3, window_bounds = array<i64: 8, 8>}, {pipeline_mode = #tpu.pipeline_mode<synchronous>, transform_indices = @transform_4, window_bounds = array<i64: 2, 32, 96>}, {pipeline_mode = #tpu.pipeline_mode<synchronous>, transform_indices = @transform_5, window_bounds = array<i64: 2, 1, 96>}, {pipeline_mode = #tpu.pipeline_mode<synchronous>, transform_indices = @transform_6, window_bounds = array<i64: 2, 32, 32>}, {pipeline_mode = #tpu.pipeline_mode<synchronous>, transform_indices = @transform_7, window_bounds = array<i64: 2, 1, 32>}, {pipeline_mode = #tpu.pipeline_mode<synchronous>, transform_indices = @transform_8, window_bounds = array<i64: 2, 1, 32>}, {pipeline_mode = #tpu.pipeline_mode<synchronous>, transform_indices = @transform_9, window_bounds = array<i64: 2, 1, 32>}, {pipeline_mode = #tpu.pipeline_mode<synchronous>, transform_indices = @transform_10, window_bounds = array<i64: 2, 32, 64>}, {pipeline_mode = #tpu.pipeline_mode<synchronous>, transform_indices = @transform_11, window_bounds = array<i64: 2, 1, 64>}, {pipeline_mode = #tpu.pipeline_mode<synchronous>, transform_indices = @transform_12, window_bounds = array<i64: 2, 64, 32>}, {pipeline_mode = #tpu.pipeline_mode<synchronous>, transform_indices = @transform_13, window_bounds = array<i64: 2, 1, 32>}, {pipeline_mode = #tpu.pipeline_mode<synchronous>, transform_indices = @transform_14, window_bounds = array<i64: 2, 1, 32>}, {pipeline_mode = #tpu.pipeline_mode<synchronous>, transform_indices = @transform_15, window_bounds = array<i64: 2, 1, 32>}, {pipeline_mode = #tpu.pipeline_mode<synchronous>, transform_indices = @transform_16, window_bounds = array<i64: 8, 8>}, {pipeline_mode = #tpu.pipeline_mode<synchronous>, transform_indices = @transform_17, window_bounds = array<i64: 1, 8>}, {pipeline_mode = #tpu.pipeline_mode<synchronous>, transform_indices = @transform_18, window_bounds = array<i64: 256, 256>}, {pipeline_mode = #tpu.pipeline_mode<synchronous>, transform_indices = @transform_19, window_bounds = array<i64: 8, 256>}, {pipeline_mode = #tpu.pipeline_mode<synchronous>, transform_indices = @transform_20, window_bounds = array<i64: 2, 1, 32, 96>}, {pipeline_mode = #tpu.pipeline_mode<synchronous>, transform_indices = @transform_21, window_bounds = array<i64: 2, 1, 1, 96>}, {pipeline_mode = #tpu.pipeline_mode<synchronous>, transform_indices = @transform_22, window_bounds = array<i64: 2, 1, 32, 32>}, {pipeline_mode = #tpu.pipeline_mode<synchronous>, transform_indices = @transform_23, window_bounds = array<i64: 2, 1, 1, 32>}, {pipeline_mode = #tpu.pipeline_mode<synchronous>, transform_indices = @transform_24, window_bounds = array<i64: 2, 1, 32, 32>}, {pipeline_mode = #tpu.pipeline_mode<synchronous>, transform_indices = @transform_25, window_bounds = array<i64: 2, 1, 1, 32>}, {pipeline_mode = #tpu.pipeline_mode<synchronous>, transform_indices = @transform_26, window_bounds = array<i64: 2, 1, 32, 64>}, {pipeline_mode = #tpu.pipeline_mode<synchronous>, transform_indices = @transform_27, window_bounds = array<i64: 2, 1, 1, 64>}, {pipeline_mode = #tpu.pipeline_mode<synchronous>, transform_indices = @transform_28, window_bounds = array<i64: 2, 1, 32, 32>}, {pipeline_mode = #tpu.pipeline_mode<synchronous>, transform_indices = @transform_29, window_bounds = array<i64: 2, 1, 1, 32>}, {pipeline_mode = #tpu.pipeline_mode<synchronous>, transform_indices = @transform_30, window_bounds = array<i64: 2, 1, 1, 32>}, {pipeline_mode = #tpu.pipeline_mode<synchronous>, transform_indices = @transform_31, window_bounds = array<i64: 2, 1, 1, 32>}, {pipeline_mode = #tpu.pipeline_mode<synchronous>, transform_indices = @transform_32, window_bounds = array<i64: 2, 1, 1, 32>}, {pipeline_mode = #tpu.pipeline_mode<synchronous>, transform_indices = @transform_33, window_bounds = array<i64: 2, 1, 1, 32>}, {pipeline_mode = #tpu.pipeline_mode<synchronous>, transform_indices = @transform_34, window_bounds = array<i64: 2, 1, 1, 32>}, {pipeline_mode = #tpu.pipeline_mode<synchronous>, transform_indices = @transform_35, window_bounds = array<i64: 2, 1, 1, 32>}, {pipeline_mode = #tpu.pipeline_mode<synchronous>, transform_indices = @transform_36, window_bounds = array<i64: 2, 1, 32, 64>}, {pipeline_mode = #tpu.pipeline_mode<synchronous>, transform_indices = @transform_37, window_bounds = array<i64: 2, 1, 1, 64>}, {pipeline_mode = #tpu.pipeline_mode<synchronous>, transform_indices = @transform_38, window_bounds = array<i64: 2, 1, 64, 32>}, {pipeline_mode = #tpu.pipeline_mode<synchronous>, transform_indices = @transform_39, window_bounds = array<i64: 2, 1, 1, 32>}, {pipeline_mode = #tpu.pipeline_mode<synchronous>, transform_indices = @transform_40, window_bounds = array<i64: 1, 256>}, {pipeline_mode = #tpu.pipeline_mode<synchronous>, transform_indices = @transform_41, window_bounds = array<i64: 1, 256>}, {pipeline_mode = #tpu.pipeline_mode<synchronous>, transform_indices = @transform_42, window_bounds = array<i64: 256, 32>}, {pipeline_mode = #tpu.pipeline_mode<synchronous>, transform_indices = @transform_43, window_bounds = array<i64: 1, 32>}, {pipeline_mode = #tpu.pipeline_mode<synchronous>, transform_indices = @transform_44, window_bounds = array<i64: 32, 10>}, {transform_indices = @transform_45, window_bounds = array<i64: 1, 1, 10>}]} {
    %c0 = arith.constant 0 : index
    %c0_0 = arith.constant 0 : index
    %c0_1 = arith.constant 0 : index
    %0 = vector.load %arg1[%c0, %c0_0, %c0_1] : memref<1x8x32xf32, #tpu.memory_space<vmem>>, vector<1x8x32xf32>
    %1 = vector.shape_cast %0 : vector<1x8x32xf32> to vector<8x32xf32>
    %c0_2 = arith.constant 0 : index
    %c0_3 = arith.constant 0 : index
    %c0_4 = arith.constant 0 : index
    %2 = vector.load %arg5[%c0_2, %c0_3, %c0_4] : memref<2x32x96xf32, #tpu.memory_space<vmem>>, vector<1x32x96xf32>
    %3 = vector.shape_cast %2 : vector<1x32x96xf32> to vector<32x96xf32>
    %c0_5 = arith.constant 0 : index
    %c0_6 = arith.constant 0 : index
    %c0_7 = arith.constant 0 : index
    %4 = vector.load %arg6[%c0_5, %c0_6, %c0_7] : memref<2x1x96xf32, #tpu.memory_space<vmem>>, vector<1x1x96xf32>
    %5 = vector.shape_cast %4 : vector<1x1x96xf32> to vector<1x96xf32>
    %c0_8 = arith.constant 0 : index
    %c0_9 = arith.constant 0 : index
    %c0_10 = arith.constant 0 : index
    %6 = vector.load %arg7[%c0_8, %c0_9, %c0_10] : memref<2x32x32xf32, #tpu.memory_space<vmem>>, vector<1x32x32xf32>
    %7 = vector.shape_cast %6 : vector<1x32x32xf32> to vector<32x32xf32>
    %c0_11 = arith.constant 0 : index
    %c0_12 = arith.constant 0 : index
    %c0_13 = arith.constant 0 : index
    %8 = vector.load %arg8[%c0_11, %c0_12, %c0_13] : memref<2x1x32xf32, #tpu.memory_space<vmem>>, vector<1x1x32xf32>
    %9 = vector.shape_cast %8 : vector<1x1x32xf32> to vector<1x32xf32>
    %cst = arith.constant dense<0.000000e+00> : vector<8x96xf32>
    %10 = tpu.matmul %1, %3, %cst {dimension_numbers = #tpu.dot_dimension_numbers<[1], [0], [0], [1], [0, 0, 1, 1], [], []>} : vector<8x32xf32>, vector<32x96xf32>, vector<8x96xf32> -> vector<8x96xf32>
    %11 = vector.broadcast %5 : vector<1x96xf32> to vector<8x96xf32>
    %12 = arith.addf %10, %11 : vector<8x96xf32>
    %13 = vector.extract_strided_slice %12 {offsets = [0, 0], sizes = [8, 16], strides = [1, 1]} : vector<8x96xf32> to vector<8x16xf32>
    %14 = vector.extract_strided_slice %12 {offsets = [0, 32], sizes = [8, 16], strides = [1, 1]} : vector<8x96xf32> to vector<8x16xf32>
    %15 = vector.extract_strided_slice %12 {offsets = [0, 64], sizes = [8, 16], strides = [1, 1]} : vector<8x96xf32> to vector<8x16xf32>
    %cst_14 = arith.constant dense<0.000000e+00> : vector<8x8xf32>
    %16 = tpu.matmul %13, %14, %cst_14 {dimension_numbers = #tpu.dot_dimension_numbers<[1], [1], [0], [0], [0, 0, 1, 0], [], []>} : vector<8x16xf32>, vector<8x16xf32>, vector<8x8xf32> -> vector<8x8xf32>
    %cst_15 = arith.constant 2.500000e-01 : f32
    %17 = vector.broadcast %cst_15 : f32 to vector<8x8xf32>
    %18 = arith.mulf %16, %17 : vector<8x8xf32>
    %cst_16 = arith.constant dense<0xFF800000> : vector<8xf32>
    %19 = vector.multi_reduction <maximumf>, %18, %cst_16 [1] : vector<8x8xf32> to vector<8xf32>
    %20 = vector.shape_cast %19 : vector<8xf32> to vector<8x1xf32>
    %21 = vector.broadcast %20 : vector<8x1xf32> to vector<8x8xf32>
    %22 = arith.subf %18, %21 : vector<8x8xf32>
    %23 = math.exp %22 : vector<8x8xf32>
    %cst_17 = arith.constant dense<0.000000e+00> : vector<8xf32>
    %24 = vector.multi_reduction <add>, %23, %cst_17 [1] : vector<8x8xf32> to vector<8xf32>
    %25 = vector.shape_cast %24 : vector<8xf32> to vector<8x1xf32>
    %26 = vector.broadcast %25 : vector<8x1xf32> to vector<8x8xf32>
    %27 = arith.divf %23, %26 : vector<8x8xf32>
    %cst_18 = arith.constant dense<0.000000e+00> : vector<8x16xf32>
    %28 = tpu.matmul %27, %15, %cst_18 {dimension_numbers = #tpu.dot_dimension_numbers<[1], [0], [0], [1], [0, 0, 1, 1], [], []>} : vector<8x8xf32>, vector<8x16xf32>, vector<8x16xf32> -> vector<8x16xf32>
    %29 = vector.extract_strided_slice %12 {offsets = [0, 16], sizes = [8, 16], strides = [1, 1]} : vector<8x96xf32> to vector<8x16xf32>
    %30 = vector.extract_strided_slice %12 {offsets = [0, 48], sizes = [8, 16], strides = [1, 1]} : vector<8x96xf32> to vector<8x16xf32>
    %31 = vector.extract_strided_slice %12 {offsets = [0, 80], sizes = [8, 16], strides = [1, 1]} : vector<8x96xf32> to vector<8x16xf32>
    %cst_19 = arith.constant dense<0.000000e+00> : vector<8x8xf32>
    %32 = tpu.matmul %29, %30, %cst_19 {dimension_numbers = #tpu.dot_dimension_numbers<[1], [1], [0], [0], [0, 0, 1, 0], [], []>} : vector<8x16xf32>, vector<8x16xf32>, vector<8x8xf32> -> vector<8x8xf32>
    %cst_20 = arith.constant 2.500000e-01 : f32
    %33 = vector.broadcast %cst_20 : f32 to vector<8x8xf32>
    %34 = arith.mulf %32, %33 : vector<8x8xf32>
    %cst_21 = arith.constant dense<0xFF800000> : vector<8xf32>
    %35 = vector.multi_reduction <maximumf>, %34, %cst_21 [1] : vector<8x8xf32> to vector<8xf32>
    %36 = vector.shape_cast %35 : vector<8xf32> to vector<8x1xf32>
    %37 = vector.broadcast %36 : vector<8x1xf32> to vector<8x8xf32>
    %38 = arith.subf %34, %37 : vector<8x8xf32>
    %39 = math.exp %38 : vector<8x8xf32>
    %cst_22 = arith.constant dense<0.000000e+00> : vector<8xf32>
    %40 = vector.multi_reduction <add>, %39, %cst_22 [1] : vector<8x8xf32> to vector<8xf32>
    %41 = vector.shape_cast %40 : vector<8xf32> to vector<8x1xf32>
    %42 = vector.broadcast %41 : vector<8x1xf32> to vector<8x8xf32>
    %43 = arith.divf %39, %42 : vector<8x8xf32>
    %cst_23 = arith.constant dense<0.000000e+00> : vector<8x16xf32>
    %44 = tpu.matmul %43, %31, %cst_23 {dimension_numbers = #tpu.dot_dimension_numbers<[1], [0], [0], [1], [0, 0, 1, 1], [], []>} : vector<8x8xf32>, vector<8x16xf32>, vector<8x16xf32> -> vector<8x16xf32>
    %45 = tpu.concatenate %28, %44 in 1 : vector<8x16xf32>, vector<8x16xf32> -> vector<8x32xf32>
    %cst_24 = arith.constant dense<0.000000e+00> : vector<8x32xf32>
    %46 = tpu.matmul %45, %7, %cst_24 {dimension_numbers = #tpu.dot_dimension_numbers<[1], [0], [0], [1], [0, 0, 1, 1], [], []>} : vector<8x32xf32>, vector<32x32xf32>, vector<8x32xf32> -> vector<8x32xf32>
    %47 = vector.broadcast %9 : vector<1x32xf32> to vector<8x32xf32>
    %48 = arith.addf %46, %47 : vector<8x32xf32>
    %49 = arith.addf %1, %48 : vector<8x32xf32>
    %c0_25 = arith.constant 0 : index
    %c0_26 = arith.constant 0 : index
    %c0_27 = arith.constant 0 : index
    %50 = vector.load %arg9[%c0_25, %c0_26, %c0_27] : memref<2x1x32xf32, #tpu.memory_space<vmem>>, vector<1x1x32xf32>
    %51 = vector.shape_cast %50 : vector<1x1x32xf32> to vector<1x32xf32>
    %c0_28 = arith.constant 0 : index
    %c0_29 = arith.constant 0 : index
    %c0_30 = arith.constant 0 : index
    %52 = vector.load %arg10[%c0_28, %c0_29, %c0_30] : memref<2x1x32xf32, #tpu.memory_space<vmem>>, vector<1x1x32xf32>
    %53 = vector.shape_cast %52 : vector<1x1x32xf32> to vector<1x32xf32>
    %cst_31 = arith.constant dense<0.000000e+00> : vector<8xf32>
    %54 = vector.multi_reduction <add>, %49, %cst_31 [1] : vector<8x32xf32> to vector<8xf32>
    %55 = vector.shape_cast %54 : vector<8xf32> to vector<8x1xf32>
    %cst_32 = arith.constant 3.200000e+01 : f32
    %56 = vector.broadcast %cst_32 : f32 to vector<8x1xf32>
    %57 = arith.divf %55, %56 : vector<8x1xf32>
    %58 = vector.broadcast %57 : vector<8x1xf32> to vector<8x32xf32>
    %59 = arith.subf %49, %58 : vector<8x32xf32>
    %60 = arith.mulf %59, %59 : vector<8x32xf32>
    %cst_33 = arith.constant dense<0.000000e+00> : vector<8xf32>
    %61 = vector.multi_reduction <add>, %60, %cst_33 [1] : vector<8x32xf32> to vector<8xf32>
    %62 = vector.shape_cast %61 : vector<8xf32> to vector<8x1xf32>
    %cst_34 = arith.constant 3.200000e+01 : f32
    %63 = vector.broadcast %cst_34 : f32 to vector<8x1xf32>
    %64 = arith.divf %62, %63 : vector<8x1xf32>
    %65 = vector.broadcast %57 : vector<8x1xf32> to vector<8x32xf32>
    %66 = arith.subf %49, %65 : vector<8x32xf32>
    %cst_35 = arith.constant 9.99999974E-6 : f32
    %67 = vector.broadcast %cst_35 : f32 to vector<8x1xf32>
    %68 = arith.addf %64, %67 : vector<8x1xf32>
    %69 = math.rsqrt %68 : vector<8x1xf32>
    %70 = vector.broadcast %69 : vector<8x1xf32> to vector<8x32xf32>
    %71 = arith.mulf %66, %70 : vector<8x32xf32>
    %72 = vector.broadcast %51 : vector<1x32xf32> to vector<8x32xf32>
    %73 = arith.mulf %71, %72 : vector<8x32xf32>
    %74 = vector.broadcast %53 : vector<1x32xf32> to vector<8x32xf32>
    %75 = arith.addf %73, %74 : vector<8x32xf32>
    %c0_36 = arith.constant 0 : index
    %c0_37 = arith.constant 0 : index
    %c0_38 = arith.constant 0 : index
    %76 = vector.load %arg11[%c0_36, %c0_37, %c0_38] : memref<2x32x64xf32, #tpu.memory_space<vmem>>, vector<1x32x64xf32>
    %77 = vector.shape_cast %76 : vector<1x32x64xf32> to vector<32x64xf32>
    %c0_39 = arith.constant 0 : index
    %c0_40 = arith.constant 0 : index
    %c0_41 = arith.constant 0 : index
    %78 = vector.load %arg12[%c0_39, %c0_40, %c0_41] : memref<2x1x64xf32, #tpu.memory_space<vmem>>, vector<1x1x64xf32>
    %79 = vector.shape_cast %78 : vector<1x1x64xf32> to vector<1x64xf32>
    %c0_42 = arith.constant 0 : index
    %c0_43 = arith.constant 0 : index
    %c0_44 = arith.constant 0 : index
    %80 = vector.load %arg13[%c0_42, %c0_43, %c0_44] : memref<2x64x32xf32, #tpu.memory_space<vmem>>, vector<1x64x32xf32>
    %81 = vector.shape_cast %80 : vector<1x64x32xf32> to vector<64x32xf32>
    %c0_45 = arith.constant 0 : index
    %c0_46 = arith.constant 0 : index
    %c0_47 = arith.constant 0 : index
    %82 = vector.load %arg14[%c0_45, %c0_46, %c0_47] : memref<2x1x32xf32, #tpu.memory_space<vmem>>, vector<1x1x32xf32>
    %83 = vector.shape_cast %82 : vector<1x1x32xf32> to vector<1x32xf32>
    %cst_48 = arith.constant dense<0.000000e+00> : vector<8x64xf32>
    %84 = tpu.matmul %75, %77, %cst_48 {dimension_numbers = #tpu.dot_dimension_numbers<[1], [0], [0], [1], [0, 0, 1, 1], [], []>} : vector<8x32xf32>, vector<32x64xf32>, vector<8x64xf32> -> vector<8x64xf32>
    %85 = vector.broadcast %79 : vector<1x64xf32> to vector<8x64xf32>
    %86 = arith.addf %84, %85 : vector<8x64xf32>
    %cst_49 = arith.constant 0.000000e+00 : f32
    %87 = vector.broadcast %cst_49 : f32 to vector<8x64xf32>
    %88 = arith.maximumf %86, %87 : vector<8x64xf32>
    %cst_50 = arith.constant dense<0.000000e+00> : vector<8x32xf32>
    %89 = tpu.matmul %88, %81, %cst_50 {dimension_numbers = #tpu.dot_dimension_numbers<[1], [0], [0], [1], [0, 0, 1, 1], [], []>} : vector<8x64xf32>, vector<64x32xf32>, vector<8x32xf32> -> vector<8x32xf32>
    %90 = vector.broadcast %83 : vector<1x32xf32> to vector<8x32xf32>
    %91 = arith.addf %89, %90 : vector<8x32xf32>
    %92 = arith.addf %75, %91 : vector<8x32xf32>
    %c0_51 = arith.constant 0 : index
    %c0_52 = arith.constant 0 : index
    %c0_53 = arith.constant 0 : index
    %93 = vector.load %arg15[%c0_51, %c0_52, %c0_53] : memref<2x1x32xf32, #tpu.memory_space<vmem>>, vector<1x1x32xf32>
    %94 = vector.shape_cast %93 : vector<1x1x32xf32> to vector<1x32xf32>
    %c0_54 = arith.constant 0 : index
    %c0_55 = arith.constant 0 : index
    %c0_56 = arith.constant 0 : index
    %95 = vector.load %arg16[%c0_54, %c0_55, %c0_56] : memref<2x1x32xf32, #tpu.memory_space<vmem>>, vector<1x1x32xf32>
    %96 = vector.shape_cast %95 : vector<1x1x32xf32> to vector<1x32xf32>
    %cst_57 = arith.constant dense<0.000000e+00> : vector<8xf32>
    %97 = vector.multi_reduction <add>, %92, %cst_57 [1] : vector<8x32xf32> to vector<8xf32>
    %98 = vector.shape_cast %97 : vector<8xf32> to vector<8x1xf32>
    %cst_58 = arith.constant 3.200000e+01 : f32
    %99 = vector.broadcast %cst_58 : f32 to vector<8x1xf32>
    %100 = arith.divf %98, %99 : vector<8x1xf32>
    %101 = vector.broadcast %100 : vector<8x1xf32> to vector<8x32xf32>
    %102 = arith.subf %92, %101 : vector<8x32xf32>
    %103 = arith.mulf %102, %102 : vector<8x32xf32>
    %cst_59 = arith.constant dense<0.000000e+00> : vector<8xf32>
    %104 = vector.multi_reduction <add>, %103, %cst_59 [1] : vector<8x32xf32> to vector<8xf32>
    %105 = vector.shape_cast %104 : vector<8xf32> to vector<8x1xf32>
    %cst_60 = arith.constant 3.200000e+01 : f32
    %106 = vector.broadcast %cst_60 : f32 to vector<8x1xf32>
    %107 = arith.divf %105, %106 : vector<8x1xf32>
    %108 = vector.broadcast %100 : vector<8x1xf32> to vector<8x32xf32>
    %109 = arith.subf %92, %108 : vector<8x32xf32>
    %cst_61 = arith.constant 9.99999974E-6 : f32
    %110 = vector.broadcast %cst_61 : f32 to vector<8x1xf32>
    %111 = arith.addf %107, %110 : vector<8x1xf32>
    %112 = math.rsqrt %111 : vector<8x1xf32>
    %113 = vector.broadcast %112 : vector<8x1xf32> to vector<8x32xf32>
    %114 = arith.mulf %109, %113 : vector<8x32xf32>
    %115 = vector.broadcast %94 : vector<1x32xf32> to vector<8x32xf32>
    %116 = arith.mulf %114, %115 : vector<8x32xf32>
    %117 = vector.broadcast %96 : vector<1x32xf32> to vector<8x32xf32>
    %118 = arith.addf %116, %117 : vector<8x32xf32>
    %c1 = arith.constant 1 : index
    %c0_62 = arith.constant 0 : index
    %c0_63 = arith.constant 0 : index
    %119 = vector.load %arg5[%c1, %c0_62, %c0_63] : memref<2x32x96xf32, #tpu.memory_space<vmem>>, vector<1x32x96xf32>
    %120 = vector.shape_cast %119 : vector<1x32x96xf32> to vector<32x96xf32>
    %c1_64 = arith.constant 1 : index
    %c0_65 = arith.constant 0 : index
    %c0_66 = arith.constant 0 : index
    %121 = vector.load %arg6[%c1_64, %c0_65, %c0_66] : memref<2x1x96xf32, #tpu.memory_space<vmem>>, vector<1x1x96xf32>
    %122 = vector.shape_cast %121 : vector<1x1x96xf32> to vector<1x96xf32>
    %c1_67 = arith.constant 1 : index
    %c0_68 = arith.constant 0 : index
    %c0_69 = arith.constant 0 : index
    %123 = vector.load %arg7[%c1_67, %c0_68, %c0_69] : memref<2x32x32xf32, #tpu.memory_space<vmem>>, vector<1x32x32xf32>
    %124 = vector.shape_cast %123 : vector<1x32x32xf32> to vector<32x32xf32>
    %c1_70 = arith.constant 1 : index
    %c0_71 = arith.constant 0 : index
    %c0_72 = arith.constant 0 : index
    %125 = vector.load %arg8[%c1_70, %c0_71, %c0_72] : memref<2x1x32xf32, #tpu.memory_space<vmem>>, vector<1x1x32xf32>
    %126 = vector.shape_cast %125 : vector<1x1x32xf32> to vector<1x32xf32>
    %cst_73 = arith.constant dense<0.000000e+00> : vector<8x96xf32>
    %127 = tpu.matmul %118, %120, %cst_73 {dimension_numbers = #tpu.dot_dimension_numbers<[1], [0], [0], [1], [0, 0, 1, 1], [], []>} : vector<8x32xf32>, vector<32x96xf32>, vector<8x96xf32> -> vector<8x96xf32>
    %128 = vector.broadcast %122 : vector<1x96xf32> to vector<8x96xf32>
    %129 = arith.addf %127, %128 : vector<8x96xf32>
    %130 = vector.extract_strided_slice %129 {offsets = [0, 0], sizes = [8, 16], strides = [1, 1]} : vector<8x96xf32> to vector<8x16xf32>
    %131 = vector.extract_strided_slice %129 {offsets = [0, 32], sizes = [8, 16], strides = [1, 1]} : vector<8x96xf32> to vector<8x16xf32>
    %132 = vector.extract_strided_slice %129 {offsets = [0, 64], sizes = [8, 16], strides = [1, 1]} : vector<8x96xf32> to vector<8x16xf32>
    %cst_74 = arith.constant dense<0.000000e+00> : vector<8x8xf32>
    %133 = tpu.matmul %130, %131, %cst_74 {dimension_numbers = #tpu.dot_dimension_numbers<[1], [1], [0], [0], [0, 0, 1, 0], [], []>} : vector<8x16xf32>, vector<8x16xf32>, vector<8x8xf32> -> vector<8x8xf32>
    %cst_75 = arith.constant 2.500000e-01 : f32
    %134 = vector.broadcast %cst_75 : f32 to vector<8x8xf32>
    %135 = arith.mulf %133, %134 : vector<8x8xf32>
    %cst_76 = arith.constant dense<0xFF800000> : vector<8xf32>
    %136 = vector.multi_reduction <maximumf>, %135, %cst_76 [1] : vector<8x8xf32> to vector<8xf32>
    %137 = vector.shape_cast %136 : vector<8xf32> to vector<8x1xf32>
    %138 = vector.broadcast %137 : vector<8x1xf32> to vector<8x8xf32>
    %139 = arith.subf %135, %138 : vector<8x8xf32>
    %140 = math.exp %139 : vector<8x8xf32>
    %cst_77 = arith.constant dense<0.000000e+00> : vector<8xf32>
    %141 = vector.multi_reduction <add>, %140, %cst_77 [1] : vector<8x8xf32> to vector<8xf32>
    %142 = vector.shape_cast %141 : vector<8xf32> to vector<8x1xf32>
    %143 = vector.broadcast %142 : vector<8x1xf32> to vector<8x8xf32>
    %144 = arith.divf %140, %143 : vector<8x8xf32>
    %cst_78 = arith.constant dense<0.000000e+00> : vector<8x16xf32>
    %145 = tpu.matmul %144, %132, %cst_78 {dimension_numbers = #tpu.dot_dimension_numbers<[1], [0], [0], [1], [0, 0, 1, 1], [], []>} : vector<8x8xf32>, vector<8x16xf32>, vector<8x16xf32> -> vector<8x16xf32>
    %146 = vector.extract_strided_slice %129 {offsets = [0, 16], sizes = [8, 16], strides = [1, 1]} : vector<8x96xf32> to vector<8x16xf32>
    %147 = vector.extract_strided_slice %129 {offsets = [0, 48], sizes = [8, 16], strides = [1, 1]} : vector<8x96xf32> to vector<8x16xf32>
    %148 = vector.extract_strided_slice %129 {offsets = [0, 80], sizes = [8, 16], strides = [1, 1]} : vector<8x96xf32> to vector<8x16xf32>
    %cst_79 = arith.constant dense<0.000000e+00> : vector<8x8xf32>
    %149 = tpu.matmul %146, %147, %cst_79 {dimension_numbers = #tpu.dot_dimension_numbers<[1], [1], [0], [0], [0, 0, 1, 0], [], []>} : vector<8x16xf32>, vector<8x16xf32>, vector<8x8xf32> -> vector<8x8xf32>
    %cst_80 = arith.constant 2.500000e-01 : f32
    %150 = vector.broadcast %cst_80 : f32 to vector<8x8xf32>
    %151 = arith.mulf %149, %150 : vector<8x8xf32>
    %cst_81 = arith.constant dense<0xFF800000> : vector<8xf32>
    %152 = vector.multi_reduction <maximumf>, %151, %cst_81 [1] : vector<8x8xf32> to vector<8xf32>
    %153 = vector.shape_cast %152 : vector<8xf32> to vector<8x1xf32>
    %154 = vector.broadcast %153 : vector<8x1xf32> to vector<8x8xf32>
    %155 = arith.subf %151, %154 : vector<8x8xf32>
    %156 = math.exp %155 : vector<8x8xf32>
    %cst_82 = arith.constant dense<0.000000e+00> : vector<8xf32>
    %157 = vector.multi_reduction <add>, %156, %cst_82 [1] : vector<8x8xf32> to vector<8xf32>
    %158 = vector.shape_cast %157 : vector<8xf32> to vector<8x1xf32>
    %159 = vector.broadcast %158 : vector<8x1xf32> to vector<8x8xf32>
    %160 = arith.divf %156, %159 : vector<8x8xf32>
    %cst_83 = arith.constant dense<0.000000e+00> : vector<8x16xf32>
    %161 = tpu.matmul %160, %148, %cst_83 {dimension_numbers = #tpu.dot_dimension_numbers<[1], [0], [0], [1], [0, 0, 1, 1], [], []>} : vector<8x8xf32>, vector<8x16xf32>, vector<8x16xf32> -> vector<8x16xf32>
    %162 = tpu.concatenate %145, %161 in 1 : vector<8x16xf32>, vector<8x16xf32> -> vector<8x32xf32>
    %cst_84 = arith.constant dense<0.000000e+00> : vector<8x32xf32>
    %163 = tpu.matmul %162, %124, %cst_84 {dimension_numbers = #tpu.dot_dimension_numbers<[1], [0], [0], [1], [0, 0, 1, 1], [], []>} : vector<8x32xf32>, vector<32x32xf32>, vector<8x32xf32> -> vector<8x32xf32>
    %164 = vector.broadcast %126 : vector<1x32xf32> to vector<8x32xf32>
    %165 = arith.addf %163, %164 : vector<8x32xf32>
    %166 = arith.addf %118, %165 : vector<8x32xf32>
    %c1_85 = arith.constant 1 : index
    %c0_86 = arith.constant 0 : index
    %c0_87 = arith.constant 0 : index
    %167 = vector.load %arg9[%c1_85, %c0_86, %c0_87] : memref<2x1x32xf32, #tpu.memory_space<vmem>>, vector<1x1x32xf32>
    %168 = vector.shape_cast %167 : vector<1x1x32xf32> to vector<1x32xf32>
    %c1_88 = arith.constant 1 : index
    %c0_89 = arith.constant 0 : index
    %c0_90 = arith.constant 0 : index
    %169 = vector.load %arg10[%c1_88, %c0_89, %c0_90] : memref<2x1x32xf32, #tpu.memory_space<vmem>>, vector<1x1x32xf32>
    %170 = vector.shape_cast %169 : vector<1x1x32xf32> to vector<1x32xf32>
    %cst_91 = arith.constant dense<0.000000e+00> : vector<8xf32>
    %171 = vector.multi_reduction <add>, %166, %cst_91 [1] : vector<8x32xf32> to vector<8xf32>
    %172 = vector.shape_cast %171 : vector<8xf32> to vector<8x1xf32>
    %cst_92 = arith.constant 3.200000e+01 : f32
    %173 = vector.broadcast %cst_92 : f32 to vector<8x1xf32>
    %174 = arith.divf %172, %173 : vector<8x1xf32>
    %175 = vector.broadcast %174 : vector<8x1xf32> to vector<8x32xf32>
    %176 = arith.subf %166, %175 : vector<8x32xf32>
    %177 = arith.mulf %176, %176 : vector<8x32xf32>
    %cst_93 = arith.constant dense<0.000000e+00> : vector<8xf32>
    %178 = vector.multi_reduction <add>, %177, %cst_93 [1] : vector<8x32xf32> to vector<8xf32>
    %179 = vector.shape_cast %178 : vector<8xf32> to vector<8x1xf32>
    %cst_94 = arith.constant 3.200000e+01 : f32
    %180 = vector.broadcast %cst_94 : f32 to vector<8x1xf32>
    %181 = arith.divf %179, %180 : vector<8x1xf32>
    %182 = vector.broadcast %174 : vector<8x1xf32> to vector<8x32xf32>
    %183 = arith.subf %166, %182 : vector<8x32xf32>
    %cst_95 = arith.constant 9.99999974E-6 : f32
    %184 = vector.broadcast %cst_95 : f32 to vector<8x1xf32>
    %185 = arith.addf %181, %184 : vector<8x1xf32>
    %186 = math.rsqrt %185 : vector<8x1xf32>
    %187 = vector.broadcast %186 : vector<8x1xf32> to vector<8x32xf32>
    %188 = arith.mulf %183, %187 : vector<8x32xf32>
    %189 = vector.broadcast %168 : vector<1x32xf32> to vector<8x32xf32>
    %190 = arith.mulf %188, %189 : vector<8x32xf32>
    %191 = vector.broadcast %170 : vector<1x32xf32> to vector<8x32xf32>
    %192 = arith.addf %190, %191 : vector<8x32xf32>
    %c1_96 = arith.constant 1 : index
    %c0_97 = arith.constant 0 : index
    %c0_98 = arith.constant 0 : index
    %193 = vector.load %arg11[%c1_96, %c0_97, %c0_98] : memref<2x32x64xf32, #tpu.memory_space<vmem>>, vector<1x32x64xf32>
    %194 = vector.shape_cast %193 : vector<1x32x64xf32> to vector<32x64xf32>
    %c1_99 = arith.constant 1 : index
    %c0_100 = arith.constant 0 : index
    %c0_101 = arith.constant 0 : index
    %195 = vector.load %arg12[%c1_99, %c0_100, %c0_101] : memref<2x1x64xf32, #tpu.memory_space<vmem>>, vector<1x1x64xf32>
    %196 = vector.shape_cast %195 : vector<1x1x64xf32> to vector<1x64xf32>
    %c1_102 = arith.constant 1 : index
    %c0_103 = arith.constant 0 : index
    %c0_104 = arith.constant 0 : index
    %197 = vector.load %arg13[%c1_102, %c0_103, %c0_104] : memref<2x64x32xf32, #tpu.memory_space<vmem>>, vector<1x64x32xf32>
    %198 = vector.shape_cast %197 : vector<1x64x32xf32> to vector<64x32xf32>
    %c1_105 = arith.constant 1 : index
    %c0_106 = arith.constant 0 : index
    %c0_107 = arith.constant 0 : index
    %199 = vector.load %arg14[%c1_105, %c0_106, %c0_107] : memref<2x1x32xf32, #tpu.memory_space<vmem>>, vector<1x1x32xf32>
    %200 = vector.shape_cast %199 : vector<1x1x32xf32> to vector<1x32xf32>
    %cst_108 = arith.constant dense<0.000000e+00> : vector<8x64xf32>
    %201 = tpu.matmul %192, %194, %cst_108 {dimension_numbers = #tpu.dot_dimension_numbers<[1], [0], [0], [1], [0, 0, 1, 1], [], []>} : vector<8x32xf32>, vector<32x64xf32>, vector<8x64xf32> -> vector<8x64xf32>
    %202 = vector.broadcast %196 : vector<1x64xf32> to vector<8x64xf32>
    %203 = arith.addf %201, %202 : vector<8x64xf32>
    %cst_109 = arith.constant 0.000000e+00 : f32
    %204 = vector.broadcast %cst_109 : f32 to vector<8x64xf32>
    %205 = arith.maximumf %203, %204 : vector<8x64xf32>
    %cst_110 = arith.constant dense<0.000000e+00> : vector<8x32xf32>
    %206 = tpu.matmul %205, %198, %cst_110 {dimension_numbers = #tpu.dot_dimension_numbers<[1], [0], [0], [1], [0, 0, 1, 1], [], []>} : vector<8x64xf32>, vector<64x32xf32>, vector<8x32xf32> -> vector<8x32xf32>
    %207 = vector.broadcast %200 : vector<1x32xf32> to vector<8x32xf32>
    %208 = arith.addf %206, %207 : vector<8x32xf32>
    %209 = arith.addf %192, %208 : vector<8x32xf32>
    %c1_111 = arith.constant 1 : index
    %c0_112 = arith.constant 0 : index
    %c0_113 = arith.constant 0 : index
    %210 = vector.load %arg15[%c1_111, %c0_112, %c0_113] : memref<2x1x32xf32, #tpu.memory_space<vmem>>, vector<1x1x32xf32>
    %211 = vector.shape_cast %210 : vector<1x1x32xf32> to vector<1x32xf32>
    %c1_114 = arith.constant 1 : index
    %c0_115 = arith.constant 0 : index
    %c0_116 = arith.constant 0 : index
    %212 = vector.load %arg16[%c1_114, %c0_115, %c0_116] : memref<2x1x32xf32, #tpu.memory_space<vmem>>, vector<1x1x32xf32>
    %213 = vector.shape_cast %212 : vector<1x1x32xf32> to vector<1x32xf32>
    %cst_117 = arith.constant dense<0.000000e+00> : vector<8xf32>
    %214 = vector.multi_reduction <add>, %209, %cst_117 [1] : vector<8x32xf32> to vector<8xf32>
    %215 = vector.shape_cast %214 : vector<8xf32> to vector<8x1xf32>
    %cst_118 = arith.constant 3.200000e+01 : f32
    %216 = vector.broadcast %cst_118 : f32 to vector<8x1xf32>
    %217 = arith.divf %215, %216 : vector<8x1xf32>
    %218 = vector.broadcast %217 : vector<8x1xf32> to vector<8x32xf32>
    %219 = arith.subf %209, %218 : vector<8x32xf32>
    %220 = arith.mulf %219, %219 : vector<8x32xf32>
    %cst_119 = arith.constant dense<0.000000e+00> : vector<8xf32>
    %221 = vector.multi_reduction <add>, %220, %cst_119 [1] : vector<8x32xf32> to vector<8xf32>
    %222 = vector.shape_cast %221 : vector<8xf32> to vector<8x1xf32>
    %cst_120 = arith.constant 3.200000e+01 : f32
    %223 = vector.broadcast %cst_120 : f32 to vector<8x1xf32>
    %224 = arith.divf %222, %223 : vector<8x1xf32>
    %225 = vector.broadcast %217 : vector<8x1xf32> to vector<8x32xf32>
    %226 = arith.subf %209, %225 : vector<8x32xf32>
    %cst_121 = arith.constant 9.99999974E-6 : f32
    %227 = vector.broadcast %cst_121 : f32 to vector<8x1xf32>
    %228 = arith.addf %224, %227 : vector<8x1xf32>
    %229 = math.rsqrt %228 : vector<8x1xf32>
    %230 = vector.broadcast %229 : vector<8x1xf32> to vector<8x32xf32>
    %231 = arith.mulf %226, %230 : vector<8x32xf32>
    %232 = vector.broadcast %211 : vector<1x32xf32> to vector<8x32xf32>
    %233 = arith.mulf %231, %232 : vector<8x32xf32>
    %234 = vector.broadcast %213 : vector<1x32xf32> to vector<8x32xf32>
    %235 = arith.addf %233, %234 : vector<8x32xf32>
    %236 = vector.extract_strided_slice %235 {offsets = [0, 0], sizes = [1, 32], strides = [1, 1]} : vector<8x32xf32> to vector<1x32xf32>
    %c0_122 = arith.constant 0 : index
    %c0_123 = arith.constant 0 : index
    %237 = vector.load %arg47[%c0_122, %c0_123] : memref<1x256xf32, #tpu.memory_space<vmem>>, vector<1x32xf32>
    tpu.vector_store %arg47[%c0_122, %c0_123], %236 {strides = array<i32>} : memref<1x256xf32, #tpu.memory_space<vmem>>, vector<1x32xf32>,
    %238 = vector.extract_strided_slice %235 {offsets = [1, 0], sizes = [1, 32], strides = [1, 1]} : vector<8x32xf32> to vector<1x32xf32>
    %c0_124 = arith.constant 0 : index
    %c32 = arith.constant 32 : index
    %239 = vector.load %arg47[%c0_124, %c32] : memref<1x256xf32, #tpu.memory_space<vmem>>, vector<1x32xf32>
    tpu.vector_store %arg47[%c0_124, %c32], %238 {strides = array<i32>} : memref<1x256xf32, #tpu.memory_space<vmem>>, vector<1x32xf32>,
    %240 = vector.extract_strided_slice %235 {offsets = [2, 0], sizes = [1, 32], strides = [1, 1]} : vector<8x32xf32> to vector<1x32xf32>
    %c0_125 = arith.constant 0 : index
    %c64 = arith.constant 64 : index
    %241 = vector.load %arg47[%c0_125, %c64] : memref<1x256xf32, #tpu.memory_space<vmem>>, vector<1x32xf32>
    tpu.vector_store %arg47[%c0_125, %c64], %240 {strides = array<i32>} : memref<1x256xf32, #tpu.memory_space<vmem>>, vector<1x32xf32>,
    %242 = vector.extract_strided_slice %235 {offsets = [3, 0], sizes = [1, 32], strides = [1, 1]} : vector<8x32xf32> to vector<1x32xf32>
    %c0_126 = arith.constant 0 : index
    %c96 = arith.constant 96 : index
    %243 = vector.load %arg47[%c0_126, %c96] : memref<1x256xf32, #tpu.memory_space<vmem>>, vector<1x32xf32>
    tpu.vector_store %arg47[%c0_126, %c96], %242 {strides = array<i32>} : memref<1x256xf32, #tpu.memory_space<vmem>>, vector<1x32xf32>,
    %244 = vector.extract_strided_slice %235 {offsets = [4, 0], sizes = [1, 32], strides = [1, 1]} : vector<8x32xf32> to vector<1x32xf32>
    %c0_127 = arith.constant 0 : index
    %c128 = arith.constant 128 : index
    %245 = vector.load %arg47[%c0_127, %c128] : memref<1x256xf32, #tpu.memory_space<vmem>>, vector<1x32xf32>
    tpu.vector_store %arg47[%c0_127, %c128], %244 {strides = array<i32>} : memref<1x256xf32, #tpu.memory_space<vmem>>, vector<1x32xf32>,
    %246 = vector.extract_strided_slice %235 {offsets = [5, 0], sizes = [1, 32], strides = [1, 1]} : vector<8x32xf32> to vector<1x32xf32>
    %c0_128 = arith.constant 0 : index
    %c160 = arith.constant 160 : index
    %247 = vector.load %arg47[%c0_128, %c160] : memref<1x256xf32, #tpu.memory_space<vmem>>, vector<1x32xf32>
    tpu.vector_store %arg47[%c0_128, %c160], %246 {strides = array<i32>} : memref<1x256xf32, #tpu.memory_space<vmem>>, vector<1x32xf32>,
    %248 = vector.extract_strided_slice %235 {offsets = [6, 0], sizes = [1, 32], strides = [1, 1]} : vector<8x32xf32> to vector<1x32xf32>
    %c0_129 = arith.constant 0 : index
    %c192 = arith.constant 192 : index
    %249 = vector.load %arg47[%c0_129, %c192] : memref<1x256xf32, #tpu.memory_space<vmem>>, vector<1x32xf32>
    tpu.vector_store %arg47[%c0_129, %c192], %248 {strides = array<i32>} : memref<1x256xf32, #tpu.memory_space<vmem>>, vector<1x32xf32>,
    %250 = vector.extract_strided_slice %235 {offsets = [7, 0], sizes = [1, 32], strides = [1, 1]} : vector<8x32xf32> to vector<1x32xf32>
    %c0_130 = arith.constant 0 : index
    %c224 = arith.constant 224 : index
    %251 = vector.load %arg47[%c0_130, %c224] : memref<1x256xf32, #tpu.memory_space<vmem>>, vector<1x32xf32>
    tpu.vector_store %arg47[%c0_130, %c224], %250 {strides = array<i32>} : memref<1x256xf32, #tpu.memory_space<vmem>>, vector<1x32xf32>,
    %c0_131 = arith.constant 0 : index
    %c0_132 = arith.constant 0 : index
    %252 = vector.load %arg47[%c0_131, %c0_132] : memref<1x256xf32, #tpu.memory_space<vmem>>, vector<1x256xf32>
    %c0_133 = arith.constant 0 : index
    %c0_134 = arith.constant 0 : index
    %253 = vector.load %arg19[%c0_133, %c0_134] : memref<256x256xf32, #tpu.memory_space<vmem>>, vector<256x256xf32>
    %cst_135 = arith.constant dense<0.000000e+00> : vector<1x256xf32>
    %254 = tpu.matmul %252, %253, %cst_135 {dimension_numbers = #tpu.dot_dimension_numbers<[1], [0], [0], [1], [0, 0, 1, 1], [], []>} : vector<1x256xf32>, vector<256x256xf32>, vector<1x256xf32> -> vector<1x256xf32>
    %c0_136 = arith.constant 0 : index
    %c0_137 = arith.constant 0 : index
    %c0_138 = arith.constant 0 : index
    %255 = vector.load %arg2[%c0_136, %c0_137, %c0_138] : memref<1x1x8xf32, #tpu.memory_space<vmem>>, vector<1x1x8xf32>
    %256 = vector.shape_cast %255 : vector<1x1x8xf32> to vector<1x8xf32>
    %c0_139 = arith.constant 0 : index
    %c0_140 = arith.constant 0 : index
    %257 = vector.load %arg17[%c0_139, %c0_140] : memref<8x8xf32, #tpu.memory_space<vmem>>, vector<8x8xf32>
    %cst_141 = arith.constant dense<0.000000e+00> : vector<1x8xf32>
    %258 = tpu.matmul %256, %257, %cst_141 {dimension_numbers = #tpu.dot_dimension_numbers<[1], [0], [0], [1], [0, 0, 1, 1], [], []>} : vector<1x8xf32>, vector<8x8xf32>, vector<1x8xf32> -> vector<1x8xf32>
    %c0_142 = arith.constant 0 : index
    %c0_143 = arith.constant 0 : index
    %259 = vector.load %arg18[%c0_142, %c0_143] : memref<1x8xf32, #tpu.memory_space<vmem>>, vector<1x8xf32>
    %260 = arith.addf %258, %259 : vector<1x8xf32>
    %cst_144 = arith.constant 0.000000e+00 : f32
    %261 = vector.broadcast %cst_144 : f32 to vector<1x8xf32>
    %262 = arith.maximumf %260, %261 : vector<1x8xf32>
    %c0_145 = arith.constant 0 : index
    %c0_146 = arith.constant 0 : index
    %263 = vector.load %arg20[%c0_145, %c0_146] : memref<8x256xf32, #tpu.memory_space<vmem>>, vector<8x256xf32>
    %cst_147 = arith.constant dense<0.000000e+00> : vector<1x256xf32>
    %264 = tpu.matmul %262, %263, %cst_147 {dimension_numbers = #tpu.dot_dimension_numbers<[1], [0], [0], [1], [0, 0, 1, 1], [], []>} : vector<1x8xf32>, vector<8x256xf32>, vector<1x256xf32> -> vector<1x256xf32>
    %265 = arith.addf %254, %264 : vector<1x256xf32>
    %266 = vector.extract_strided_slice %265 {offsets = [0, 0], sizes = [1, 32], strides = [1, 1]} : vector<1x256xf32> to vector<1x32xf32>
    %c0_148 = arith.constant 0 : index
    %c0_149 = arith.constant 0 : index
    %267 = vector.load %arg49[%c0_148, %c0_149] : memref<8x32xf32, #tpu.memory_space<vmem>>, vector<1x32xf32>
    tpu.vector_store %arg49[%c0_148, %c0_149], %266 {strides = array<i32>} : memref<8x32xf32, #tpu.memory_space<vmem>>, vector<1x32xf32>,
    %268 = vector.extract_strided_slice %265 {offsets = [0, 32], sizes = [1, 32], strides = [1, 1]} : vector<1x256xf32> to vector<1x32xf32>
    %c1_150 = arith.constant 1 : index
    %c0_151 = arith.constant 0 : index
    %269 = vector.load %arg49[%c1_150, %c0_151] : memref<8x32xf32, #tpu.memory_space<vmem>>, vector<1x32xf32>
    tpu.vector_store %arg49[%c1_150, %c0_151], %268 {strides = array<i32>} : memref<8x32xf32, #tpu.memory_space<vmem>>, vector<1x32xf32>,
    %270 = vector.extract_strided_slice %265 {offsets = [0, 64], sizes = [1, 32], strides = [1, 1]} : vector<1x256xf32> to vector<1x32xf32>
    %c2 = arith.constant 2 : index
    %c0_152 = arith.constant 0 : index
    %271 = vector.load %arg49[%c2, %c0_152] : memref<8x32xf32, #tpu.memory_space<vmem>>, vector<1x32xf32>
    tpu.vector_store %arg49[%c2, %c0_152], %270 {strides = array<i32>} : memref<8x32xf32, #tpu.memory_space<vmem>>, vector<1x32xf32>,
    %272 = vector.extract_strided_slice %265 {offsets = [0, 96], sizes = [1, 32], strides = [1, 1]} : vector<1x256xf32> to vector<1x32xf32>
    %c3 = arith.constant 3 : index
    %c0_153 = arith.constant 0 : index
    %273 = vector.load %arg49[%c3, %c0_153] : memref<8x32xf32, #tpu.memory_space<vmem>>, vector<1x32xf32>
    tpu.vector_store %arg49[%c3, %c0_153], %272 {strides = array<i32>} : memref<8x32xf32, #tpu.memory_space<vmem>>, vector<1x32xf32>,
    %274 = vector.extract_strided_slice %265 {offsets = [0, 128], sizes = [1, 32], strides = [1, 1]} : vector<1x256xf32> to vector<1x32xf32>
    %c4 = arith.constant 4 : index
    %c0_154 = arith.constant 0 : index
    %275 = vector.load %arg49[%c4, %c0_154] : memref<8x32xf32, #tpu.memory_space<vmem>>, vector<1x32xf32>
    tpu.vector_store %arg49[%c4, %c0_154], %274 {strides = array<i32>} : memref<8x32xf32, #tpu.memory_space<vmem>>, vector<1x32xf32>,
    %276 = vector.extract_strided_slice %265 {offsets = [0, 160], sizes = [1, 32], strides = [1, 1]} : vector<1x256xf32> to vector<1x32xf32>
    %c5 = arith.constant 5 : index
    %c0_155 = arith.constant 0 : index
    %277 = vector.load %arg49[%c5, %c0_155] : memref<8x32xf32, #tpu.memory_space<vmem>>, vector<1x32xf32>
    tpu.vector_store %arg49[%c5, %c0_155], %276 {strides = array<i32>} : memref<8x32xf32, #tpu.memory_space<vmem>>, vector<1x32xf32>,
    %278 = vector.extract_strided_slice %265 {offsets = [0, 192], sizes = [1, 32], strides = [1, 1]} : vector<1x256xf32> to vector<1x32xf32>
    %c6 = arith.constant 6 : index
    %c0_156 = arith.constant 0 : index
    %279 = vector.load %arg49[%c6, %c0_156] : memref<8x32xf32, #tpu.memory_space<vmem>>, vector<1x32xf32>
    tpu.vector_store %arg49[%c6, %c0_156], %278 {strides = array<i32>} : memref<8x32xf32, #tpu.memory_space<vmem>>, vector<1x32xf32>,
    %280 = vector.extract_strided_slice %265 {offsets = [0, 224], sizes = [1, 32], strides = [1, 1]} : vector<1x256xf32> to vector<1x32xf32>
    %c7 = arith.constant 7 : index
    %c0_157 = arith.constant 0 : index
    %281 = vector.load %arg49[%c7, %c0_157] : memref<8x32xf32, #tpu.memory_space<vmem>>, vector<1x32xf32>
    tpu.vector_store %arg49[%c7, %c0_157], %280 {strides = array<i32>} : memref<8x32xf32, #tpu.memory_space<vmem>>, vector<1x32xf32>,
    %c0_158 = arith.constant 0 : index
    %c0_159 = arith.constant 0 : index
    %282 = vector.load %arg49[%c0_158, %c0_159] : memref<8x32xf32, #tpu.memory_space<vmem>>, vector<8x32xf32>
    %c0_160 = arith.constant 0 : index
    %c0_161 = arith.constant 0 : index
    %283 = vector.load %arg4[%c0_160, %c0_161] : memref<8x8xf32, #tpu.memory_space<vmem>>, vector<8x8xf32>
    %cst_162 = arith.constant 0.000000e+00 : f32
    %284 = vector.broadcast %cst_162 : f32 to vector<8x32xf32>
    %c0_163 = arith.constant 0 : index
    %c0_164 = arith.constant 0 : index
    %c0_165 = arith.constant 0 : index
    %c0_166 = arith.constant 0 : index
    %285 = vector.load %arg3[%c0_163, %c0_164, %c0_165, %c0_166] : memref<1x2x8x32xf32, #tpu.memory_space<vmem>>, vector<1x1x8x32xf32>
    %286 = vector.shape_cast %285 : vector<1x1x8x32xf32> to vector<8x32xf32>
    %c0_167 = arith.constant 0 : index
    %c0_168 = arith.constant 0 : index
    %c0_169 = arith.constant 0 : index
    %c0_170 = arith.constant 0 : index
    %287 = vector.load %arg21[%c0_167, %c0_168, %c0_169, %c0_170] : memref<2x1x32x96xf32, #tpu.memory_space<vmem>>, vector<1x1x32x96xf32>
    %288 = vector.shape_cast %287 : vector<1x1x32x96xf32> to vector<32x96xf32>
    %c0_171 = arith.constant 0 : index
    %c0_172 = arith.constant 0 : index
    %c0_173 = arith.constant 0 : index
    %c0_174 = arith.constant 0 : index
    %289 = vector.load %arg22[%c0_171, %c0_172, %c0_173, %c0_174] : memref<2x1x1x96xf32, #tpu.memory_space<vmem>>, vector<1x1x1x96xf32>
    %290 = vector.shape_cast %289 : vector<1x1x1x96xf32> to vector<1x96xf32>
    %c0_175 = arith.constant 0 : index
    %c0_176 = arith.constant 0 : index
    %c0_177 = arith.constant 0 : index
    %c0_178 = arith.constant 0 : index
    %291 = vector.load %arg23[%c0_175, %c0_176, %c0_177, %c0_178] : memref<2x1x32x32xf32, #tpu.memory_space<vmem>>, vector<1x1x32x32xf32>
    %292 = vector.shape_cast %291 : vector<1x1x32x32xf32> to vector<32x32xf32>
    %c0_179 = arith.constant 0 : index
    %c0_180 = arith.constant 0 : index
    %c0_181 = arith.constant 0 : index
    %c0_182 = arith.constant 0 : index
    %293 = vector.load %arg24[%c0_179, %c0_180, %c0_181, %c0_182] : memref<2x1x1x32xf32, #tpu.memory_space<vmem>>, vector<1x1x1x32xf32>
    %294 = vector.shape_cast %293 : vector<1x1x1x32xf32> to vector<1x32xf32>
    %cst_183 = arith.constant dense<0.000000e+00> : vector<8x96xf32>
    %295 = tpu.matmul %286, %288, %cst_183 {dimension_numbers = #tpu.dot_dimension_numbers<[1], [0], [0], [1], [0, 0, 1, 1], [], []>} : vector<8x32xf32>, vector<32x96xf32>, vector<8x96xf32> -> vector<8x96xf32>
    %296 = vector.broadcast %290 : vector<1x96xf32> to vector<8x96xf32>
    %297 = arith.addf %295, %296 : vector<8x96xf32>
    %298 = vector.extract_strided_slice %297 {offsets = [0, 0], sizes = [8, 16], strides = [1, 1]} : vector<8x96xf32> to vector<8x16xf32>
    %299 = vector.extract_strided_slice %297 {offsets = [0, 32], sizes = [8, 16], strides = [1, 1]} : vector<8x96xf32> to vector<8x16xf32>
    %300 = vector.extract_strided_slice %297 {offsets = [0, 64], sizes = [8, 16], strides = [1, 1]} : vector<8x96xf32> to vector<8x16xf32>
    %cst_184 = arith.constant dense<0.000000e+00> : vector<8x8xf32>
    %301 = tpu.matmul %298, %299, %cst_184 {dimension_numbers = #tpu.dot_dimension_numbers<[1], [1], [0], [0], [0, 0, 1, 0], [], []>} : vector<8x16xf32>, vector<8x16xf32>, vector<8x8xf32> -> vector<8x8xf32>
    %cst_185 = arith.constant 2.500000e-01 : f32
    %302 = vector.broadcast %cst_185 : f32 to vector<8x8xf32>
    %303 = arith.mulf %301, %302 : vector<8x8xf32>
    %304 = arith.addf %303, %283 : vector<8x8xf32>
    %cst_186 = arith.constant dense<0xFF800000> : vector<8xf32>
    %305 = vector.multi_reduction <maximumf>, %304, %cst_186 [1] : vector<8x8xf32> to vector<8xf32>
    %306 = vector.shape_cast %305 : vector<8xf32> to vector<8x1xf32>
    %307 = vector.broadcast %306 : vector<8x1xf32> to vector<8x8xf32>
    %308 = arith.subf %304, %307 : vector<8x8xf32>
    %309 = math.exp %308 : vector<8x8xf32>
    %cst_187 = arith.constant dense<0.000000e+00> : vector<8xf32>
    %310 = vector.multi_reduction <add>, %309, %cst_187 [1] : vector<8x8xf32> to vector<8xf32>
    %311 = vector.shape_cast %310 : vector<8xf32> to vector<8x1xf32>
    %312 = vector.broadcast %311 : vector<8x1xf32> to vector<8x8xf32>
    %313 = arith.divf %309, %312 : vector<8x8xf32>
    %cst_188 = arith.constant dense<0.000000e+00> : vector<8x16xf32>
    %314 = tpu.matmul %313, %300, %cst_188 {dimension_numbers = #tpu.dot_dimension_numbers<[1], [0], [0], [1], [0, 0, 1, 1], [], []>} : vector<8x8xf32>, vector<8x16xf32>, vector<8x16xf32> -> vector<8x16xf32>
    %315 = vector.extract_strided_slice %297 {offsets = [0, 16], sizes = [8, 16], strides = [1, 1]} : vector<8x96xf32> to vector<8x16xf32>
    %316 = vector.extract_strided_slice %297 {offsets = [0, 48], sizes = [8, 16], strides = [1, 1]} : vector<8x96xf32> to vector<8x16xf32>
    %317 = vector.extract_strided_slice %297 {offsets = [0, 80], sizes = [8, 16], strides = [1, 1]} : vector<8x96xf32> to vector<8x16xf32>
    %cst_189 = arith.constant dense<0.000000e+00> : vector<8x8xf32>
    %318 = tpu.matmul %315, %316, %cst_189 {dimension_numbers = #tpu.dot_dimension_numbers<[1], [1], [0], [0], [0, 0, 1, 0], [], []>} : vector<8x16xf32>, vector<8x16xf32>, vector<8x8xf32> -> vector<8x8xf32>
    %cst_190 = arith.constant 2.500000e-01 : f32
    %319 = vector.broadcast %cst_190 : f32 to vector<8x8xf32>
    %320 = arith.mulf %318, %319 : vector<8x8xf32>
    %321 = arith.addf %320, %283 : vector<8x8xf32>
    %cst_191 = arith.constant dense<0xFF800000> : vector<8xf32>
    %322 = vector.multi_reduction <maximumf>, %321, %cst_191 [1] : vector<8x8xf32> to vector<8xf32>
    %323 = vector.shape_cast %322 : vector<8xf32> to vector<8x1xf32>
    %324 = vector.broadcast %323 : vector<8x1xf32> to vector<8x8xf32>
    %325 = arith.subf %321, %324 : vector<8x8xf32>
    %326 = math.exp %325 : vector<8x8xf32>
    %cst_192 = arith.constant dense<0.000000e+00> : vector<8xf32>
    %327 = vector.multi_reduction <add>, %326, %cst_192 [1] : vector<8x8xf32> to vector<8xf32>
    %328 = vector.shape_cast %327 : vector<8xf32> to vector<8x1xf32>
    %329 = vector.broadcast %328 : vector<8x1xf32> to vector<8x8xf32>
    %330 = arith.divf %326, %329 : vector<8x8xf32>
    %cst_193 = arith.constant dense<0.000000e+00> : vector<8x16xf32>
    %331 = tpu.matmul %330, %317, %cst_193 {dimension_numbers = #tpu.dot_dimension_numbers<[1], [0], [0], [1], [0, 0, 1, 1], [], []>} : vector<8x8xf32>, vector<8x16xf32>, vector<8x16xf32> -> vector<8x16xf32>
    %332 = tpu.concatenate %314, %331 in 1 : vector<8x16xf32>, vector<8x16xf32> -> vector<8x32xf32>
    %cst_194 = arith.constant dense<0.000000e+00> : vector<8x32xf32>
    %333 = tpu.matmul %332, %292, %cst_194 {dimension_numbers = #tpu.dot_dimension_numbers<[1], [0], [0], [1], [0, 0, 1, 1], [], []>} : vector<8x32xf32>, vector<32x32xf32>, vector<8x32xf32> -> vector<8x32xf32>
    %334 = vector.broadcast %294 : vector<1x32xf32> to vector<8x32xf32>
    %335 = arith.addf %333, %334 : vector<8x32xf32>
    %336 = arith.addf %286, %335 : vector<8x32xf32>
    %c0_195 = arith.constant 0 : index
    %c0_196 = arith.constant 0 : index
    %c0_197 = arith.constant 0 : index
    %c0_198 = arith.constant 0 : index
    %337 = vector.load %arg31[%c0_195, %c0_196, %c0_197, %c0_198] : memref<2x1x1x32xf32, #tpu.memory_space<vmem>>, vector<1x1x1x32xf32>
    %338 = vector.shape_cast %337 : vector<1x1x1x32xf32> to vector<1x32xf32>
    %c0_199 = arith.constant 0 : index
    %c0_200 = arith.constant 0 : index
    %c0_201 = arith.constant 0 : index
    %c0_202 = arith.constant 0 : index
    %339 = vector.load %arg32[%c0_199, %c0_200, %c0_201, %c0_202] : memref<2x1x1x32xf32, #tpu.memory_space<vmem>>, vector<1x1x1x32xf32>
    %340 = vector.shape_cast %339 : vector<1x1x1x32xf32> to vector<1x32xf32>
    %cst_203 = arith.constant dense<0.000000e+00> : vector<8xf32>
    %341 = vector.multi_reduction <add>, %336, %cst_203 [1] : vector<8x32xf32> to vector<8xf32>
    %342 = vector.shape_cast %341 : vector<8xf32> to vector<8x1xf32>
    %cst_204 = arith.constant 3.200000e+01 : f32
    %343 = vector.broadcast %cst_204 : f32 to vector<8x1xf32>
    %344 = arith.divf %342, %343 : vector<8x1xf32>
    %345 = vector.broadcast %344 : vector<8x1xf32> to vector<8x32xf32>
    %346 = arith.subf %336, %345 : vector<8x32xf32>
    %347 = arith.mulf %346, %346 : vector<8x32xf32>
    %cst_205 = arith.constant dense<0.000000e+00> : vector<8xf32>
    %348 = vector.multi_reduction <add>, %347, %cst_205 [1] : vector<8x32xf32> to vector<8xf32>
    %349 = vector.shape_cast %348 : vector<8xf32> to vector<8x1xf32>
    %cst_206 = arith.constant 3.200000e+01 : f32
    %350 = vector.broadcast %cst_206 : f32 to vector<8x1xf32>
    %351 = arith.divf %349, %350 : vector<8x1xf32>
    %352 = vector.broadcast %344 : vector<8x1xf32> to vector<8x32xf32>
    %353 = arith.subf %336, %352 : vector<8x32xf32>
    %cst_207 = arith.constant 9.99999974E-6 : f32
    %354 = vector.broadcast %cst_207 : f32 to vector<8x1xf32>
    %355 = arith.addf %351, %354 : vector<8x1xf32>
    %356 = math.rsqrt %355 : vector<8x1xf32>
    %357 = vector.broadcast %356 : vector<8x1xf32> to vector<8x32xf32>
    %358 = arith.mulf %353, %357 : vector<8x32xf32>
    %359 = vector.broadcast %338 : vector<1x32xf32> to vector<8x32xf32>
    %360 = arith.mulf %358, %359 : vector<8x32xf32>
    %361 = vector.broadcast %340 : vector<1x32xf32> to vector<8x32xf32>
    %362 = arith.addf %360, %361 : vector<8x32xf32>
    %c0_208 = arith.constant 0 : index
    %c0_209 = arith.constant 0 : index
    %c0_210 = arith.constant 0 : index
    %c0_211 = arith.constant 0 : index
    %363 = vector.load %arg25[%c0_208, %c0_209, %c0_210, %c0_211] : memref<2x1x32x32xf32, #tpu.memory_space<vmem>>, vector<1x1x32x32xf32>
    %364 = vector.shape_cast %363 : vector<1x1x32x32xf32> to vector<32x32xf32>
    %c0_212 = arith.constant 0 : index
    %c0_213 = arith.constant 0 : index
    %c0_214 = arith.constant 0 : index
    %c0_215 = arith.constant 0 : index
    %365 = vector.load %arg26[%c0_212, %c0_213, %c0_214, %c0_215] : memref<2x1x1x32xf32, #tpu.memory_space<vmem>>, vector<1x1x1x32xf32>
    %366 = vector.shape_cast %365 : vector<1x1x1x32xf32> to vector<1x32xf32>
    %c0_216 = arith.constant 0 : index
    %c0_217 = arith.constant 0 : index
    %c0_218 = arith.constant 0 : index
    %c0_219 = arith.constant 0 : index
    %367 = vector.load %arg27[%c0_216, %c0_217, %c0_218, %c0_219] : memref<2x1x32x64xf32, #tpu.memory_space<vmem>>, vector<1x1x32x64xf32>
    %368 = vector.shape_cast %367 : vector<1x1x32x64xf32> to vector<32x64xf32>
    %c0_220 = arith.constant 0 : index
    %c0_221 = arith.constant 0 : index
    %c0_222 = arith.constant 0 : index
    %c0_223 = arith.constant 0 : index
    %369 = vector.load %arg28[%c0_220, %c0_221, %c0_222, %c0_223] : memref<2x1x1x64xf32, #tpu.memory_space<vmem>>, vector<1x1x1x64xf32>
    %370 = vector.shape_cast %369 : vector<1x1x1x64xf32> to vector<1x64xf32>
    %c0_224 = arith.constant 0 : index
    %c0_225 = arith.constant 0 : index
    %c0_226 = arith.constant 0 : index
    %c0_227 = arith.constant 0 : index
    %371 = vector.load %arg29[%c0_224, %c0_225, %c0_226, %c0_227] : memref<2x1x32x32xf32, #tpu.memory_space<vmem>>, vector<1x1x32x32xf32>
    %372 = vector.shape_cast %371 : vector<1x1x32x32xf32> to vector<32x32xf32>
    %c0_228 = arith.constant 0 : index
    %c0_229 = arith.constant 0 : index
    %c0_230 = arith.constant 0 : index
    %c0_231 = arith.constant 0 : index
    %373 = vector.load %arg30[%c0_228, %c0_229, %c0_230, %c0_231] : memref<2x1x1x32xf32, #tpu.memory_space<vmem>>, vector<1x1x1x32xf32>
    %374 = vector.shape_cast %373 : vector<1x1x1x32xf32> to vector<1x32xf32>
    %cst_232 = arith.constant dense<0.000000e+00> : vector<8x32xf32>
    %375 = tpu.matmul %362, %364, %cst_232 {dimension_numbers = #tpu.dot_dimension_numbers<[1], [0], [0], [1], [0, 0, 1, 1], [], []>} : vector<8x32xf32>, vector<32x32xf32>, vector<8x32xf32> -> vector<8x32xf32>
    %376 = vector.broadcast %366 : vector<1x32xf32> to vector<8x32xf32>
    %377 = arith.addf %375, %376 : vector<8x32xf32>
    %cst_233 = arith.constant dense<0.000000e+00> : vector<8x64xf32>
    %378 = tpu.matmul %282, %368, %cst_233 {dimension_numbers = #tpu.dot_dimension_numbers<[1], [0], [0], [1], [0, 0, 1, 1], [], []>} : vector<8x32xf32>, vector<32x64xf32>, vector<8x64xf32> -> vector<8x64xf32>
    %379 = vector.broadcast %370 : vector<1x64xf32> to vector<8x64xf32>
    %380 = arith.addf %378, %379 : vector<8x64xf32>
    %381 = vector.extract_strided_slice %377 {offsets = [0, 0], sizes = [8, 16], strides = [1, 1]} : vector<8x32xf32> to vector<8x16xf32>
    %382 = vector.extract_strided_slice %380 {offsets = [0, 0], sizes = [8, 16], strides = [1, 1]} : vector<8x64xf32> to vector<8x16xf32>
    %383 = vector.extract_strided_slice %380 {offsets = [0, 32], sizes = [8, 16], strides = [1, 1]} : vector<8x64xf32> to vector<8x16xf32>
    %cst_234 = arith.constant dense<0.000000e+00> : vector<8x8xf32>
    %384 = tpu.matmul %381, %382, %cst_234 {dimension_numbers = #tpu.dot_dimension_numbers<[1], [1], [0], [0], [0, 0, 1, 0], [], []>} : vector<8x16xf32>, vector<8x16xf32>, vector<8x8xf32> -> vector<8x8xf32>
    %cst_235 = arith.constant 2.500000e-01 : f32
    %385 = vector.broadcast %cst_235 : f32 to vector<8x8xf32>
    %386 = arith.mulf %384, %385 : vector<8x8xf32>
    %cst_236 = arith.constant dense<0xFF800000> : vector<8xf32>
    %387 = vector.multi_reduction <maximumf>, %386, %cst_236 [1] : vector<8x8xf32> to vector<8xf32>
    %388 = vector.shape_cast %387 : vector<8xf32> to vector<8x1xf32>
    %389 = vector.broadcast %388 : vector<8x1xf32> to vector<8x8xf32>
    %390 = arith.subf %386, %389 : vector<8x8xf32>
    %391 = math.exp %390 : vector<8x8xf32>
    %cst_237 = arith.constant dense<0.000000e+00> : vector<8xf32>
    %392 = vector.multi_reduction <add>, %391, %cst_237 [1] : vector<8x8xf32> to vector<8xf32>
    %393 = vector.shape_cast %392 : vector<8xf32> to vector<8x1xf32>
    %394 = vector.broadcast %393 : vector<8x1xf32> to vector<8x8xf32>
    %395 = arith.divf %391, %394 : vector<8x8xf32>
    %cst_238 = arith.constant dense<0.000000e+00> : vector<8x16xf32>
    %396 = tpu.matmul %395, %383, %cst_238 {dimension_numbers = #tpu.dot_dimension_numbers<[1], [0], [0], [1], [0, 0, 1, 1], [], []>} : vector<8x8xf32>, vector<8x16xf32>, vector<8x16xf32> -> vector<8x16xf32>
    %397 = vector.extract_strided_slice %377 {offsets = [0, 16], sizes = [8, 16], strides = [1, 1]} : vector<8x32xf32> to vector<8x16xf32>
    %398 = vector.extract_strided_slice %380 {offsets = [0, 16], sizes = [8, 16], strides = [1, 1]} : vector<8x64xf32> to vector<8x16xf32>
    %399 = vector.extract_strided_slice %380 {offsets = [0, 48], sizes = [8, 16], strides = [1, 1]} : vector<8x64xf32> to vector<8x16xf32>
    %cst_239 = arith.constant dense<0.000000e+00> : vector<8x8xf32>
    %400 = tpu.matmul %397, %398, %cst_239 {dimension_numbers = #tpu.dot_dimension_numbers<[1], [1], [0], [0], [0, 0, 1, 0], [], []>} : vector<8x16xf32>, vector<8x16xf32>, vector<8x8xf32> -> vector<8x8xf32>
    %cst_240 = arith.constant 2.500000e-01 : f32
    %401 = vector.broadcast %cst_240 : f32 to vector<8x8xf32>
    %402 = arith.mulf %400, %401 : vector<8x8xf32>
    %cst_241 = arith.constant dense<0xFF800000> : vector<8xf32>
    %403 = vector.multi_reduction <maximumf>, %402, %cst_241 [1] : vector<8x8xf32> to vector<8xf32>
    %404 = vector.shape_cast %403 : vector<8xf32> to vector<8x1xf32>
    %405 = vector.broadcast %404 : vector<8x1xf32> to vector<8x8xf32>
    %406 = arith.subf %402, %405 : vector<8x8xf32>
    %407 = math.exp %406 : vector<8x8xf32>
    %cst_242 = arith.constant dense<0.000000e+00> : vector<8xf32>
    %408 = vector.multi_reduction <add>, %407, %cst_242 [1] : vector<8x8xf32> to vector<8xf32>
    %409 = vector.shape_cast %408 : vector<8xf32> to vector<8x1xf32>
    %410 = vector.broadcast %409 : vector<8x1xf32> to vector<8x8xf32>
    %411 = arith.divf %407, %410 : vector<8x8xf32>
    %cst_243 = arith.constant dense<0.000000e+00> : vector<8x16xf32>
    %412 = tpu.matmul %411, %399, %cst_243 {dimension_numbers = #tpu.dot_dimension_numbers<[1], [0], [0], [1], [0, 0, 1, 1], [], []>} : vector<8x8xf32>, vector<8x16xf32>, vector<8x16xf32> -> vector<8x16xf32>
    %413 = tpu.concatenate %396, %412 in 1 : vector<8x16xf32>, vector<8x16xf32> -> vector<8x32xf32>
    %cst_244 = arith.constant dense<0.000000e+00> : vector<8x32xf32>
    %414 = tpu.matmul %413, %372, %cst_244 {dimension_numbers = #tpu.dot_dimension_numbers<[1], [0], [0], [1], [0, 0, 1, 1], [], []>} : vector<8x32xf32>, vector<32x32xf32>, vector<8x32xf32> -> vector<8x32xf32>
    %415 = vector.broadcast %374 : vector<1x32xf32> to vector<8x32xf32>
    %416 = arith.addf %414, %415 : vector<8x32xf32>
    %417 = arith.addf %362, %416 : vector<8x32xf32>
    %c0_245 = arith.constant 0 : index
    %c0_246 = arith.constant 0 : index
    %c0_247 = arith.constant 0 : index
    %c0_248 = arith.constant 0 : index
    %418 = vector.load %arg33[%c0_245, %c0_246, %c0_247, %c0_248] : memref<2x1x1x32xf32, #tpu.memory_space<vmem>>, vector<1x1x1x32xf32>
    %419 = vector.shape_cast %418 : vector<1x1x1x32xf32> to vector<1x32xf32>
    %c0_249 = arith.constant 0 : index
    %c0_250 = arith.constant 0 : index
    %c0_251 = arith.constant 0 : index
    %c0_252 = arith.constant 0 : index
    %420 = vector.load %arg34[%c0_249, %c0_250, %c0_251, %c0_252] : memref<2x1x1x32xf32, #tpu.memory_space<vmem>>, vector<1x1x1x32xf32>
    %421 = vector.shape_cast %420 : vector<1x1x1x32xf32> to vector<1x32xf32>
    %cst_253 = arith.constant dense<0.000000e+00> : vector<8xf32>
    %422 = vector.multi_reduction <add>, %417, %cst_253 [1] : vector<8x32xf32> to vector<8xf32>
    %423 = vector.shape_cast %422 : vector<8xf32> to vector<8x1xf32>
    %cst_254 = arith.constant 3.200000e+01 : f32
    %424 = vector.broadcast %cst_254 : f32 to vector<8x1xf32>
    %425 = arith.divf %423, %424 : vector<8x1xf32>
    %426 = vector.broadcast %425 : vector<8x1xf32> to vector<8x32xf32>
    %427 = arith.subf %417, %426 : vector<8x32xf32>
    %428 = arith.mulf %427, %427 : vector<8x32xf32>
    %cst_255 = arith.constant dense<0.000000e+00> : vector<8xf32>
    %429 = vector.multi_reduction <add>, %428, %cst_255 [1] : vector<8x32xf32> to vector<8xf32>
    %430 = vector.shape_cast %429 : vector<8xf32> to vector<8x1xf32>
    %cst_256 = arith.constant 3.200000e+01 : f32
    %431 = vector.broadcast %cst_256 : f32 to vector<8x1xf32>
    %432 = arith.divf %430, %431 : vector<8x1xf32>
    %433 = vector.broadcast %425 : vector<8x1xf32> to vector<8x32xf32>
    %434 = arith.subf %417, %433 : vector<8x32xf32>
    %cst_257 = arith.constant 9.99999974E-6 : f32
    %435 = vector.broadcast %cst_257 : f32 to vector<8x1xf32>
    %436 = arith.addf %432, %435 : vector<8x1xf32>
    %437 = math.rsqrt %436 : vector<8x1xf32>
    %438 = vector.broadcast %437 : vector<8x1xf32> to vector<8x32xf32>
    %439 = arith.mulf %434, %438 : vector<8x32xf32>
    %440 = vector.broadcast %419 : vector<1x32xf32> to vector<8x32xf32>
    %441 = arith.mulf %439, %440 : vector<8x32xf32>
    %442 = vector.broadcast %421 : vector<1x32xf32> to vector<8x32xf32>
    %443 = arith.addf %441, %442 : vector<8x32xf32>
    %c0_258 = arith.constant 0 : index
    %c0_259 = arith.constant 0 : index
    %c0_260 = arith.constant 0 : index
    %c0_261 = arith.constant 0 : index
    %444 = vector.load %arg37[%c0_258, %c0_259, %c0_260, %c0_261] : memref<2x1x32x64xf32, #tpu.memory_space<vmem>>, vector<1x1x32x64xf32>
    %445 = vector.shape_cast %444 : vector<1x1x32x64xf32> to vector<32x64xf32>
    %c0_262 = arith.constant 0 : index
    %c0_263 = arith.constant 0 : index
    %c0_264 = arith.constant 0 : index
    %c0_265 = arith.constant 0 : index
    %446 = vector.load %arg38[%c0_262, %c0_263, %c0_264, %c0_265] : memref<2x1x1x64xf32, #tpu.memory_space<vmem>>, vector<1x1x1x64xf32>
    %447 = vector.shape_cast %446 : vector<1x1x1x64xf32> to vector<1x64xf32>
    %c0_266 = arith.constant 0 : index
    %c0_267 = arith.constant 0 : index
    %c0_268 = arith.constant 0 : index
    %c0_269 = arith.constant 0 : index
    %448 = vector.load %arg39[%c0_266, %c0_267, %c0_268, %c0_269] : memref<2x1x64x32xf32, #tpu.memory_space<vmem>>, vector<1x1x64x32xf32>
    %449 = vector.shape_cast %448 : vector<1x1x64x32xf32> to vector<64x32xf32>
    %c0_270 = arith.constant 0 : index
    %c0_271 = arith.constant 0 : index
    %c0_272 = arith.constant 0 : index
    %c0_273 = arith.constant 0 : index
    %450 = vector.load %arg40[%c0_270, %c0_271, %c0_272, %c0_273] : memref<2x1x1x32xf32, #tpu.memory_space<vmem>>, vector<1x1x1x32xf32>
    %451 = vector.shape_cast %450 : vector<1x1x1x32xf32> to vector<1x32xf32>
    %cst_274 = arith.constant dense<0.000000e+00> : vector<8x64xf32>
    %452 = tpu.matmul %443, %445, %cst_274 {dimension_numbers = #tpu.dot_dimension_numbers<[1], [0], [0], [1], [0, 0, 1, 1], [], []>} : vector<8x32xf32>, vector<32x64xf32>, vector<8x64xf32> -> vector<8x64xf32>
    %453 = vector.broadcast %447 : vector<1x64xf32> to vector<8x64xf32>
    %454 = arith.addf %452, %453 : vector<8x64xf32>
    %cst_275 = arith.constant 0.000000e+00 : f32
    %455 = vector.broadcast %cst_275 : f32 to vector<8x64xf32>
    %456 = arith.maximumf %454, %455 : vector<8x64xf32>
    %cst_276 = arith.constant dense<0.000000e+00> : vector<8x32xf32>
    %457 = tpu.matmul %456, %449, %cst_276 {dimension_numbers = #tpu.dot_dimension_numbers<[1], [0], [0], [1], [0, 0, 1, 1], [], []>} : vector<8x64xf32>, vector<64x32xf32>, vector<8x32xf32> -> vector<8x32xf32>
    %458 = vector.broadcast %451 : vector<1x32xf32> to vector<8x32xf32>
    %459 = arith.addf %457, %458 : vector<8x32xf32>
    %460 = arith.addf %443, %459 : vector<8x32xf32>
    %c0_277 = arith.constant 0 : index
    %c0_278 = arith.constant 0 : index
    %c0_279 = arith.constant 0 : index
    %c0_280 = arith.constant 0 : index
    %461 = vector.load %arg35[%c0_277, %c0_278, %c0_279, %c0_280] : memref<2x1x1x32xf32, #tpu.memory_space<vmem>>, vector<1x1x1x32xf32>
    %462 = vector.shape_cast %461 : vector<1x1x1x32xf32> to vector<1x32xf32>
    %c0_281 = arith.constant 0 : index
    %c0_282 = arith.constant 0 : index
    %c0_283 = arith.constant 0 : index
    %c0_284 = arith.constant 0 : index
    %463 = vector.load %arg36[%c0_281, %c0_282, %c0_283, %c0_284] : memref<2x1x1x32xf32, #tpu.memory_space<vmem>>, vector<1x1x1x32xf32>
    %464 = vector.shape_cast %463 : vector<1x1x1x32xf32> to vector<1x32xf32>
    %cst_285 = arith.constant dense<0.000000e+00> : vector<8xf32>
    %465 = vector.multi_reduction <add>, %460, %cst_285 [1] : vector<8x32xf32> to vector<8xf32>
    %466 = vector.shape_cast %465 : vector<8xf32> to vector<8x1xf32>
    %cst_286 = arith.constant 3.200000e+01 : f32
    %467 = vector.broadcast %cst_286 : f32 to vector<8x1xf32>
    %468 = arith.divf %466, %467 : vector<8x1xf32>
    %469 = vector.broadcast %468 : vector<8x1xf32> to vector<8x32xf32>
    %470 = arith.subf %460, %469 : vector<8x32xf32>
    %471 = arith.mulf %470, %470 : vector<8x32xf32>
    %cst_287 = arith.constant dense<0.000000e+00> : vector<8xf32>
    %472 = vector.multi_reduction <add>, %471, %cst_287 [1] : vector<8x32xf32> to vector<8xf32>
    %473 = vector.shape_cast %472 : vector<8xf32> to vector<8x1xf32>
    %cst_288 = arith.constant 3.200000e+01 : f32
    %474 = vector.broadcast %cst_288 : f32 to vector<8x1xf32>
    %475 = arith.divf %473, %474 : vector<8x1xf32>
    %476 = vector.broadcast %468 : vector<8x1xf32> to vector<8x32xf32>
    %477 = arith.subf %460, %476 : vector<8x32xf32>
    %cst_289 = arith.constant 9.99999974E-6 : f32
    %478 = vector.broadcast %cst_289 : f32 to vector<8x1xf32>
    %479 = arith.addf %475, %478 : vector<8x1xf32>
    %480 = math.rsqrt %479 : vector<8x1xf32>
    %481 = vector.broadcast %480 : vector<8x1xf32> to vector<8x32xf32>
    %482 = arith.mulf %477, %481 : vector<8x32xf32>
    %483 = vector.broadcast %462 : vector<1x32xf32> to vector<8x32xf32>
    %484 = arith.mulf %482, %483 : vector<8x32xf32>
    %485 = vector.broadcast %464 : vector<1x32xf32> to vector<8x32xf32>
    %486 = arith.addf %484, %485 : vector<8x32xf32>
    %487 = arith.addf %284, %486 : vector<8x32xf32>
    %c0_290 = arith.constant 0 : index
    %c1_291 = arith.constant 1 : index
    %c0_292 = arith.constant 0 : index
    %c0_293 = arith.constant 0 : index
    %488 = vector.load %arg3[%c0_290, %c1_291, %c0_292, %c0_293] : memref<1x2x8x32xf32, #tpu.memory_space<vmem>>, vector<1x1x8x32xf32>
    %489 = vector.shape_cast %488 : vector<1x1x8x32xf32> to vector<8x32xf32>
    %c1_294 = arith.constant 1 : index
    %c0_295 = arith.constant 0 : index
    %c0_296 = arith.constant 0 : index
    %c0_297 = arith.constant 0 : index
    %490 = vector.load %arg21[%c1_294, %c0_295, %c0_296, %c0_297] : memref<2x1x32x96xf32, #tpu.memory_space<vmem>>, vector<1x1x32x96xf32>
    %491 = vector.shape_cast %490 : vector<1x1x32x96xf32> to vector<32x96xf32>
    %c1_298 = arith.constant 1 : index
    %c0_299 = arith.constant 0 : index
    %c0_300 = arith.constant 0 : index
    %c0_301 = arith.constant 0 : index
    %492 = vector.load %arg22[%c1_298, %c0_299, %c0_300, %c0_301] : memref<2x1x1x96xf32, #tpu.memory_space<vmem>>, vector<1x1x1x96xf32>
    %493 = vector.shape_cast %492 : vector<1x1x1x96xf32> to vector<1x96xf32>
    %c1_302 = arith.constant 1 : index
    %c0_303 = arith.constant 0 : index
    %c0_304 = arith.constant 0 : index
    %c0_305 = arith.constant 0 : index
    %494 = vector.load %arg23[%c1_302, %c0_303, %c0_304, %c0_305] : memref<2x1x32x32xf32, #tpu.memory_space<vmem>>, vector<1x1x32x32xf32>
    %495 = vector.shape_cast %494 : vector<1x1x32x32xf32> to vector<32x32xf32>
    %c1_306 = arith.constant 1 : index
    %c0_307 = arith.constant 0 : index
    %c0_308 = arith.constant 0 : index
    %c0_309 = arith.constant 0 : index
    %496 = vector.load %arg24[%c1_306, %c0_307, %c0_308, %c0_309] : memref<2x1x1x32xf32, #tpu.memory_space<vmem>>, vector<1x1x1x32xf32>
    %497 = vector.shape_cast %496 : vector<1x1x1x32xf32> to vector<1x32xf32>
    %cst_310 = arith.constant dense<0.000000e+00> : vector<8x96xf32>
    %498 = tpu.matmul %489, %491, %cst_310 {dimension_numbers = #tpu.dot_dimension_numbers<[1], [0], [0], [1], [0, 0, 1, 1], [], []>} : vector<8x32xf32>, vector<32x96xf32>, vector<8x96xf32> -> vector<8x96xf32>
    %499 = vector.broadcast %493 : vector<1x96xf32> to vector<8x96xf32>
    %500 = arith.addf %498, %499 : vector<8x96xf32>
    %501 = vector.extract_strided_slice %500 {offsets = [0, 0], sizes = [8, 16], strides = [1, 1]} : vector<8x96xf32> to vector<8x16xf32>
    %502 = vector.extract_strided_slice %500 {offsets = [0, 32], sizes = [8, 16], strides = [1, 1]} : vector<8x96xf32> to vector<8x16xf32>
    %503 = vector.extract_strided_slice %500 {offsets = [0, 64], sizes = [8, 16], strides = [1, 1]} : vector<8x96xf32> to vector<8x16xf32>
    %cst_311 = arith.constant dense<0.000000e+00> : vector<8x8xf32>
    %504 = tpu.matmul %501, %502, %cst_311 {dimension_numbers = #tpu.dot_dimension_numbers<[1], [1], [0], [0], [0, 0, 1, 0], [], []>} : vector<8x16xf32>, vector<8x16xf32>, vector<8x8xf32> -> vector<8x8xf32>
    %cst_312 = arith.constant 2.500000e-01 : f32
    %505 = vector.broadcast %cst_312 : f32 to vector<8x8xf32>
    %506 = arith.mulf %504, %505 : vector<8x8xf32>
    %507 = arith.addf %506, %283 : vector<8x8xf32>
    %cst_313 = arith.constant dense<0xFF800000> : vector<8xf32>
    %508 = vector.multi_reduction <maximumf>, %507, %cst_313 [1] : vector<8x8xf32> to vector<8xf32>
    %509 = vector.shape_cast %508 : vector<8xf32> to vector<8x1xf32>
    %510 = vector.broadcast %509 : vector<8x1xf32> to vector<8x8xf32>
    %511 = arith.subf %507, %510 : vector<8x8xf32>
    %512 = math.exp %511 : vector<8x8xf32>
    %cst_314 = arith.constant dense<0.000000e+00> : vector<8xf32>
    %513 = vector.multi_reduction <add>, %512, %cst_314 [1] : vector<8x8xf32> to vector<8xf32>
    %514 = vector.shape_cast %513 : vector<8xf32> to vector<8x1xf32>
    %515 = vector.broadcast %514 : vector<8x1xf32> to vector<8x8xf32>
    %516 = arith.divf %512, %515 : vector<8x8xf32>
    %cst_315 = arith.constant dense<0.000000e+00> : vector<8x16xf32>
    %517 = tpu.matmul %516, %503, %cst_315 {dimension_numbers = #tpu.dot_dimension_numbers<[1], [0], [0], [1], [0, 0, 1, 1], [], []>} : vector<8x8xf32>, vector<8x16xf32>, vector<8x16xf32> -> vector<8x16xf32>
    %518 = vector.extract_strided_slice %500 {offsets = [0, 16], sizes = [8, 16], strides = [1, 1]} : vector<8x96xf32> to vector<8x16xf32>
    %519 = vector.extract_strided_slice %500 {offsets = [0, 48], sizes = [8, 16], strides = [1, 1]} : vector<8x96xf32> to vector<8x16xf32>
    %520 = vector.extract_strided_slice %500 {offsets = [0, 80], sizes = [8, 16], strides = [1, 1]} : vector<8x96xf32> to vector<8x16xf32>
    %cst_316 = arith.constant dense<0.000000e+00> : vector<8x8xf32>
    %521 = tpu.matmul %518, %519, %cst_316 {dimension_numbers = #tpu.dot_dimension_numbers<[1], [1], [0], [0], [0, 0, 1, 0], [], []>} : vector<8x16xf32>, vector<8x16xf32>, vector<8x8xf32> -> vector<8x8xf32>
    %cst_317 = arith.constant 2.500000e-01 : f32
    %522 = vector.broadcast %cst_317 : f32 to vector<8x8xf32>
    %523 = arith.mulf %521, %522 : vector<8x8xf32>
    %524 = arith.addf %523, %283 : vector<8x8xf32>
    %cst_318 = arith.constant dense<0xFF800000> : vector<8xf32>
    %525 = vector.multi_reduction <maximumf>, %524, %cst_318 [1] : vector<8x8xf32> to vector<8xf32>
    %526 = vector.shape_cast %525 : vector<8xf32> to vector<8x1xf32>
    %527 = vector.broadcast %526 : vector<8x1xf32> to vector<8x8xf32>
    %528 = arith.subf %524, %527 : vector<8x8xf32>
    %529 = math.exp %528 : vector<8x8xf32>
    %cst_319 = arith.constant dense<0.000000e+00> : vector<8xf32>
    %530 = vector.multi_reduction <add>, %529, %cst_319 [1] : vector<8x8xf32> to vector<8xf32>
    %531 = vector.shape_cast %530 : vector<8xf32> to vector<8x1xf32>
    %532 = vector.broadcast %531 : vector<8x1xf32> to vector<8x8xf32>
    %533 = arith.divf %529, %532 : vector<8x8xf32>
    %cst_320 = arith.constant dense<0.000000e+00> : vector<8x16xf32>
    %534 = tpu.matmul %533, %520, %cst_320 {dimension_numbers = #tpu.dot_dimension_numbers<[1], [0], [0], [1], [0, 0, 1, 1], [], []>} : vector<8x8xf32>, vector<8x16xf32>, vector<8x16xf32> -> vector<8x16xf32>
    %535 = tpu.concatenate %517, %534 in 1 : vector<8x16xf32>, vector<8x16xf32> -> vector<8x32xf32>
    %cst_321 = arith.constant dense<0.000000e+00> : vector<8x32xf32>
    %536 = tpu.matmul %535, %495, %cst_321 {dimension_numbers = #tpu.dot_dimension_numbers<[1], [0], [0], [1], [0, 0, 1, 1], [], []>} : vector<8x32xf32>, vector<32x32xf32>, vector<8x32xf32> -> vector<8x32xf32>
    %537 = vector.broadcast %497 : vector<1x32xf32> to vector<8x32xf32>
    %538 = arith.addf %536, %537 : vector<8x32xf32>
    %539 = arith.addf %489, %538 : vector<8x32xf32>
    %c1_322 = arith.constant 1 : index
    %c0_323 = arith.constant 0 : index
    %c0_324 = arith.constant 0 : index
    %c0_325 = arith.constant 0 : index
    %540 = vector.load %arg31[%c1_322, %c0_323, %c0_324, %c0_325] : memref<2x1x1x32xf32, #tpu.memory_space<vmem>>, vector<1x1x1x32xf32>
    %541 = vector.shape_cast %540 : vector<1x1x1x32xf32> to vector<1x32xf32>
    %c1_326 = arith.constant 1 : index
    %c0_327 = arith.constant 0 : index
    %c0_328 = arith.constant 0 : index
    %c0_329 = arith.constant 0 : index
    %542 = vector.load %arg32[%c1_326, %c0_327, %c0_328, %c0_329] : memref<2x1x1x32xf32, #tpu.memory_space<vmem>>, vector<1x1x1x32xf32>
    %543 = vector.shape_cast %542 : vector<1x1x1x32xf32> to vector<1x32xf32>
    %cst_330 = arith.constant dense<0.000000e+00> : vector<8xf32>
    %544 = vector.multi_reduction <add>, %539, %cst_330 [1] : vector<8x32xf32> to vector<8xf32>
    %545 = vector.shape_cast %544 : vector<8xf32> to vector<8x1xf32>
    %cst_331 = arith.constant 3.200000e+01 : f32
    %546 = vector.broadcast %cst_331 : f32 to vector<8x1xf32>
    %547 = arith.divf %545, %546 : vector<8x1xf32>
    %548 = vector.broadcast %547 : vector<8x1xf32> to vector<8x32xf32>
    %549 = arith.subf %539, %548 : vector<8x32xf32>
    %550 = arith.mulf %549, %549 : vector<8x32xf32>
    %cst_332 = arith.constant dense<0.000000e+00> : vector<8xf32>
    %551 = vector.multi_reduction <add>, %550, %cst_332 [1] : vector<8x32xf32> to vector<8xf32>
    %552 = vector.shape_cast %551 : vector<8xf32> to vector<8x1xf32>
    %cst_333 = arith.constant 3.200000e+01 : f32
    %553 = vector.broadcast %cst_333 : f32 to vector<8x1xf32>
    %554 = arith.divf %552, %553 : vector<8x1xf32>
    %555 = vector.broadcast %547 : vector<8x1xf32> to vector<8x32xf32>
    %556 = arith.subf %539, %555 : vector<8x32xf32>
    %cst_334 = arith.constant 9.99999974E-6 : f32
    %557 = vector.broadcast %cst_334 : f32 to vector<8x1xf32>
    %558 = arith.addf %554, %557 : vector<8x1xf32>
    %559 = math.rsqrt %558 : vector<8x1xf32>
    %560 = vector.broadcast %559 : vector<8x1xf32> to vector<8x32xf32>
    %561 = arith.mulf %556, %560 : vector<8x32xf32>
    %562 = vector.broadcast %541 : vector<1x32xf32> to vector<8x32xf32>
    %563 = arith.mulf %561, %562 : vector<8x32xf32>
    %564 = vector.broadcast %543 : vector<1x32xf32> to vector<8x32xf32>
    %565 = arith.addf %563, %564 : vector<8x32xf32>
    %c1_335 = arith.constant 1 : index
    %c0_336 = arith.constant 0 : index
    %c0_337 = arith.constant 0 : index
    %c0_338 = arith.constant 0 : index
    %566 = vector.load %arg25[%c1_335, %c0_336, %c0_337, %c0_338] : memref<2x1x32x32xf32, #tpu.memory_space<vmem>>, vector<1x1x32x32xf32>
    %567 = vector.shape_cast %566 : vector<1x1x32x32xf32> to vector<32x32xf32>
    %c1_339 = arith.constant 1 : index
    %c0_340 = arith.constant 0 : index
    %c0_341 = arith.constant 0 : index
    %c0_342 = arith.constant 0 : index
    %568 = vector.load %arg26[%c1_339, %c0_340, %c0_341, %c0_342] : memref<2x1x1x32xf32, #tpu.memory_space<vmem>>, vector<1x1x1x32xf32>
    %569 = vector.shape_cast %568 : vector<1x1x1x32xf32> to vector<1x32xf32>
    %c1_343 = arith.constant 1 : index
    %c0_344 = arith.constant 0 : index
    %c0_345 = arith.constant 0 : index
    %c0_346 = arith.constant 0 : index
    %570 = vector.load %arg27[%c1_343, %c0_344, %c0_345, %c0_346] : memref<2x1x32x64xf32, #tpu.memory_space<vmem>>, vector<1x1x32x64xf32>
    %571 = vector.shape_cast %570 : vector<1x1x32x64xf32> to vector<32x64xf32>
    %c1_347 = arith.constant 1 : index
    %c0_348 = arith.constant 0 : index
    %c0_349 = arith.constant 0 : index
    %c0_350 = arith.constant 0 : index
    %572 = vector.load %arg28[%c1_347, %c0_348, %c0_349, %c0_350] : memref<2x1x1x64xf32, #tpu.memory_space<vmem>>, vector<1x1x1x64xf32>
    %573 = vector.shape_cast %572 : vector<1x1x1x64xf32> to vector<1x64xf32>
    %c1_351 = arith.constant 1 : index
    %c0_352 = arith.constant 0 : index
    %c0_353 = arith.constant 0 : index
    %c0_354 = arith.constant 0 : index
    %574 = vector.load %arg29[%c1_351, %c0_352, %c0_353, %c0_354] : memref<2x1x32x32xf32, #tpu.memory_space<vmem>>, vector<1x1x32x32xf32>
    %575 = vector.shape_cast %574 : vector<1x1x32x32xf32> to vector<32x32xf32>
    %c1_355 = arith.constant 1 : index
    %c0_356 = arith.constant 0 : index
    %c0_357 = arith.constant 0 : index
    %c0_358 = arith.constant 0 : index
    %576 = vector.load %arg30[%c1_355, %c0_356, %c0_357, %c0_358] : memref<2x1x1x32xf32, #tpu.memory_space<vmem>>, vector<1x1x1x32xf32>
    %577 = vector.shape_cast %576 : vector<1x1x1x32xf32> to vector<1x32xf32>
    %cst_359 = arith.constant dense<0.000000e+00> : vector<8x32xf32>
    %578 = tpu.matmul %565, %567, %cst_359 {dimension_numbers = #tpu.dot_dimension_numbers<[1], [0], [0], [1], [0, 0, 1, 1], [], []>} : vector<8x32xf32>, vector<32x32xf32>, vector<8x32xf32> -> vector<8x32xf32>
    %579 = vector.broadcast %569 : vector<1x32xf32> to vector<8x32xf32>
    %580 = arith.addf %578, %579 : vector<8x32xf32>
    %cst_360 = arith.constant dense<0.000000e+00> : vector<8x64xf32>
    %581 = tpu.matmul %282, %571, %cst_360 {dimension_numbers = #tpu.dot_dimension_numbers<[1], [0], [0], [1], [0, 0, 1, 1], [], []>} : vector<8x32xf32>, vector<32x64xf32>, vector<8x64xf32> -> vector<8x64xf32>
    %582 = vector.broadcast %573 : vector<1x64xf32> to vector<8x64xf32>
    %583 = arith.addf %581, %582 : vector<8x64xf32>
    %584 = vector.extract_strided_slice %580 {offsets = [0, 0], sizes = [8, 16], strides = [1, 1]} : vector<8x32xf32> to vector<8x16xf32>
    %585 = vector.extract_strided_slice %583 {offsets = [0, 0], sizes = [8, 16], strides = [1, 1]} : vector<8x64xf32> to vector<8x16xf32>
    %586 = vector.extract_strided_slice %583 {offsets = [0, 32], sizes = [8, 16], strides = [1, 1]} : vector<8x64xf32> to vector<8x16xf32>
    %cst_361 = arith.constant dense<0.000000e+00> : vector<8x8xf32>
    %587 = tpu.matmul %584, %585, %cst_361 {dimension_numbers = #tpu.dot_dimension_numbers<[1], [1], [0], [0], [0, 0, 1, 0], [], []>} : vector<8x16xf32>, vector<8x16xf32>, vector<8x8xf32> -> vector<8x8xf32>
    %cst_362 = arith.constant 2.500000e-01 : f32
    %588 = vector.broadcast %cst_362 : f32 to vector<8x8xf32>
    %589 = arith.mulf %587, %588 : vector<8x8xf32>
    %cst_363 = arith.constant dense<0xFF800000> : vector<8xf32>
    %590 = vector.multi_reduction <maximumf>, %589, %cst_363 [1] : vector<8x8xf32> to vector<8xf32>
    %591 = vector.shape_cast %590 : vector<8xf32> to vector<8x1xf32>
    %592 = vector.broadcast %591 : vector<8x1xf32> to vector<8x8xf32>
    %593 = arith.subf %589, %592 : vector<8x8xf32>
    %594 = math.exp %593 : vector<8x8xf32>
    %cst_364 = arith.constant dense<0.000000e+00> : vector<8xf32>
    %595 = vector.multi_reduction <add>, %594, %cst_364 [1] : vector<8x8xf32> to vector<8xf32>
    %596 = vector.shape_cast %595 : vector<8xf32> to vector<8x1xf32>
    %597 = vector.broadcast %596 : vector<8x1xf32> to vector<8x8xf32>
    %598 = arith.divf %594, %597 : vector<8x8xf32>
    %cst_365 = arith.constant dense<0.000000e+00> : vector<8x16xf32>
    %599 = tpu.matmul %598, %586, %cst_365 {dimension_numbers = #tpu.dot_dimension_numbers<[1], [0], [0], [1], [0, 0, 1, 1], [], []>} : vector<8x8xf32>, vector<8x16xf32>, vector<8x16xf32> -> vector<8x16xf32>
    %600 = vector.extract_strided_slice %580 {offsets = [0, 16], sizes = [8, 16], strides = [1, 1]} : vector<8x32xf32> to vector<8x16xf32>
    %601 = vector.extract_strided_slice %583 {offsets = [0, 16], sizes = [8, 16], strides = [1, 1]} : vector<8x64xf32> to vector<8x16xf32>
    %602 = vector.extract_strided_slice %583 {offsets = [0, 48], sizes = [8, 16], strides = [1, 1]} : vector<8x64xf32> to vector<8x16xf32>
    %cst_366 = arith.constant dense<0.000000e+00> : vector<8x8xf32>
    %603 = tpu.matmul %600, %601, %cst_366 {dimension_numbers = #tpu.dot_dimension_numbers<[1], [1], [0], [0], [0, 0, 1, 0], [], []>} : vector<8x16xf32>, vector<8x16xf32>, vector<8x8xf32> -> vector<8x8xf32>
    %cst_367 = arith.constant 2.500000e-01 : f32
    %604 = vector.broadcast %cst_367 : f32 to vector<8x8xf32>
    %605 = arith.mulf %603, %604 : vector<8x8xf32>
    %cst_368 = arith.constant dense<0xFF800000> : vector<8xf32>
    %606 = vector.multi_reduction <maximumf>, %605, %cst_368 [1] : vector<8x8xf32> to vector<8xf32>
    %607 = vector.shape_cast %606 : vector<8xf32> to vector<8x1xf32>
    %608 = vector.broadcast %607 : vector<8x1xf32> to vector<8x8xf32>
    %609 = arith.subf %605, %608 : vector<8x8xf32>
    %610 = math.exp %609 : vector<8x8xf32>
    %cst_369 = arith.constant dense<0.000000e+00> : vector<8xf32>
    %611 = vector.multi_reduction <add>, %610, %cst_369 [1] : vector<8x8xf32> to vector<8xf32>
    %612 = vector.shape_cast %611 : vector<8xf32> to vector<8x1xf32>
    %613 = vector.broadcast %612 : vector<8x1xf32> to vector<8x8xf32>
    %614 = arith.divf %610, %613 : vector<8x8xf32>
    %cst_370 = arith.constant dense<0.000000e+00> : vector<8x16xf32>
    %615 = tpu.matmul %614, %602, %cst_370 {dimension_numbers = #tpu.dot_dimension_numbers<[1], [0], [0], [1], [0, 0, 1, 1], [], []>} : vector<8x8xf32>, vector<8x16xf32>, vector<8x16xf32> -> vector<8x16xf32>
    %616 = tpu.concatenate %599, %615 in 1 : vector<8x16xf32>, vector<8x16xf32> -> vector<8x32xf32>
    %cst_371 = arith.constant dense<0.000000e+00> : vector<8x32xf32>
    %617 = tpu.matmul %616, %575, %cst_371 {dimension_numbers = #tpu.dot_dimension_numbers<[1], [0], [0], [1], [0, 0, 1, 1], [], []>} : vector<8x32xf32>, vector<32x32xf32>, vector<8x32xf32> -> vector<8x32xf32>
    %618 = vector.broadcast %577 : vector<1x32xf32> to vector<8x32xf32>
    %619 = arith.addf %617, %618 : vector<8x32xf32>
    %620 = arith.addf %565, %619 : vector<8x32xf32>
    %c1_372 = arith.constant 1 : index
    %c0_373 = arith.constant 0 : index
    %c0_374 = arith.constant 0 : index
    %c0_375 = arith.constant 0 : index
    %621 = vector.load %arg33[%c1_372, %c0_373, %c0_374, %c0_375] : memref<2x1x1x32xf32, #tpu.memory_space<vmem>>, vector<1x1x1x32xf32>
    %622 = vector.shape_cast %621 : vector<1x1x1x32xf32> to vector<1x32xf32>
    %c1_376 = arith.constant 1 : index
    %c0_377 = arith.constant 0 : index
    %c0_378 = arith.constant 0 : index
    %c0_379 = arith.constant 0 : index
    %623 = vector.load %arg34[%c1_376, %c0_377, %c0_378, %c0_379] : memref<2x1x1x32xf32, #tpu.memory_space<vmem>>, vector<1x1x1x32xf32>
    %624 = vector.shape_cast %623 : vector<1x1x1x32xf32> to vector<1x32xf32>
    %cst_380 = arith.constant dense<0.000000e+00> : vector<8xf32>
    %625 = vector.multi_reduction <add>, %620, %cst_380 [1] : vector<8x32xf32> to vector<8xf32>
    %626 = vector.shape_cast %625 : vector<8xf32> to vector<8x1xf32>
    %cst_381 = arith.constant 3.200000e+01 : f32
    %627 = vector.broadcast %cst_381 : f32 to vector<8x1xf32>
    %628 = arith.divf %626, %627 : vector<8x1xf32>
    %629 = vector.broadcast %628 : vector<8x1xf32> to vector<8x32xf32>
    %630 = arith.subf %620, %629 : vector<8x32xf32>
    %631 = arith.mulf %630, %630 : vector<8x32xf32>
    %cst_382 = arith.constant dense<0.000000e+00> : vector<8xf32>
    %632 = vector.multi_reduction <add>, %631, %cst_382 [1] : vector<8x32xf32> to vector<8xf32>
    %633 = vector.shape_cast %632 : vector<8xf32> to vector<8x1xf32>
    %cst_383 = arith.constant 3.200000e+01 : f32
    %634 = vector.broadcast %cst_383 : f32 to vector<8x1xf32>
    %635 = arith.divf %633, %634 : vector<8x1xf32>
    %636 = vector.broadcast %628 : vector<8x1xf32> to vector<8x32xf32>
    %637 = arith.subf %620, %636 : vector<8x32xf32>
    %cst_384 = arith.constant 9.99999974E-6 : f32
    %638 = vector.broadcast %cst_384 : f32 to vector<8x1xf32>
    %639 = arith.addf %635, %638 : vector<8x1xf32>
    %640 = math.rsqrt %639 : vector<8x1xf32>
    %641 = vector.broadcast %640 : vector<8x1xf32> to vector<8x32xf32>
    %642 = arith.mulf %637, %641 : vector<8x32xf32>
    %643 = vector.broadcast %622 : vector<1x32xf32> to vector<8x32xf32>
    %644 = arith.mulf %642, %643 : vector<8x32xf32>
    %645 = vector.broadcast %624 : vector<1x32xf32> to vector<8x32xf32>
    %646 = arith.addf %644, %645 : vector<8x32xf32>
    %c1_385 = arith.constant 1 : index
    %c0_386 = arith.constant 0 : index
    %c0_387 = arith.constant 0 : index
    %c0_388 = arith.constant 0 : index
    %647 = vector.load %arg37[%c1_385, %c0_386, %c0_387, %c0_388] : memref<2x1x32x64xf32, #tpu.memory_space<vmem>>, vector<1x1x32x64xf32>
    %648 = vector.shape_cast %647 : vector<1x1x32x64xf32> to vector<32x64xf32>
    %c1_389 = arith.constant 1 : index
    %c0_390 = arith.constant 0 : index
    %c0_391 = arith.constant 0 : index
    %c0_392 = arith.constant 0 : index
    %649 = vector.load %arg38[%c1_389, %c0_390, %c0_391, %c0_392] : memref<2x1x1x64xf32, #tpu.memory_space<vmem>>, vector<1x1x1x64xf32>
    %650 = vector.shape_cast %649 : vector<1x1x1x64xf32> to vector<1x64xf32>
    %c1_393 = arith.constant 1 : index
    %c0_394 = arith.constant 0 : index
    %c0_395 = arith.constant 0 : index
    %c0_396 = arith.constant 0 : index
    %651 = vector.load %arg39[%c1_393, %c0_394, %c0_395, %c0_396] : memref<2x1x64x32xf32, #tpu.memory_space<vmem>>, vector<1x1x64x32xf32>
    %652 = vector.shape_cast %651 : vector<1x1x64x32xf32> to vector<64x32xf32>
    %c1_397 = arith.constant 1 : index
    %c0_398 = arith.constant 0 : index
    %c0_399 = arith.constant 0 : index
    %c0_400 = arith.constant 0 : index
    %653 = vector.load %arg40[%c1_397, %c0_398, %c0_399, %c0_400] : memref<2x1x1x32xf32, #tpu.memory_space<vmem>>, vector<1x1x1x32xf32>
    %654 = vector.shape_cast %653 : vector<1x1x1x32xf32> to vector<1x32xf32>
    %cst_401 = arith.constant dense<0.000000e+00> : vector<8x64xf32>
    %655 = tpu.matmul %646, %648, %cst_401 {dimension_numbers = #tpu.dot_dimension_numbers<[1], [0], [0], [1], [0, 0, 1, 1], [], []>} : vector<8x32xf32>, vector<32x64xf32>, vector<8x64xf32> -> vector<8x64xf32>
    %656 = vector.broadcast %650 : vector<1x64xf32> to vector<8x64xf32>
    %657 = arith.addf %655, %656 : vector<8x64xf32>
    %cst_402 = arith.constant 0.000000e+00 : f32
    %658 = vector.broadcast %cst_402 : f32 to vector<8x64xf32>
    %659 = arith.maximumf %657, %658 : vector<8x64xf32>
    %cst_403 = arith.constant dense<0.000000e+00> : vector<8x32xf32>
    %660 = tpu.matmul %659, %652, %cst_403 {dimension_numbers = #tpu.dot_dimension_numbers<[1], [0], [0], [1], [0, 0, 1, 1], [], []>} : vector<8x64xf32>, vector<64x32xf32>, vector<8x32xf32> -> vector<8x32xf32>
    %661 = vector.broadcast %654 : vector<1x32xf32> to vector<8x32xf32>
    %662 = arith.addf %660, %661 : vector<8x32xf32>
    %663 = arith.addf %646, %662 : vector<8x32xf32>
    %c1_404 = arith.constant 1 : index
    %c0_405 = arith.constant 0 : index
    %c0_406 = arith.constant 0 : index
    %c0_407 = arith.constant 0 : index
    %664 = vector.load %arg35[%c1_404, %c0_405, %c0_406, %c0_407] : memref<2x1x1x32xf32, #tpu.memory_space<vmem>>, vector<1x1x1x32xf32>
    %665 = vector.shape_cast %664 : vector<1x1x1x32xf32> to vector<1x32xf32>
    %c1_408 = arith.constant 1 : index
    %c0_409 = arith.constant 0 : index
    %c0_410 = arith.constant 0 : index
    %c0_411 = arith.constant 0 : index
    %666 = vector.load %arg36[%c1_408, %c0_409, %c0_410, %c0_411] : memref<2x1x1x32xf32, #tpu.memory_space<vmem>>, vector<1x1x1x32xf32>
    %667 = vector.shape_cast %666 : vector<1x1x1x32xf32> to vector<1x32xf32>
    %cst_412 = arith.constant dense<0.000000e+00> : vector<8xf32>
    %668 = vector.multi_reduction <add>, %663, %cst_412 [1] : vector<8x32xf32> to vector<8xf32>
    %669 = vector.shape_cast %668 : vector<8xf32> to vector<8x1xf32>
    %cst_413 = arith.constant 3.200000e+01 : f32
    %670 = vector.broadcast %cst_413 : f32 to vector<8x1xf32>
    %671 = arith.divf %669, %670 : vector<8x1xf32>
    %672 = vector.broadcast %671 : vector<8x1xf32> to vector<8x32xf32>
    %673 = arith.subf %663, %672 : vector<8x32xf32>
    %674 = arith.mulf %673, %673 : vector<8x32xf32>
    %cst_414 = arith.constant dense<0.000000e+00> : vector<8xf32>
    %675 = vector.multi_reduction <add>, %674, %cst_414 [1] : vector<8x32xf32> to vector<8xf32>
    %676 = vector.shape_cast %675 : vector<8xf32> to vector<8x1xf32>
    %cst_415 = arith.constant 3.200000e+01 : f32
    %677 = vector.broadcast %cst_415 : f32 to vector<8x1xf32>
    %678 = arith.divf %676, %677 : vector<8x1xf32>
    %679 = vector.broadcast %671 : vector<8x1xf32> to vector<8x32xf32>
    %680 = arith.subf %663, %679 : vector<8x32xf32>
    %cst_416 = arith.constant 9.99999974E-6 : f32
    %681 = vector.broadcast %cst_416 : f32 to vector<8x1xf32>
    %682 = arith.addf %678, %681 : vector<8x1xf32>
    %683 = math.rsqrt %682 : vector<8x1xf32>
    %684 = vector.broadcast %683 : vector<8x1xf32> to vector<8x32xf32>
    %685 = arith.mulf %680, %684 : vector<8x32xf32>
    %686 = vector.broadcast %665 : vector<1x32xf32> to vector<8x32xf32>
    %687 = arith.mulf %685, %686 : vector<8x32xf32>
    %688 = vector.broadcast %667 : vector<1x32xf32> to vector<8x32xf32>
    %689 = arith.addf %687, %688 : vector<8x32xf32>
    %690 = arith.addf %487, %689 : vector<8x32xf32>
    %691 = arith.addf %690, %282 : vector<8x32xf32>
    %692 = vector.extract_strided_slice %691 {offsets = [0, 0], sizes = [1, 32], strides = [1, 1]} : vector<8x32xf32> to vector<1x32xf32>
    %c0_417 = arith.constant 0 : index
    %c0_418 = arith.constant 0 : index
    %693 = vector.load %arg48[%c0_417, %c0_418] : memref<1x256xf32, #tpu.memory_space<vmem>>, vector<1x32xf32>
    tpu.vector_store %arg48[%c0_417, %c0_418], %692 {strides = array<i32>} : memref<1x256xf32, #tpu.memory_space<vmem>>, vector<1x32xf32>,
    %694 = vector.extract_strided_slice %691 {offsets = [1, 0], sizes = [1, 32], strides = [1, 1]} : vector<8x32xf32> to vector<1x32xf32>
    %c0_419 = arith.constant 0 : index
    %c32_420 = arith.constant 32 : index
    %695 = vector.load %arg48[%c0_419, %c32_420] : memref<1x256xf32, #tpu.memory_space<vmem>>, vector<1x32xf32>
    tpu.vector_store %arg48[%c0_419, %c32_420], %694 {strides = array<i32>} : memref<1x256xf32, #tpu.memory_space<vmem>>, vector<1x32xf32>,
    %696 = vector.extract_strided_slice %691 {offsets = [2, 0], sizes = [1, 32], strides = [1, 1]} : vector<8x32xf32> to vector<1x32xf32>
    %c0_421 = arith.constant 0 : index
    %c64_422 = arith.constant 64 : index
    %697 = vector.load %arg48[%c0_421, %c64_422] : memref<1x256xf32, #tpu.memory_space<vmem>>, vector<1x32xf32>
    tpu.vector_store %arg48[%c0_421, %c64_422], %696 {strides = array<i32>} : memref<1x256xf32, #tpu.memory_space<vmem>>, vector<1x32xf32>,
    %698 = vector.extract_strided_slice %691 {offsets = [3, 0], sizes = [1, 32], strides = [1, 1]} : vector<8x32xf32> to vector<1x32xf32>
    %c0_423 = arith.constant 0 : index
    %c96_424 = arith.constant 96 : index
    %699 = vector.load %arg48[%c0_423, %c96_424] : memref<1x256xf32, #tpu.memory_space<vmem>>, vector<1x32xf32>
    tpu.vector_store %arg48[%c0_423, %c96_424], %698 {strides = array<i32>} : memref<1x256xf32, #tpu.memory_space<vmem>>, vector<1x32xf32>,
    %700 = vector.extract_strided_slice %691 {offsets = [4, 0], sizes = [1, 32], strides = [1, 1]} : vector<8x32xf32> to vector<1x32xf32>
    %c0_425 = arith.constant 0 : index
    %c128_426 = arith.constant 128 : index
    %701 = vector.load %arg48[%c0_425, %c128_426] : memref<1x256xf32, #tpu.memory_space<vmem>>, vector<1x32xf32>
    tpu.vector_store %arg48[%c0_425, %c128_426], %700 {strides = array<i32>} : memref<1x256xf32, #tpu.memory_space<vmem>>, vector<1x32xf32>,
    %702 = vector.extract_strided_slice %691 {offsets = [5, 0], sizes = [1, 32], strides = [1, 1]} : vector<8x32xf32> to vector<1x32xf32>
    %c0_427 = arith.constant 0 : index
    %c160_428 = arith.constant 160 : index
    %703 = vector.load %arg48[%c0_427, %c160_428] : memref<1x256xf32, #tpu.memory_space<vmem>>, vector<1x32xf32>
    tpu.vector_store %arg48[%c0_427, %c160_428], %702 {strides = array<i32>} : memref<1x256xf32, #tpu.memory_space<vmem>>, vector<1x32xf32>,
    %704 = vector.extract_strided_slice %691 {offsets = [6, 0], sizes = [1, 32], strides = [1, 1]} : vector<8x32xf32> to vector<1x32xf32>
    %c0_429 = arith.constant 0 : index
    %c192_430 = arith.constant 192 : index
    %705 = vector.load %arg48[%c0_429, %c192_430] : memref<1x256xf32, #tpu.memory_space<vmem>>, vector<1x32xf32>
    tpu.vector_store %arg48[%c0_429, %c192_430], %704 {strides = array<i32>} : memref<1x256xf32, #tpu.memory_space<vmem>>, vector<1x32xf32>,
    %706 = vector.extract_strided_slice %691 {offsets = [7, 0], sizes = [1, 32], strides = [1, 1]} : vector<8x32xf32> to vector<1x32xf32>
    %c0_431 = arith.constant 0 : index
    %c224_432 = arith.constant 224 : index
    %707 = vector.load %arg48[%c0_431, %c224_432] : memref<1x256xf32, #tpu.memory_space<vmem>>, vector<1x32xf32>
    tpu.vector_store %arg48[%c0_431, %c224_432], %706 {strides = array<i32>} : memref<1x256xf32, #tpu.memory_space<vmem>>, vector<1x32xf32>,
    %c0_433 = arith.constant 0 : index
    %c0_434 = arith.constant 0 : index
    %708 = vector.load %arg48[%c0_433, %c0_434] : memref<1x256xf32, #tpu.memory_space<vmem>>, vector<1x256xf32>
    %c0_435 = arith.constant 0 : index
    %c0_436 = arith.constant 0 : index
    %709 = vector.load %arg41[%c0_435, %c0_436] : memref<1x256xf32, #tpu.memory_space<vmem>>, vector<1x256xf32>
    %c0_437 = arith.constant 0 : index
    %c0_438 = arith.constant 0 : index
    %710 = vector.load %arg42[%c0_437, %c0_438] : memref<1x256xf32, #tpu.memory_space<vmem>>, vector<1x256xf32>
    %cst_439 = arith.constant dense<0.000000e+00> : vector<1xf32>
    %711 = vector.multi_reduction <add>, %708, %cst_439 [1] : vector<1x256xf32> to vector<1xf32>
    %712 = vector.shape_cast %711 : vector<1xf32> to vector<1x1xf32>
    %cst_440 = arith.constant 2.560000e+02 : f32
    %713 = vector.broadcast %cst_440 : f32 to vector<1x1xf32>
    %714 = arith.divf %712, %713 : vector<1x1xf32>
    %715 = vector.broadcast %714 : vector<1x1xf32> to vector<1x256xf32>
    %716 = arith.subf %708, %715 : vector<1x256xf32>
    %717 = arith.mulf %716, %716 : vector<1x256xf32>
    %cst_441 = arith.constant dense<0.000000e+00> : vector<1xf32>
    %718 = vector.multi_reduction <add>, %717, %cst_441 [1] : vector<1x256xf32> to vector<1xf32>
    %719 = vector.shape_cast %718 : vector<1xf32> to vector<1x1xf32>
    %cst_442 = arith.constant 2.560000e+02 : f32
    %720 = vector.broadcast %cst_442 : f32 to vector<1x1xf32>
    %721 = arith.divf %719, %720 : vector<1x1xf32>
    %722 = vector.broadcast %714 : vector<1x1xf32> to vector<1x256xf32>
    %723 = arith.subf %708, %722 : vector<1x256xf32>
    %cst_443 = arith.constant 9.99999974E-6 : f32
    %724 = vector.broadcast %cst_443 : f32 to vector<1x1xf32>
    %725 = arith.addf %721, %724 : vector<1x1xf32>
    %726 = math.rsqrt %725 : vector<1x1xf32>
    %727 = vector.broadcast %726 : vector<1x1xf32> to vector<1x256xf32>
    %728 = arith.mulf %723, %727 : vector<1x256xf32>
    %729 = arith.mulf %728, %709 : vector<1x256xf32>
    %730 = arith.addf %729, %710 : vector<1x256xf32>
    %c0_444 = arith.constant 0 : index
    %c0_445 = arith.constant 0 : index
    %731 = vector.load %arg43[%c0_444, %c0_445] : memref<256x32xf32, #tpu.memory_space<vmem>>, vector<256x32xf32>
    %cst_446 = arith.constant dense<0.000000e+00> : vector<1x32xf32>
    %732 = tpu.matmul %730, %731, %cst_446 {dimension_numbers = #tpu.dot_dimension_numbers<[1], [0], [0], [1], [0, 0, 1, 1], [], []>} : vector<1x256xf32>, vector<256x32xf32>, vector<1x32xf32> -> vector<1x32xf32>
    %c0_447 = arith.constant 0 : index
    %c0_448 = arith.constant 0 : index
    %733 = vector.load %arg44[%c0_447, %c0_448] : memref<1x32xf32, #tpu.memory_space<vmem>>, vector<1x32xf32>
    %734 = arith.addf %732, %733 : vector<1x32xf32>
    %cst_449 = arith.constant 0.000000e+00 : f32
    %735 = vector.broadcast %cst_449 : f32 to vector<1x32xf32>
    %736 = arith.maximumf %734, %735 : vector<1x32xf32>
    %c0_450 = arith.constant 0 : index
    %c0_451 = arith.constant 0 : index
    %737 = vector.load %arg45[%c0_450, %c0_451] : memref<32x10xf32, #tpu.memory_space<vmem>>, vector<32x10xf32>
    %cst_452 = arith.constant dense<0.000000e+00> : vector<1x10xf32>
    %738 = tpu.matmul %736, %737, %cst_452 {dimension_numbers = #tpu.dot_dimension_numbers<[1], [0], [0], [1], [0, 0, 1, 1], [], []>} : vector<1x32xf32>, vector<32x10xf32>, vector<1x10xf32> -> vector<1x10xf32>
    %739 = tpu.iota {dimensions = array<i32: 1>} : vector<1x10xi32>
    %c8_i32 = arith.constant 8 : i32
    %740 = vector.broadcast %c8_i32 : i32 to vector<1x10xi32>
    %741 = arith.cmpi slt, %739, %740 : vector<1x10xi32>
    %cst_453 = arith.constant 0.000000e+00 : f32
    %742 = vector.broadcast %cst_453 : f32 to vector<1x10xf32>
    %743 = arith.select %741, %742, %738 : vector<1x10xi1>, vector<1x10xf32>
    %744 = math.exp %743 : vector<1x10xf32>
    %745 = arith.negf %738 : vector<1x10xf32>
    %746 = math.exp %745 : vector<1x10xf32>
    %cst_454 = arith.constant 1.000000e+00 : f32
    %747 = vector.broadcast %cst_454 : f32 to vector<1x10xf32>
    %748 = arith.addf %747, %746 : vector<1x10xf32>
    %749 = arith.divf %747, %748 : vector<1x10xf32>
    %750 = arith.select %741, %749, %744 : vector<1x10xi1>, vector<1x10xf32>
    %c0_455 = arith.constant 0 : index
    %c0_456 = arith.constant 0 : index
    %c0_457 = arith.constant 0 : index
    %751 = vector.load %arg46[%c0_455, %c0_456, %c0_457] : memref<1x1x10xf32, #tpu.memory_space<vmem>>, vector<1x1x10xf32>
    %752 = vector.shape_cast %751 : vector<1x1x10xf32> to vector<1x10xf32>
    %753 = vector.shape_cast %750 : vector<1x10xf32> to vector<1x1x10xf32>
    tpu.vector_store %arg46[%c0_455, %c0_456, %c0_457], %753 {strides = array<i32>} : memref<1x1x10xf32, #tpu.memory_space<vmem>>, vector<1x1x10xf32>,
    return
  }
  func.func @transform_0(%arg0: i32) -> (i32, i32, i32) {
    %c0_i32 = arith.constant 0 : i32
    %c0_i32_0 = arith.constant 0 : i32
    %c0_i32_1 = arith.constant 0 : i32
    return %arg0, %c0_i32, %c0_i32_0 : i32, i32, i32
  }
  func.func @transform_1(%arg0: i32) -> (i32, i32, i32) {
    %c0_i32 = arith.constant 0 : i32
    %c0_i32_0 = arith.constant 0 : i32
    %c0_i32_1 = arith.constant 0 : i32
    return %arg0, %c0_i32, %c0_i32_0 : i32, i32, i32
  }
  func.func @transform_2(%arg0: i32) -> (i32, i32, i32, i32) {
    %c0_i32 = arith.constant 0 : i32
    %c0_i32_0 = arith.constant 0 : i32
    %c0_i32_1 = arith.constant 0 : i32
    %c0_i32_2 = arith.constant 0 : i32
    return %arg0, %c0_i32, %c0_i32_0, %c0_i32_1 : i32, i32, i32, i32
  }
  func.func @transform_3(%arg0: i32) -> (i32, i32) {
    %c0_i32 = arith.constant 0 : i32
    %c0_i32_0 = arith.constant 0 : i32
    %c0_i32_1 = arith.constant 0 : i32
    return %c0_i32, %c0_i32_0 : i32, i32
  }
  func.func @transform_4(%arg0: i32) -> (i32, i32, i32) {
    %c0_i32 = arith.constant 0 : i32
    %c0_i32_0 = arith.constant 0 : i32
    %c0_i32_1 = arith.constant 0 : i32
    %c0_i32_2 = arith.constant 0 : i32
    return %c0_i32, %c0_i32_0, %c0_i32_1 : i32, i32, i32
  }
  func.func @transform_5(%arg0: i32) -> (i32, i32, i32) {
    %c0_i32 = arith.constant 0 : i32
    %c0_i32_0 = arith.constant 0 : i32
    %c0_i32_1 = arith.constant 0 : i32
    %c0_i32_2 = arith.constant 0 : i32
    return %c0_i32, %c0_i32_0, %c0_i32_1 : i32, i32, i32
  }
  func.func @transform_6(%arg0: i32) -> (i32, i32, i32) {
    %c0_i32 = arith.constant 0 : i32
    %c0_i32_0 = arith.constant 0 : i32
    %c0_i32_1 = arith.constant 0 : i32
    %c0_i32_2 = arith.constant 0 : i32
    return %c0_i32, %c0_i32_0, %c0_i32_1 : i32, i32, i32
  }
  func.func @transform_7(%arg0: i32) -> (i32, i32, i32) {
    %c0_i32 = arith.constant 0 : i32
    %c0_i32_0 = arith.constant 0 : i32
    %c0_i32_1 = arith.constant 0 : i32
    %c0_i32_2 = arith.constant 0 : i32
    return %c0_i32, %c0_i32_0, %c0_i32_1 : i32, i32, i32
  }
  func.func @transform_8(%arg0: i32) -> (i32, i32, i32) {
    %c0_i32 = arith.constant 0 : i32
    %c0_i32_0 = arith.constant 0 : i32
    %c0_i32_1 = arith.constant 0 : i32
    %c0_i32_2 = arith.constant 0 : i32
    return %c0_i32, %c0_i32_0, %c0_i32_1 : i32, i32, i32
  }
  func.func @transform_9(%arg0: i32) -> (i32, i32, i32) {
    %c0_i32 = arith.constant 0 : i32
    %c0_i32_0 = arith.constant 0 : i32
    %c0_i32_1 = arith.constant 0 : i32
    %c0_i32_2 = arith.constant 0 : i32
    return %c0_i32, %c0_i32_0, %c0_i32_1 : i32, i32, i32
  }
  func.func @transform_10(%arg0: i32) -> (i32, i32, i32) {
    %c0_i32 = arith.constant 0 : i32
    %c0_i32_0 = arith.constant 0 : i32
    %c0_i32_1 = arith.constant 0 : i32
    %c0_i32_2 = arith.constant 0 : i32
    return %c0_i32, %c0_i32_0, %c0_i32_1 : i32, i32, i32
  }
  func.func @transform_11(%arg0: i32) -> (i32, i32, i32) {
    %c0_i32 = arith.constant 0 : i32
    %c0_i32_0 = arith.constant 0 : i32
    %c0_i32_1 = arith.constant 0 : i32
    %c0_i32_2 = arith.constant 0 : i32
    return %c0_i32, %c0_i32_0, %c0_i32_1 : i32, i32, i32
  }
  func.func @transform_12(%arg0: i32) -> (i32, i32, i32) {
    %c0_i32 = arith.constant 0 : i32
    %c0_i32_0 = arith.constant 0 : i32
    %c0_i32_1 = arith.constant 0 : i32
    %c0_i32_2 = arith.constant 0 : i32
    return %c0_i32, %c0_i32_0, %c0_i32_1 : i32, i32, i32
  }
  func.func @transform_13(%arg0: i32) -> (i32, i32, i32) {
    %c0_i32 = arith.constant 0 : i32
    %c0_i32_0 = arith.constant 0 : i32
    %c0_i32_1 = arith.constant 0 : i32
    %c0_i32_2 = arith.constant 0 : i32
    return %c0_i32, %c0_i32_0, %c0_i32_1 : i32, i32, i32
  }
  func.func @transform_14(%arg0: i32) -> (i32, i32, i32) {
    %c0_i32 = arith.constant 0 : i32
    %c0_i32_0 = arith.constant 0 : i32
    %c0_i32_1 = arith.constant 0 : i32
    %c0_i32_2 = arith.constant 0 : i32
    return %c0_i32, %c0_i32_0, %c0_i32_1 : i32, i32, i32
  }
  func.func @transform_15(%arg0: i32) -> (i32, i32, i32) {
    %c0_i32 = arith.constant 0 : i32
    %c0_i32_0 = arith.constant 0 : i32
    %c0_i32_1 = arith.constant 0 : i32
    %c0_i32_2 = arith.constant 0 : i32
    return %c0_i32, %c0_i32_0, %c0_i32_1 : i32, i32, i32
  }
  func.func @transform_16(%arg0: i32) -> (i32, i32) {
    %c0_i32 = arith.constant 0 : i32
    %c0_i32_0 = arith.constant 0 : i32
    %c0_i32_1 = arith.constant 0 : i32
    return %c0_i32, %c0_i32_0 : i32, i32
  }
  func.func @transform_17(%arg0: i32) -> (i32, i32) {
    %c0_i32 = arith.constant 0 : i32
    %c0_i32_0 = arith.constant 0 : i32
    %c0_i32_1 = arith.constant 0 : i32
    return %c0_i32, %c0_i32_0 : i32, i32
  }
  func.func @transform_18(%arg0: i32) -> (i32, i32) {
    %c0_i32 = arith.constant 0 : i32
    %c0_i32_0 = arith.constant 0 : i32
    %c0_i32_1 = arith.constant 0 : i32
    return %c0_i32, %c0_i32_0 : i32, i32
  }
  func.func @transform_19(%arg0: i32) -> (i32, i32) {
    %c0_i32 = arith.constant 0 : i32
    %c0_i32_0 = arith.constant 0 : i32
    %c0_i32_1 = arith.constant 0 : i32
    return %c0_i32, %c0_i32_0 : i32, i32
  }
  func.func @transform_20(%arg0: i32) -> (i32, i32, i32, i32) {
    %c0_i32 = arith.constant 0 : i32
    %c0_i32_0 = arith.constant 0 : i32
    %c0_i32_1 = arith.constant 0 : i32
    %c0_i32_2 = arith.constant 0 : i32
    %c0_i32_3 = arith.constant 0 : i32
    return %c0_i32, %c0_i32_0, %c0_i32_1, %c0_i32_2 : i32, i32, i32, i32
  }
  func.func @transform_21(%arg0: i32) -> (i32, i32, i32, i32) {
    %c0_i32 = arith.constant 0 : i32
    %c0_i32_0 = arith.constant 0 : i32
    %c0_i32_1 = arith.constant 0 : i32
    %c0_i32_2 = arith.constant 0 : i32
    %c0_i32_3 = arith.constant 0 : i32
    return %c0_i32, %c0_i32_0, %c0_i32_1, %c0_i32_2 : i32, i32, i32, i32
  }
  func.func @transform_22(%arg0: i32) -> (i32, i32, i32, i32) {
    %c0_i32 = arith.constant 0 : i32
    %c0_i32_0 = arith.constant 0 : i32
    %c0_i32_1 = arith.constant 0 : i32
    %c0_i32_2 = arith.constant 0 : i32
    %c0_i32_3 = arith.constant 0 : i32
    return %c0_i32, %c0_i32_0, %c0_i32_1, %c0_i32_2 : i32, i32, i32, i32
  }
  func.func @transform_23(%arg0: i32) -> (i32, i32, i32, i32) {
    %c0_i32 = arith.constant 0 : i32
    %c0_i32_0 = arith.constant 0 : i32
    %c0_i32_1 = arith.constant 0 : i32
    %c0_i32_2 = arith.constant 0 : i32
    %c0_i32_3 = arith.constant 0 : i32
    return %c0_i32, %c0_i32_0, %c0_i32_1, %c0_i32_2 : i32, i32, i32, i32
  }
  func.func @transform_24(%arg0: i32) -> (i32, i32, i32, i32) {
    %c0_i32 = arith.constant 0 : i32
    %c0_i32_0 = arith.constant 0 : i32
    %c0_i32_1 = arith.constant 0 : i32
    %c0_i32_2 = arith.constant 0 : i32
    %c0_i32_3 = arith.constant 0 : i32
    return %c0_i32, %c0_i32_0, %c0_i32_1, %c0_i32_2 : i32, i32, i32, i32
  }
  func.func @transform_25(%arg0: i32) -> (i32, i32, i32, i32) {
    %c0_i32 = arith.constant 0 : i32
    %c0_i32_0 = arith.constant 0 : i32
    %c0_i32_1 = arith.constant 0 : i32
    %c0_i32_2 = arith.constant 0 : i32
    %c0_i32_3 = arith.constant 0 : i32
    return %c0_i32, %c0_i32_0, %c0_i32_1, %c0_i32_2 : i32, i32, i32, i32
  }
  func.func @transform_26(%arg0: i32) -> (i32, i32, i32, i32) {
    %c0_i32 = arith.constant 0 : i32
    %c0_i32_0 = arith.constant 0 : i32
    %c0_i32_1 = arith.constant 0 : i32
    %c0_i32_2 = arith.constant 0 : i32
    %c0_i32_3 = arith.constant 0 : i32
    return %c0_i32, %c0_i32_0, %c0_i32_1, %c0_i32_2 : i32, i32, i32, i32
  }
  func.func @transform_27(%arg0: i32) -> (i32, i32, i32, i32) {
    %c0_i32 = arith.constant 0 : i32
    %c0_i32_0 = arith.constant 0 : i32
    %c0_i32_1 = arith.constant 0 : i32
    %c0_i32_2 = arith.constant 0 : i32
    %c0_i32_3 = arith.constant 0 : i32
    return %c0_i32, %c0_i32_0, %c0_i32_1, %c0_i32_2 : i32, i32, i32, i32
  }
  func.func @transform_28(%arg0: i32) -> (i32, i32, i32, i32) {
    %c0_i32 = arith.constant 0 : i32
    %c0_i32_0 = arith.constant 0 : i32
    %c0_i32_1 = arith.constant 0 : i32
    %c0_i32_2 = arith.constant 0 : i32
    %c0_i32_3 = arith.constant 0 : i32
    return %c0_i32, %c0_i32_0, %c0_i32_1, %c0_i32_2 : i32, i32, i32, i32
  }
  func.func @transform_29(%arg0: i32) -> (i32, i32, i32, i32) {
    %c0_i32 = arith.constant 0 : i32
    %c0_i32_0 = arith.constant 0 : i32
    %c0_i32_1 = arith.constant 0 : i32
    %c0_i32_2 = arith.constant 0 : i32
    %c0_i32_3 = arith.constant 0 : i32
    return %c0_i32, %c0_i32_0, %c0_i32_1, %c0_i32_2 : i32, i32, i32, i32
  }
  func.func @transform_30(%arg0: i32) -> (i32, i32, i32, i32) {
    %c0_i32 = arith.constant 0 : i32
    %c0_i32_0 = arith.constant 0 : i32
    %c0_i32_1 = arith.constant 0 : i32
    %c0_i32_2 = arith.constant 0 : i32
    %c0_i32_3 = arith.constant 0 : i32
    return %c0_i32, %c0_i32_0, %c0_i32_1, %c0_i32_2 : i32, i32, i32, i32
  }
  func.func @transform_31(%arg0: i32) -> (i32, i32, i32, i32) {
    %c0_i32 = arith.constant 0 : i32
    %c0_i32_0 = arith.constant 0 : i32
    %c0_i32_1 = arith.constant 0 : i32
    %c0_i32_2 = arith.constant 0 : i32
    %c0_i32_3 = arith.constant 0 : i32
    return %c0_i32, %c0_i32_0, %c0_i32_1, %c0_i32_2 : i32, i32, i32, i32
  }
  func.func @transform_32(%arg0: i32) -> (i32, i32, i32, i32) {
    %c0_i32 = arith.constant 0 : i32
    %c0_i32_0 = arith.constant 0 : i32
    %c0_i32_1 = arith.constant 0 : i32
    %c0_i32_2 = arith.constant 0 : i32
    %c0_i32_3 = arith.constant 0 : i32
    return %c0_i32, %c0_i32_0, %c0_i32_1, %c0_i32_2 : i32, i32, i32, i32
  }
  func.func @transform_33(%arg0: i32) -> (i32, i32, i32, i32) {
    %c0_i32 = arith.constant 0 : i32
    %c0_i32_0 = arith.constant 0 : i32
    %c0_i32_1 = arith.constant 0 : i32
    %c0_i32_2 = arith.constant 0 : i32
    %c0_i32_3 = arith.constant 0 : i32
    return %c0_i32, %c0_i32_0, %c0_i32_1, %c0_i32_2 : i32, i32, i32, i32
  }
  func.func @transform_34(%arg0: i32) -> (i32, i32, i32, i32) {
    %c0_i32 = arith.constant 0 : i32
    %c0_i32_0 = arith.constant 0 : i32
    %c0_i32_1 = arith.constant 0 : i32
    %c0_i32_2 = arith.constant 0 : i32
    %c0_i32_3 = arith.constant 0 : i32
    return %c0_i32, %c0_i32_0, %c0_i32_1, %c0_i32_2 : i32, i32, i32, i32
  }
  func.func @transform_35(%arg0: i32) -> (i32, i32, i32, i32) {
    %c0_i32 = arith.constant 0 : i32
    %c0_i32_0 = arith.constant 0 : i32
    %c0_i32_1 = arith.constant 0 : i32
    %c0_i32_2 = arith.constant 0 : i32
    %c0_i32_3 = arith.constant 0 : i32
    return %c0_i32, %c0_i32_0, %c0_i32_1, %c0_i32_2 : i32, i32, i32, i32
  }
  func.func @transform_36(%arg0: i32) -> (i32, i32, i32, i32) {
    %c0_i32 = arith.constant 0 : i32
    %c0_i32_0 = arith.constant 0 : i32
    %c0_i32_1 = arith.constant 0 : i32
    %c0_i32_2 = arith.constant 0 : i32
    %c0_i32_3 = arith.constant 0 : i32
    return %c0_i32, %c0_i32_0, %c0_i32_1, %c0_i32_2 : i32, i32, i32, i32
  }
  func.func @transform_37(%arg0: i32) -> (i32, i32, i32, i32) {
    %c0_i32 = arith.constant 0 : i32
    %c0_i32_0 = arith.constant 0 : i32
    %c0_i32_1 = arith.constant 0 : i32
    %c0_i32_2 = arith.constant 0 : i32
    %c0_i32_3 = arith.constant 0 : i32
    return %c0_i32, %c0_i32_0, %c0_i32_1, %c0_i32_2 : i32, i32, i32, i32
  }
  func.func @transform_38(%arg0: i32) -> (i32, i32, i32, i32) {
    %c0_i32 = arith.constant 0 : i32
    %c0_i32_0 = arith.constant 0 : i32
    %c0_i32_1 = arith.constant 0 : i32
    %c0_i32_2 = arith.constant 0 : i32
    %c0_i32_3 = arith.constant 0 : i32
    return %c0_i32, %c0_i32_0, %c0_i32_1, %c0_i32_2 : i32, i32, i32, i32
  }
  func.func @transform_39(%arg0: i32) -> (i32, i32, i32, i32) {
    %c0_i32 = arith.constant 0 : i32
    %c0_i32_0 = arith.constant 0 : i32
    %c0_i32_1 = arith.constant 0 : i32
    %c0_i32_2 = arith.constant 0 : i32
    %c0_i32_3 = arith.constant 0 : i32
    return %c0_i32, %c0_i32_0, %c0_i32_1, %c0_i32_2 : i32, i32, i32, i32
  }
  func.func @transform_40(%arg0: i32) -> (i32, i32) {
    %c0_i32 = arith.constant 0 : i32
    %c0_i32_0 = arith.constant 0 : i32
    %c0_i32_1 = arith.constant 0 : i32
    return %c0_i32, %c0_i32_0 : i32, i32
  }
  func.func @transform_41(%arg0: i32) -> (i32, i32) {
    %c0_i32 = arith.constant 0 : i32
    %c0_i32_0 = arith.constant 0 : i32
    %c0_i32_1 = arith.constant 0 : i32
    return %c0_i32, %c0_i32_0 : i32, i32
  }
  func.func @transform_42(%arg0: i32) -> (i32, i32) {
    %c0_i32 = arith.constant 0 : i32
    %c0_i32_0 = arith.constant 0 : i32
    %c0_i32_1 = arith.constant 0 : i32
    return %c0_i32, %c0_i32_0 : i32, i32
  }
  func.func @transform_43(%arg0: i32) -> (i32, i32) {
    %c0_i32 = arith.constant 0 : i32
    %c0_i32_0 = arith.constant 0 : i32
    %c0_i32_1 = arith.constant 0 : i32
    return %c0_i32, %c0_i32_0 : i32, i32
  }
  func.func @transform_44(%arg0: i32) -> (i32, i32) {
    %c0_i32 = arith.constant 0 : i32
    %c0_i32_0 = arith.constant 0 : i32
    %c0_i32_1 = arith.constant 0 : i32
    return %c0_i32, %c0_i32_0 : i32, i32
  }
  func.func @transform_45(%arg0: i32) -> (i32, i32, i32) {
    %c0_i32 = arith.constant 0 : i32
    %c0_i32_0 = arith.constant 0 : i32
    %c0_i32_1 = arith.constant 0 : i32
    return %arg0, %c0_i32, %c0_i32_0 : i32, i32, i32
  }
}

</mosaic_0001>

<bundles_post_ra>
// kernel: _lambda_.1
= control target key start
LH: loop header
LB: loop body
LE: loop exit
PB: predicated region body
PF: predicated region fallthrough
CT: control target
= control target key end

     0   :  { %s8378_s6 = smov 1   ;;  %s8379_s10 = smov 2   ;;  %s9728_s0 = inlined_call_operand.smem [shape: u32[46], index: -1, kind: input, shape index: {}] }
   0x1   :  { %s8457_s5 = sld [smem:[%s9728_s0]]   ;;  %s8380_s14 = smov 3  }
   0x2   :  { %s8462_s9 = sld [smem:[%s9728_s0 + %s8378_s6]]   ;;  %s8381_s18 = smov 4  }
   0x3   :  { %s8467_s13 = sld [smem:[%s9728_s0 + %s8379_s10]]   ;;  %s8382_s22 = smov 5  }
   0x4   :  { %s8472_s17 = sld [smem:[%s9728_s0 + %s8380_s14]]   ;;  %s8383_s26 = smov 6  }
   0x5   :  { %s8477_s21 = sld [smem:[%s9728_s0 + %s8381_s18]]   ;;  %s8384_s30 = smov 7  }
   0x6   :  { %s8482_s25 = sld [smem:[%s9728_s0 + %s8382_s22]]   ;;  %s8385_s4 = smov 8  }
   0x7   :  { %9782 = sst [smem:[#allocation35_spill]] %s8457_s5  ;;  %s8386_s10 = smov 9  }
   0x8   :  { %9783 = sst [smem:[#allocation36_spill]] %s8462_s9  ;;  %s8387_s15 = smov 10  }
   0x9   :  { %9784 = sst [smem:[#allocation37_spill]] %s8467_s13  ;;  %s8388_s20 = smov 11  }
   0xa   :  { %9785 = sst [smem:[#allocation38_spill]] %s8472_s17  ;;  %s8390_s1 = smov 13  }
   0xb   :  { %9786 = sst [smem:[#allocation39_spill]] %s8477_s21  ;;  %s8391_s7 = smov 14  }
   0xc   :  { %9787 = sst [smem:[#allocation40_spill]] %s8482_s25  ;;  %s8393_s22 = smov 16  }
   0xd   :  { %s8487_s29 = sld [smem:[%s9728_s0 + %s8383_s26]]   ;;  %s8389_s26 = smov 12  }
   0xe   :  { %s8492_s3 = sld [smem:[%s9728_s0 + %s8384_s30]]   ;;  %s8394_s28 = smov 17  }
   0xf   :  { %s8497_s8 = sld [smem:[%s9728_s0 + %s8385_s4]]  }
  0x10   :  { %s8502_s14 = sld [smem:[%s9728_s0 + %s8386_s10]]  }
  0x11   :  { %s8507_s19 = sld [smem:[%s9728_s0 + %s8387_s15]]   ;;  %s8392_s15 = smov 15  }
  0x12   :  { %s8512_s24 = sld [smem:[%s9728_s0 + %s8388_s20]]  }
  0x13   :  { %9788 = sst [smem:[#allocation41_spill]] %s8487_s29 }
  0x14   :  { %9789 = sst [smem:[#allocation42_spill]] %s8492_s3 }
  0x15   :  { %9790 = sst [smem:[#allocation43_spill]] %s8497_s8 }
  0x16   :  { %9791 = sst [smem:[#allocation44_spill]] %s8502_s14 }
  0x17   :  { %9792 = sst [smem:[#allocation45_spill]] %s8507_s19 }
  0x18   :  { %9793 = sst [smem:[#allocation46_spill]] %s8512_s24 }
  0x19   :  { %s8517_s30 = sld [smem:[%s9728_s0 + %s8389_s26]]  }
  0x1a   :  { %s8522_s6 = sld [smem:[%s9728_s0 + %s8390_s1]]  }
  0x1b   :  { %s8527_s12 = sld [smem:[%s9728_s0 + %s8391_s7]]   ;;  %s8395_s7 = smov 18  }
  0x1c   :  { %s8532_s20 = sld [smem:[%s9728_s0 + %s8392_s15]]   ;;  %s8396_s15 = smov 19  }
  0x1d   :  { %s8537_s27 = sld [smem:[%s9728_s0 + %s8393_s22]]   ;;  %s8397_s22 = smov 20  }
  0x1e   :  { %s8542_s4 = sld [smem:[%s9728_s0 + %s8394_s28]]   ;;  %s8398_s28 = smov 21  }
  0x1f   :  { %9794 = sst [smem:[#allocation47_spill]] %s8517_s30 }
  0x20   :  { %9795 = sst [smem:[#allocation48_spill]] %s8522_s6 }
  0x21   :  { %9796 = sst [smem:[#allocation49_spill]] %s8527_s12 }
  0x22   :  { %9797 = sst [smem:[#allocation50_spill]] %s8532_s20 }
  0x23   :  { %9798 = sst [smem:[#allocation51_spill]] %s8537_s27 }
  0x24   :  { %9799 = sst [smem:[#allocation52_spill]] %s8542_s4 }
  0x25   :  { %s8547_s9 = sld [smem:[%s9728_s0 + %s8395_s7]]   ;;  %s8399_s7 = smov 22  }
  0x26   :  { %s8552_s17 = sld [smem:[%s9728_s0 + %s8396_s15]]   ;;  %s8400_s15 = smov 23  }
  0x27   :  { %s8557_s27 = sld [smem:[%s9728_s0 + %s8397_s22]]   ;;  %s8401_s22 = smov 24  }
  0x28   :  { %s8562_s4 = sld [smem:[%s9728_s0 + %s8398_s28]]   ;;  %s8402_s28 = smov 25  }
  0x29   :  { %s8577_s13 = sld [smem:[%s9728_s0 + %s8401_s22]]   ;;  %s8405_s22 = smov 28  }
  0x2b   :  { %9800 = sst [smem:[#allocation53_spill]] %s8547_s9 }
  0x2c   :  { %9801 = sst [smem:[#allocation54_spill]] %s8552_s17 }
  0x2d   :  { %9802 = sst [smem:[#allocation55_spill]] %s8557_s27 }
  0x2e   :  { %9803 = sst [smem:[#allocation56_spill]] %s8562_s4 }
  0x2f   :  { %s8567_s9 = sld [smem:[%s9728_s0 + %s8399_s7]]   ;;  %s8403_s7 = smov 26  }
  0x30   :  { %s8572_s17 = sld [smem:[%s9728_s0 + %s8400_s15]]   ;;  %s8404_s15 = smov 27  }
  0x31   :  { %9806 = sst [smem:[#allocation59_spill]] %s8577_s13 }
  0x32   :  { %s8582_s27 = sld [smem:[%s9728_s0 + %s8402_s28]]   ;;  %s8406_s28 = smov 29  }
  0x33   :  { %s8592_s20 = sld [smem:[%s9728_s0 + %s8404_s15]]   ;;  %s8408_s15 = smov 31  }
  0x34   :  { %s8597_s13 = sld [smem:[%s9728_s0 + %s8405_s22]]   ;;  %s8409_s22 = smov 32  }
  0x35   :  { %9804 = sst [smem:[#allocation57_spill]] %s8567_s9 }
  0x36   :  { %9805 = sst [smem:[#allocation58_spill]] %s8572_s17 }
  0x37   :  { %s8587_s9 = sld [smem:[%s9728_s0 + %s8403_s7]]   ;;  %s8407_s7 = smov 30  }
  0x38   :  { %s8602_s12 = sld [smem:[%s9728_s0 + %s8406_s28]]   ;;  %s8410_s28 = smov 33  }
  0x39   :  { %9808 = sst [smem:[#allocation61_spill]] %s8592_s20 }
  0x3a   :  { %9809 = sst [smem:[#allocation62_spill]] %s8597_s13 }
  0x3b   :  { %s8612_s6 = sld [smem:[%s9728_s0 + %s8408_s15]]   ;;  %s8412_s15 = smov 35  }
  0x3c   :  { %s8617_s13 = sld [smem:[%s9728_s0 + %s8409_s22]]   ;;  %s8413_s22 = smov 36  }
  0x3d   :  { %9807 = sst [smem:[#allocation60_spill]] %s8587_s9 }
  0x3e   :  { %9810 = sst [smem:[#allocation63_spill]] %s8602_s12 }
  0x3f   :  { %s8607_s9 = sld [smem:[%s9728_s0 + %s8407_s7]]   ;;  %s8411_s7 = smov 34  }
  0x40   :  { %s8622_s24 = sld [smem:[%s9728_s0 + %s8410_s28]]   ;;  %s8414_s28 = smov 37  }
  0x41   :  { %9812 = sst [smem:[#allocation65_spill]] %s8612_s6 }
  0x42   :  { %9813 = sst [smem:[#allocation66_spill]] %s8617_s13 }
  0x43   :  { %s8627_s14 = sld [smem:[%s9728_s0 + %s8411_s7]]   ;;  %s8415_s7 = smov 38  }
  0x44   :  { %s8632_s8 = sld [smem:[%s9728_s0 + %s8412_s15]]   ;;  %s8416_s15 = smov 39  }
  0x45   :  { %9811 = sst [smem:[#allocation64_spill]] %s8607_s9 }
  0x46   :  { %s8637_s30 = sld [smem:[%s9728_s0 + %s8413_s22]]   ;;  %s8417_s22 = smov 40  }
  0x47   :  { %s8642_s19 = sld [smem:[%s9728_s0 + %s8414_s28]]   ;;  %s8418_s28 = smov 41  }
  0x48   :  { %s8647_s3 = sld [smem:[%s9728_s0 + %s8415_s7]]   ;;  %s8419_s7 = smov 42  }
  0x49   :  { %9814 = sst [smem:[#allocation67_spill]] %s8627_s14 }
  0x4a   :  { %9815 = sst [smem:[#allocation68_spill]] %s8632_s8 }
  0x4b   :  { %s8652_s29 = sld [smem:[%s9728_s0 + %s8416_s15]]   ;;  %s8420_s15 = smov 43  }
  0x4c   :  { %9816 = sst [smem:[#allocation69_spill]] %s8637_s30 }
  0x4d   :  { %9817 = sst [smem:[#allocation70_spill]] %s8642_s19 }
  0x4e   :  { %9818 = sst [smem:[#allocation71_spill]] %s8647_s3 }
  0x4f   :  { %s8657_s30 = sld [smem:[%s9728_s0 + %s8417_s22]]   ;;  %s8421_s22 = smov 44  }
  0x50   :  { %s8662_s25 = sld [smem:[%s9728_s0 + %s8418_s28]]   ;;  %s8422_s28 = smov 45  }
  0x51   :  { %s8667_s3 = sld [smem:[%s9728_s0 + %s8419_s7]]  }
  0x52   :  { %s8672_s5 = sld [smem:[%s9728_s0 + %s8420_s15]]  }
  0x55   :  { %9819 = sst [smem:[#allocation72_spill]] %s8657_s30 }
  0x56   :  { %9820 = sst [smem:[#allocation73_spill]] %s8662_s25 }
  0x57   :  { %s8677_s30 = sld [smem:[%s9728_s0 + %s8421_s22]]  }
  0x58   :  { %s8682_s25 = sld [smem:[%s9728_s0 + %s8422_s28]]  }
  0x59   :  { %96 = vsyncpa [#allocation6], 0 }
  0x5a   :  { %97 = vsyncpa [#allocation9], 0 }
  0x5b   :  { %98 = vsyncpa [#allocation12], 0 }
  0x5c   :  { %99 = vsyncpa [#allocation15], 0 }
  0x5d   :  { %100 = vsyncpa [#allocation18], 0 }
  0x5e   :  { %101 = vsyncpa [#allocation21], 0 }
  0x5f   :  { %102 = vsyncpa [#allocation24], 0 }
  0x60   :  { %103 = vsyncpa [#allocation7], 0 }
  0x61   :  { %105 = vsyncpa [#allocation7 + $0x1], 0  ;;  %s8684_s7 = smov 0   ;;  %s8686_s10 = smov 0  }
  0x62   :  { %s8688_s11 = smov 0   ;;  %s8690_s15 = smov 0  }
  0x63 LB: > { %s9821_s21 = sld [smem:[#allocation39_spill]]  ;;  %s8705_s0 = sadd.s32 4294967295, %s8376_s15   ;;  %s8364_s7 = sphi %s8684_s7, %s9915_s7   ;;  %s8376_s15 = sphi %s8690_s15, %s9912_s15   ;;  %s8372_s11 = sphi %s8688_s11, %s9914_s11   ;;  %s8368_s10 = sphi %s8686_s10, %s9916_s10  }
  0x64   : > { %9822 = sst [smem:[#allocation74_spill]] %s8364_s7  ;;  %s6818_s16 = sadd.s32 4294967294, %s8376_s15  }
  0x65   : > { %9823 = sst [smem:[#allocation75_spill]] %s8372_s11  ;;  %s8709_s18 = sadd.s32 1, %s8376_s15  }
  0x66   : > { %9824 = sst [smem:[#allocation76_spill]] %s8376_s15  ;;  %s1078_s22 = sadd.s32 1, %s8372_s11 }
  0x67   : > { %9825 = sst [smem:[#allocation77_spill]] %s8709_s18  ;;  %s1075_s23 = ssub.s32 %s8376_s15, %s8709_s18 }
  0x68   : > { %p1088_p0 = scmp.ne.s32.totalorder %s8372_s11, %s8368_s10  ;;  %p1076_p1 = scmp.eq.s32.totalorder %s1075_s23, 0 }
  0x69   : > { %p1089_p2 = scmp.eq.s32.totalorder %s8705_s0, 1  ;;  %p1094_p3 = scmp.ne.s32.totalorder %s8368_s10, %s8364_s7 }
  0x6a   : > { %p1095_p4 = scmp.eq.s32.totalorder %s6818_s16, 1  ;;  %p6819_p7 = scmp.ge.s32.totalorder %s8376_s15, 1 }
  0x6b   : > { %s8720_s26 = scalar_select %p1076_p1, %s8372_s11, %s1078_s22  }
  0x6c   : > { %p8722_p5 = por %p1089_p2, %p1088_p0  ;;  %p8726_p6 = por %p1095_p4, %p1094_p3 }
  0x6d   : > { %9826 = sst [smem:[#allocation78_spill]] %s8720_s26  ;;  %p1102_p8 = scmp.lt.s32.totalorder %s8376_s15, 3 }
  0x6e   : > { %s9827_s28 = scalar_select %p8722_p5, 1, 0 }
  0x6f   : > { %s9828_s1 = scalar_select %p8726_p6, 1, 0 }
  0x70   : > { %p9756_p9 = scmp.eq.s32.totalorder %s8705_s0, 0  ;;  %p8733_p10 = pnand %p6819_p7, %p1102_p8 }
  0x71   : > { %9829 = sst [smem:[#allocation79_spill]] %s9828_s1  ;;  %s8423_s16 = smov [#allocation8]  }
  0x72   : > { %p7700_p11 = pneg %p8733_p10  ;;  %s1184_s22 = sshll.u32 %s8423_s16, 4  ;;  %s1185_s22 = int_to_ptr.vmem [resolvable:$true] %s1184_s22 }
  0x73   : > { %s8424_s26 = smov [#allocation11]   ;;  %s8425_s18 = smov [#allocation14]  }
  0x74   : > { %p8741_p12 = pnand %p9756_p9, %p7700_p11  ;;  %s1216_s11 = sshll.u32 %s8424_s26, 4  ;;  %s1217_s11 = int_to_ptr.vmem [resolvable:$true] %s1216_s11 }
  0x75   : > { %s1245_s1 = sshll.u32 %s8425_s18, 4  ;;  %s7961_s15 = scalar_lea.vmem %s1185_s22, 32  ;;  %s1246_s1 = int_to_ptr.vmem [resolvable:$true] %s1245_s1 }
  0x76   : > { %p8747_p13 = pneg %p8741_p12  ;;  %p7962_p0 = scmp.ne.s32.totalorder %s1185_s22, %s7961_s15 }
  0x77   : > { %p7969_p3 = scmp.lt.s32.totalorder %s1185_s22, %s1185_s22  ;;  %p7970_p4 = scmp.lt.s32.totalorder %s7961_s15, %s7961_s15 }
  0x78   : > { %p7964_p1 = pnand %p7962_p0, %p8747_p13 }
  0x79   : > { %p7971_p7 = por %p7970_p4, %p7969_p3 }
  0x7a   : > { %p7965_p2 = pneg %p7964_p1 }
  0x7c   : > { %p7972_p8 = pnand %p7971_p7, %p7965_p2 }
  0x7e   : > { %7975 = shalt.err (!%p7972_p8)
}
  0x7f   : > { %s8426_s26 = smov 16   ;;  %s9833_s17 = sld [smem:[#allocation58_spill]] }
  0x80   : > { %s8427_s18 = smov 1   ;;  %s7987_s16 = scalar_lea.vmem %s1217_s11, 32 }
  0x81   : > { %p7988_p11 = scmp.ne.s32.totalorder %s1217_s11, %s7987_s16  ;;  %p7995_p9 = scmp.lt.s32.totalorder %s1217_s11, %s1217_s11 }
  0x82   : > { %p7996_p6 = scmp.lt.s32.totalorder %s7987_s16, %s7987_s16 }
  0x83   : > { %p7990_p0 = pnand %p7988_p11, %p8747_p13 }
  0x84   : > { %p7997_p3 = por %p7996_p6, %p7995_p9 }
  0x85   : > { %7706 = dma.hbm_to_vmem [thread:$0]  (!%p8741_p12), %s9833_s17, 32, %s1185_s22, [#allocation9], %s8426_s26, %s8426_s26, %s8427_s18  }
  0x86   : > { %p7991_p1 = pneg %p7990_p0 }
  0x88   : > { %p7998_p2 = pnand %p7997_p3, %p7991_p1 }
  0x8a   : > { %8001 = shalt.err (!%p7998_p2)
}
  0x8b   : > { %s9834_s20 = sld [smem:[#allocation61_spill]]  ;;  %s8013_s15 = scalar_lea.vmem %s1246_s1, 32 }
  0x8c   : > { %p8014_p4 = scmp.ne.s32.totalorder %s1246_s1, %s8013_s15  ;;  %p8021_p11 = scmp.lt.s32.totalorder %s1246_s1, %s1246_s1 }
  0x8d   : > { %p8022_p0 = scmp.lt.s32.totalorder %s8013_s15, %s8013_s15 }
  0x8e   : > { %p8016_p7 = pnand %p8014_p4, %p8747_p13 }
  0x8f   : > { %p8023_p5 = por %p8022_p0, %p8021_p11 }
  0x90   : > { %p8017_p8 = pneg %p8016_p7 }
  0x91   : > { %7712 = dma.hbm_to_vmem [thread:$0]  (!%p8741_p12), %s9834_s20, 32, %s1217_s11, [#allocation12], %s8426_s26, %s8426_s26, %s8427_s18  }
  0x92   : > { %p8024_p6 = pnand %p8023_p5, %p8017_p8 }
  0x94   : > { %8027 = shalt.err (!%p8024_p6)
}
  0x95   : > { %s9835_s9 = sld [smem:[#allocation64_spill]]  ;;  %s8428_s11 = smov [#allocation17]  }
  0x96   : > { %s1271_s22 = sshll.u32 %s8428_s11, 4  ;;  %s8429_s16 = smov [#allocation20]   ;;  %s1272_s22 = int_to_ptr.vmem [resolvable:$true] %s1271_s22 }
  0x97   : > { %s1297_s17 = sshll.u32 %s8429_s16, 4  ;;  %s8039_s20 = scalar_lea.vmem %s1272_s22, 32  ;;  %s1298_s17 = int_to_ptr.vmem [resolvable:$true] %s1297_s17 }
  0x98   : > { %p8040_p9 = scmp.ne.s32.totalorder %s1272_s22, %s8039_s20  ;;  %p8047_p5 = scmp.lt.s32.totalorder %s1272_s22, %s1272_s22 }
  0x99   : > { %p8048_p2 = scmp.lt.s32.totalorder %s8039_s20, %s8039_s20 }
  0x9a   : > { %p8042_p1 = pnand %p8040_p9, %p8747_p13 }
  0x9b   : > { %7718 = dma.hbm_to_vmem [thread:$0]  (!%p8741_p12), %s9835_s9, 32, %s1246_s1, [#allocation15], %s8426_s26, %s8426_s26, %s8427_s18  }
  0x9c   : > { %p8043_p3 = pneg %p8042_p1  ;;  %p8049_p4 = por %p8048_p2, %p8047_p5 }
  0x9e   : > { %p8050_p7 = pnand %p8049_p4, %p8043_p3 }
  0xa0   : > { %8053 = shalt.err (!%p8050_p7)
}
  0xa1   : > { %s9836_s13 = sld [smem:[#allocation66_spill]]  ;;  %s8065_s1 = scalar_lea.vmem %s1298_s17, 32 }
  0xa2   : > { %p8066_p8 = scmp.ne.s32.totalorder %s1298_s17, %s8065_s1  ;;  %p8073_p6 = scmp.lt.s32.totalorder %s1298_s17, %s1298_s17 }
  0xa3   : > { %p8074_p9 = scmp.lt.s32.totalorder %s8065_s1, %s8065_s1 }
  0xa4   : > { %p8068_p11 = pnand %p8066_p8, %p8747_p13 }
  0xa5   : > { %p8075_p1 = por %p8074_p9, %p8073_p6 }
  0xa6   : > { %p8069_p0 = pneg %p8068_p11 }
  0xa7   : > { %7724 = dma.hbm_to_vmem [thread:$0]  (!%p8741_p12), %s9836_s13, 32, %s1272_s22, [#allocation18], %s8426_s26, %s8426_s26, %s8427_s18  }
  0xa8   : > { %p8076_p5 = pnand %p8075_p1, %p8069_p0 }
  0xaa   : > { %8079 = shalt.err (!%p8076_p5)
}
  0xab   : > { %s9837_s14 = sld [smem:[#allocation67_spill]]  ;;  %s8430_s20 = smov [#allocation23]  }
  0xac   : > { %s1326_s15 = sshll.u32 %s8430_s20, 4  ;;  %s8431_s11 = smov [#allocation5]   ;;  %s1327_s15 = int_to_ptr.vmem [resolvable:$true] %s1326_s15 }
  0xad   : > { %s1168_s22 = sshll.u32 %s8431_s11, 4  ;;  %s8091_s16 = scalar_lea.vmem %s1327_s15, 32  ;;  %s1169_s22 = int_to_ptr.vmem [resolvable:$true] %s1168_s22 }
  0xae   : > { %p8092_p3 = scmp.ne.s32.totalorder %s1327_s15, %s8091_s16  ;;  %p8099_p7 = scmp.lt.s32.totalorder %s1327_s15, %s1327_s15 }
  0xaf   : > { %p8100_p8 = scmp.lt.s32.totalorder %s8091_s16, %s8091_s16 }
  0xb0   : > { %p8094_p2 = pnand %p8092_p3, %p8747_p13 }
  0xb1   : > { %7730 = dma.hbm_to_vmem [thread:$0]  (!%p8741_p12), %s9837_s14, 32, %s1298_s17, [#allocation21], %s8426_s26, %s8426_s26, %s8427_s18  }
  0xb2   : > { %p8095_p4 = pneg %p8094_p2  ;;  %p8101_p11 = por %p8100_p8, %p8099_p7 }
  0xb4   : > { %p8102_p0 = pnand %p8101_p11, %p8095_p4 }
  0xb6   : > { %8105 = shalt.err (!%p8102_p0)
}
  0xb7   : > { %s9838_s19 = sld [smem:[#allocation70_spill]]  ;;  %s8117_s17 = scalar_lea.vmem %s1169_s22, 32 }
  0xb8   : > { %p8118_p6 = scmp.ne.s32.totalorder %s1169_s22, %s8117_s17  ;;  %p8125_p5 = scmp.lt.s32.totalorder %s1169_s22, %s1169_s22 }
  0xb9   : > { %p8126_p3 = scmp.lt.s32.totalorder %s8117_s17, %s8117_s17 }
  0xba   : > { %p8120_p9 = pnand %p8118_p6, %p8747_p13 }
  0xbb   : > { %p8127_p2 = por %p8126_p3, %p8125_p5 }
  0xbc   : > { %p8121_p1 = pneg %p8120_p9 }
  0xbd   : > { %7736 = dma.hbm_to_vmem [thread:$0]  (!%p8741_p12), %s9838_s19, 32, %s1327_s15, [#allocation24], %s8426_s26, %s8426_s26, %s8427_s18  }
  0xbe   : > { %p8128_p7 = pnand %p8127_p2, %p8121_p1 }
  0xc0   : > { %8131 = shalt.err (!%p8128_p7)
}
  0xc1   : > { %s9839_s4 = sld [smem:[#allocation56_spill]]  ;;  %s8432_s1 = smov [#allocation10]  }
  0xc2   : > { %s1200_s20 = sshll.u32 %s8432_s1, 4  ;;  %s8433_s15 = smov [#allocation13]   ;;  %s1201_s20 = int_to_ptr.vmem [resolvable:$true] %s1200_s20 }
  0xc3   : > { %s1232_s11 = sshll.u32 %s8433_s15, 4  ;;  %s8143_s16 = scalar_lea.vmem %s1201_s20, 32  ;;  %s1233_s11 = int_to_ptr.vmem [resolvable:$true] %s1232_s11 }
  0xc4   : > { %p8144_p4 = scmp.ne.s32.totalorder %s1201_s20, %s8143_s16  ;;  %p8151_p0 = scmp.lt.s32.totalorder %s1201_s20, %s1201_s20 }
  0xc5   : > { %p8152_p6 = scmp.lt.s32.totalorder %s8143_s16, %s8143_s16 }
  0xc6   : > { %p8146_p8 = pnand %p8144_p4, %p8747_p13 }
  0xc7   : > { %7703 = dma.hbm_to_vmem [thread:$0]  (!%p8741_p12), %s9839_s4, 32, %s1169_s22, [#allocation6], %s8426_s26, %s8426_s26, %s8427_s18  }
  0xc8   : > { %p8147_p11 = pneg %p8146_p8  ;;  %p8153_p9 = por %p8152_p6, %p8151_p0 }
  0xca   : > { %p8154_p1 = pnand %p8153_p9, %p8147_p11 }
  0xcc   : > { %8157 = shalt.err (!%p8154_p1)
}
  0xcd   : > { %7709 = dma.hbm_to_vmem [thread:$0]  (!%p8741_p12), %s8582_s27, 32, %s1201_s20, [#allocation9], %s8426_s26, %s8426_s26, %s8427_s18  }
  0xce   : > { %s8169_s22 = scalar_lea.vmem %s1233_s11, 32  ;;  %p8177_p7 = scmp.lt.s32.totalorder %s1233_s11, %s1233_s11 }
  0xcf   : > { %p8170_p5 = scmp.ne.s32.totalorder %s1233_s11, %s8169_s22  ;;  %p8178_p4 = scmp.lt.s32.totalorder %s8169_s22, %s8169_s22 }
  0xd1   : > { %p8172_p3 = pnand %p8170_p5, %p8747_p13  ;;  %p8179_p8 = por %p8178_p4, %p8177_p7 }
  0xd3   : > { %p8173_p2 = pneg %p8172_p3 }
  0xd5   : > { %p8180_p0 = pnand %p8179_p8, %p8173_p2 }
  0xd7   : > { %8183 = shalt.err (!%p8180_p0)
}
  0xd8   : > { %s9840_s12 = sld [smem:[#allocation63_spill]]  ;;  %s8434_s17 = smov [#allocation16]  }
  0xd9   : > { %s1258_s1 = sshll.u32 %s8434_s17, 4  ;;  %s8435_s20 = smov [#allocation19]   ;;  %s1259_s1 = int_to_ptr.vmem [resolvable:$true] %s1258_s1 }
  0xda   : > { %s1284_s15 = sshll.u32 %s8435_s20, 4  ;;  %s8195_s16 = scalar_lea.vmem %s1259_s1, 32  ;;  %s1285_s15 = int_to_ptr.vmem [resolvable:$true] %s1284_s15 }
  0xdb   : > { %p8196_p11 = scmp.ne.s32.totalorder %s1259_s1, %s8195_s16  ;;  %p8203_p1 = scmp.lt.s32.totalorder %s1259_s1, %s1259_s1 }
  0xdc   : > { %p8204_p5 = scmp.lt.s32.totalorder %s8195_s16, %s8195_s16 }
  0xdd   : > { %p8198_p6 = pnand %p8196_p11, %p8747_p13 }
  0xde   : > { %7715 = dma.hbm_to_vmem [thread:$0]  (!%p8741_p12), %s9840_s12, 32, %s1233_s11, [#allocation12], %s8426_s26, %s8426_s26, %s8427_s18  }
  0xdf   : > { %p8199_p9 = pneg %p8198_p6  ;;  %p8205_p3 = por %p8204_p5, %p8203_p1 }
  0xe1   : > { %p8206_p2 = pnand %p8205_p3, %p8199_p9 }
  0xe3   : > { %8209 = shalt.err (!%p8206_p2)
}
  0xe4   : > { %s9841_s6 = sld [smem:[#allocation65_spill]]  ;;  %s8221_s11 = scalar_lea.vmem %s1285_s15, 32 }
  0xe5   : > { %p8222_p7 = scmp.ne.s32.totalorder %s1285_s15, %s8221_s11  ;;  %p8229_p0 = scmp.lt.s32.totalorder %s1285_s15, %s1285_s15 }
  0xe6   : > { %p8230_p11 = scmp.lt.s32.totalorder %s8221_s11, %s8221_s11 }
  0xe7   : > { %p8224_p4 = pnand %p8222_p7, %p8747_p13 }
  0xe8   : > { %p8231_p6 = por %p8230_p11, %p8229_p0 }
  0xe9   : > { %p8225_p8 = pneg %p8224_p4 }
  0xea   : > { %7721 = dma.hbm_to_vmem [thread:$0]  (!%p8741_p12), %s9841_s6, 32, %s1259_s1, [#allocation15], %s8426_s26, %s8426_s26, %s8427_s18  }
  0xeb   : > { %p8232_p1 = pnand %p8231_p6, %p8225_p8 }
  0xed   : > { %8235 = shalt.err (!%p8232_p1)
}
  0xee   : > { %7727 = dma.hbm_to_vmem [thread:$0]  (!%p8741_p12), %s8622_s24, 32, %s1285_s15, [#allocation18], %s8426_s26, %s8426_s26, %s8427_s18  }
  0xef   : > { %s8436_s22 = smov [#allocation22]   ;;  %s8437_s1 = smov [#allocation25]  }
  0xf0   : > { %s1310_s17 = sshll.u32 %s8436_s22, 4  ;;  %s1342_s20 = sshll.u32 %s8437_s1, 4  ;;  %s1311_s17 = int_to_ptr.vmem [resolvable:$true] %s1310_s17  ;;  %s1343_s20 = int_to_ptr.vmem [resolvable:$true] %s1342_s20 }
  0xf1   : > { %s8247_s16 = scalar_lea.vmem %s1311_s17, 32  ;;  %p8255_p2 = scmp.lt.s32.totalorder %s1311_s17, %s1311_s17 }
  0xf2   : > { %p8248_p9 = scmp.ne.s32.totalorder %s1311_s17, %s8247_s16  ;;  %p8256_p7 = scmp.lt.s32.totalorder %s8247_s16, %s8247_s16 }
  0xf4   : > { %p8250_p5 = pnand %p8248_p9, %p8747_p13  ;;  %p8257_p4 = por %p8256_p7, %p8255_p2 }
  0xf6   : > { %p8251_p3 = pneg %p8250_p5 }
  0xf8   : > { %p8258_p8 = pnand %p8257_p4, %p8251_p3 }
  0xfa   : > { %8261 = shalt.err (!%p8258_p8)
}
  0xfb   : > { %s9842_s8 = sld [smem:[#allocation68_spill]]  ;;  %s8273_s15 = scalar_lea.vmem %s1343_s20, 32 }
  0xfc   : > { %p8274_p0 = scmp.ne.s32.totalorder %s1343_s20, %s8273_s15  ;;  %p8281_p1 = scmp.lt.s32.totalorder %s1343_s20, %s1343_s20 }
  0xfd   : > { %p8282_p9 = scmp.lt.s32.totalorder %s8273_s15, %s8273_s15 }
  0xfe   : > { %p8276_p11 = pnand %p8274_p0, %p8747_p13 }
  0xff   : > { %p8283_p5 = por %p8282_p9, %p8281_p1 }
 0x100   : > { %p8277_p6 = pneg %p8276_p11 }
 0x101   : > { %7733 = dma.hbm_to_vmem [thread:$0]  (!%p8741_p12), %s9842_s8, 32, %s1311_s17, [#allocation21], %s8426_s26, %s8426_s26, %s8427_s18  }
 0x102   : > { %p8284_p2 = pnand %p8283_p5, %p8277_p6 }
 0x104   : > { %8287 = shalt.err (!%p8284_p2)
}
 0x105   : > { %7739 = dma.hbm_to_vmem [thread:$0]  (!%p8741_p12), %s8652_s29, 32, %s1343_s20, [#allocation24], %s8426_s26, %s8426_s26, %s8427_s18  }
 0x106   : > { %1394 = sbr.rel (%p8733_p10) target bundleno = 13556 (0x34f4), region = 200  ;;  %p9843_p3 = scmp.eq.s32.totalorder (!%p8733_p10), %s8705_s0, 0 }
 0x10b   : > { %8331 = dma.done.wait (%p9843_p3), [#allocation6], 32   ;;  %p9844_p13 = pmov %p9843_p3 }
 0x10c   : > { %p9845_p7 = pmov %p9843_p3 }
 0x10d   : > { %8333 = vsyncadd (%p9844_p13), [#allocation6], 4294967264 }
 0x10e   : > { %8335 = dma.done.wait (%p9845_p7), [#allocation9], 64   ;;  %p9846_p4 = pmov %p9843_p3 }
 0x10f   : > { %p9847_p8 = pmov %p9843_p3 }
 0x110   : > { %8337 = vsyncadd (%p9846_p4), [#allocation9], 4294967232 }
 0x111   : > { %8339 = dma.done.wait (%p9847_p8), [#allocation12], 64   ;;  %p9848_p12 = pmov %p9843_p3 }
 0x112   : > { %p9849_p10 = pmov %p9843_p3 }
 0x113   : > { %8341 = vsyncadd (%p9848_p12), [#allocation12], 4294967232 }
 0x114   : > { %8343 = dma.done.wait (%p9849_p10), [#allocation15], 64   ;;  %p9850_p0 = pmov %p9843_p3 }
 0x116   : > { %8345 = vsyncadd (%p9850_p0), [#allocation15], 4294967232  ;;  %p9851_p11 = pmov %p9850_p0 }
 0x117   : > { %p9852_p6 = pmov %p9850_p0 }
 0x118   : > { %8347 = dma.done.wait (%p9851_p11), [#allocation18], 64  }
 0x119   : > { %8349 = vsyncadd (%p9852_p6), [#allocation18], 4294967232  ;;  %p9853_p1 = pmov %p9850_p0 }
 0x11a   : > { %p9854_p9 = pmov %p9850_p0 }
 0x11b   : > { %8351 = dma.done.wait (%p9853_p1), [#allocation21], 64  }
 0x11c   : > { %8353 = vsyncadd (%p9854_p9), [#allocation21], 4294967232  ;;  %p9855_p5 = pmov %p9850_p0 }
 0x11d   : > { %p9856_p2 = pmov %p9850_p0 }
 0x11e   : > { %8355 = dma.done.wait (%p9855_p5), [#allocation24], 64  }
 0x11f   : > { %8357 = vsyncadd (%p9856_p2), [#allocation24], 4294967232  ;;  %s9857_s7 = sld [smem:[#allocation35_spill]]  ;;  %p1556_p3 = scmp.lt.s32.totalorder %s8705_s0, 1  ;;  %v8438_v0 = vmov 0.0   ;;  %vm8439_vm0 = vmmov 0  }
 0x120   : > { %7236 = vmatprep.subr.mxu0 %v8438_v0  ;;  %7244 = vmatprep.mubr.msk.f32.mxu0 %vm8439_vm0, %v8438_v0  ;;  %v1572_v1 = vld [vmem:[%s9821_s21 + $0x18] sm:$0xff]  ;;  %v1571_v2 = vld [vmem:[%s9821_s21 + $0x10] sm:$0xff]  ;;  %s9858_s26 = sld [smem:[#allocation40_spill]]  ;;  %v1570_v3 = vld [vmem:[%s9821_s21 + $0x8] sm:$0xff]  ;;  %vm1585_vm1 = vcmask 261120   ;;  %s9764_s11 = smov 112  }
 0x121   : > { %s8890_s2 = scalar_select %p1556_p3, %s8705_s0, 1  ;;  %7252 = vmatprep.subr.mxu1 %v8438_v0  ;;  %7254 = vmatprep.mubr.msk.f32.mxu1 %vm8439_vm0, %v8438_v0  ;;  %v1569_v4 = vld [vmem:[%s9821_s21] sm:$0xff]  ;;  %vm1662_vm2 = vcmask 130048   ;;  %vm1738_vm3 = vcmask 64512   ;;  %vm2207_vm4 = vcmask 523264   ;;  %vm3450_vm15 = vcmask 253952  }
 0x122   : > { %7237 = vmatpush3.msra.mxu0 %v1572_v1  ;;  %s9766_s22 = smov 96   ;;  %s9768_s17 = smov 80  }
 0x123   : > { %s6848_s23 = sshll.u32 %s8890_s2, 3  ;;  %7238 = vmatprep.subr.mxu0 %v8438_v0  ;;  %s9762_s1 = smov 48  }
 0x124   : > { %7239 = vmatpush3.msra.mxu0 %v1571_v2  ;;  %s9760_s20 = smov 64   ;;  %s9859_s16 = sld [smem:[#allocation41_spill]] }
 0x125   : > { %s1559_s18 = scalar_lea.vmem %s9857_s7, %s6848_s23  ;;  %7240 = vmatprep.subr.mxu0 %v8438_v0  ;;  %s9860_s15 = sld [smem:[#allocation42_spill]] }
 0x126   : > { %7241 = vmatpush3.msra.mxu0 %v1570_v3  ;;  %v8903_v5 = vld [vmem:[%s1559_s18] sm:$0xff]  ;;  %s9758_s7 = smov 16   ;;  %s9862_s18 = sld [smem:[#allocation45_spill]] }
 0x127   : > { %7242 = vmatprep.subr.mxu0 %v8438_v0  ;;  %v6851_v6 = vld [vmem:[%s9858_s26] ss:$0 sm:$0xff]  ;;  %s9871_s4 = sld [smem:[#allocation48_spill]]  ;;  %s9877_s9 = smov 96  }
 0x128   : > { %7243 = vmatpush3.msra.mxu0 %v1569_v4  ;;  %s9880_s12 = smov 64   ;;  %s9881_s13 = smov 16  }
 0x129   : > { %7245 = vmatmul.mubr.msk.f32.vlgmr.msra.gmra.mxu0 %vm1585_vm1, %v8903_v5  ;;  %7247 = vmatprep.subr.mxu0 %v8438_v0  ;;  %s9882_s14 = sld [smem:[#allocation55_spill]]  ;;  %p9907_p7 = scmp.ne.s32.totalorder %s9827_s28, 0 }
 0x12a   : > { %7249 = vmatprep.mubr.msk.f32.mxu0 %vm8439_vm0, %v8438_v0  ;;  %v1577_v39 = vld [vmem:[%s9859_s16 + $0x18] sm:$0xff]  ;;  %v1576_v40 = vld [vmem:[%s9859_s16 + $0x10] sm:$0xff]  ;;  %v1575_v41 = vld [vmem:[%s9859_s16 + $0x8] sm:$0xff] }
 0x12b   : > { %s9861_s23 = smov %s9860_s15  ;;  %v1574_v42 = vld [vmem:[%s9859_s16] sm:$0xff] }
 0x12c   : > { %v6859_v49 = vld [vmem:[%s9860_s15] ss:$0 sm:$0xff]  ;;  %v2110_v60 = vld [vmem:[%s9862_s18 + $0x18] sm:$0xff]  ;;  %v2109_v61 = vld [vmem:[%s9862_s18 + $0x10] sm:$0xff]  ;;  %s9865_s15 = sld [smem:[#allocation43_spill]] }
 0x12d   : > { %v2108_v62 = vld [vmem:[%s9862_s18 + $0x8] sm:$0xff]  ;;  %v2107_v63 = vld [vmem:[%s9862_s18] sm:$0xff] }
 0x1e9   : > { %v1655_v7 = vpop.f32.mrf.mxu0 }
 0x1ea   : > { %v1656_v8 = vadd.f32 %v6851_v6, %v1655_v7 }
 0x1eb   : > { %v7246_v9 = vpop.f32.mrf.mxu0 }
 0x1ec   : > { %1826 = vrot.lane.b32.xlu1 %v1656_v8, %s9764_s11  ;;  %1660 = vrot.lane.b32.xlu0 %v1656_v8, %s9766_s22  ;;  %s9867_s11 = sld [smem:[#allocation44_spill]] }
 0x1f0   : > { %1828 = vrot.lane.b32.xlu0 %v1656_v8, %s9768_s17 }
 0x1f2   : > { %s9868_s22 = smov %s9867_s11 }
 0x25e   : > { %v1661_v10 = vpop.permute.xlu0 %1660  ;;  %v1827_v12 = vpop.permute.xlu1 %1826 }
 0x25f   : > { %7248 = vmatpush3.xpose.msk.msra.mxu0 %vm1662_vm2, %v1661_v10  ;;  %v6861_v10 = vld [vmem:[%s9865_s15] ss:$0 sm:$0xff] }
 0x260   : > { %7257 = vmatprep.subr.mxu0 %v8438_v0 }
 0x262   : > { %7250 = vmatmul.mubr.msk.f32.vlgmr.msra.gmra.mxu0 %vm1662_vm2, %v1656_v8  ;;  %v1829_v11 = vpop.permute.xlu0 %1828 }
 0x263   : > { %7258 = vmatpush3.xpose.msk.msra.mxu0 %vm1662_vm2, %v1829_v11  ;;  %7259 = vmatprep.mubr.msk.f32.mxu0 %vm8439_vm0, %v8438_v0 }
 0x264   : > { %7267 = vmatprep.subr.mxu0 %v8438_v0 }
 0x266   : > { %7260 = vmatmul.mubr.msk.f32.vlgmr.msra.gmra.mxu0 %vm1662_vm2, %v1827_v12  ;;  %v6862_v12 = vld [vmem:[%s9867_s11] ss:$0 sm:$0xff]  ;;  %s9872_s11 = sld [smem:[#allocation49_spill]] }
 0x267   : > { %7275 = vmatprep.mubr.msk.f32.mxu0 %vm8439_vm0, %v8438_v0  ;;  %7268 = vmatpush3.msra.mxu0 %v1577_v39 }
 0x268   : > { %7269 = vmatprep.subr.mxu0 %v8438_v0 }
 0x269   : > { %7270 = vmatpush3.msra.mxu0 %v1576_v40 }
 0x26a   : > { %7271 = vmatprep.subr.mxu0 %v8438_v0 }
 0x26b   : > { %7272 = vmatpush3.msra.mxu0 %v1575_v41 }
 0x26c   : > { %7273 = vmatprep.subr.mxu0 %v8438_v0  ;;  %s9873_s6 = smov %s9872_s11 }
 0x26d   : > { %7274 = vmatpush3.msra.mxu0 %v1574_v42  ;;  %v6867_v42 = vld [vmem:[%s9872_s11] ss:$0 sm:$0xff]  ;;  %s9878_s11 = smov 112  }
 0x26e   : > { %7289 = vmatprep.subr.mxu0 %v8438_v0 }
 0x322   : > { %v1733_v13 = vpop.f32.mrf.mxu0 }
 0x323   : > { %v1737_v14 = vmul.f32 0.25, %v1733_v13 }
 0x324   : > { %v7251_v15 = vpop.f32.mrf.mxu0 }
 0x325   : > { %v1739_v16 = vsel %vm1738_vm3, %v1737_v14, -inf }
 0x326   : > { %1740 = vmax.xlane.f32.xlu1 %v1739_v16  ;;  %v1900_v17 = vpop.f32.mrf.mxu0 }
 0x327   : > { %v1904_v18 = vmul.f32 0.25, %v1900_v17 }
 0x328   : > { %v7261_v19 = vpop.f32.mrf.mxu0 }
 0x329   : > { %v1905_v20 = vsel %vm1738_vm3, %v1904_v18, -inf }
 0x32a   : > { %1906 = vmax.xlane.f32.xlu0 %v1905_v20 }
 0x3af   : > { %v1741_v21 = vpop.xlane.xlu1 %1740 }
 0x3b0   : > { %v1742_v22 = vsub.f32 %v1737_v14, %v1741_v21 }
 0x3b2   : > { %v1743_v23 = vmul.f32 1.442695, %v1742_v22 }
 0x3b3   : > { %v1907_v24 = vpop.xlane.xlu0 %1906 }
 0x3b4   : > { %7873 = vpow2.f32 %v1743_v23  ;;  %v1908_v25 = vsub.f32 %v1904_v18, %v1907_v24  ;;  %v6865_v23 = vld [vmem:[%s9871_s4] ss:$0 sm:$0xff] }
 0x3b6   : > { %v1909_v26 = vmul.f32 1.442695, %v1908_v25 }
 0x3b8   : > { %7875 = vpow2.f32 %v1909_v26 }
 0x3c1   : > { %v7874_v27 = vpop.eup %7873 }
 0x3c2   : > { %v1745_v28 = vsel %vm1738_vm3, %v7874_v27, 0.0 }
 0x3c3   : > { %1746 = vadd.xlane.f32.xlu0 %v1745_v28 }
 0x3c5   : > { %v7876_v29 = vpop.eup %7875 }
 0x3c6   : > { %v1911_v30 = vsel %vm1738_vm3, %v7876_v29, 0.0 }
 0x3c7   : > { %1912 = vadd.xlane.f32.xlu1 %v1911_v30 }
 0x3d8   : > { %1916 = vrot.lane.b32.xlu1 %v1656_v8, %s9762_s1  ;;  %s9866_s1 = smov %s9865_s15  ;;  %s9874_s15 = sld [smem:[#allocation50_spill]] }
 0x3d9   : > { %1750 = vrot.lane.b32.xlu0 %v1656_v8, %s9760_s20 }
 0x3de   : > { %s9875_s8 = smov %s9874_s15 }
 0x44c   : > { %v1747_v31 = vpop.xlane.xlu0 %1746 }
 0x44d   : > { %7877 = vrcp.f32 %v1747_v31 }
 0x450   : > { %v1913_v32 = vpop.xlane.xlu1 %1912  ;;  %v1751_v33 = vpop.permute.xlu0 %1750 }
 0x451   : > { %7879 = vrcp.f32 %v1913_v32  ;;  %7253 = vmatpush3.msra.mxu1 %v1751_v33 }
 0x452   : > { %7262 = vmatprep.subr.mxu1 %v8438_v0 }
 0x454   : > { %v1917_v36 = vpop.permute.xlu1 %1916 }
 0x45a   : > { %v7878_v34 = vpop.eup %7877 }
 0x45b   : > { %v1749_v35 = vmul.f32 %v7878_v34, %v7874_v27  ;;  %v6872_v34 = vld [vmem:[%s9821_s21 + $0x38] sm:$0xff] }
 0x45d   : > { %7255 = vmatmul.mubr.msk.f32.vlgmr.msra.gmra.mxu1 %vm1738_vm3, %v1749_v35  ;;  %v6871_v35 = vld [vmem:[%s9821_s21 + $0x30] sm:$0xff] }
 0x45e   : > { %v7880_v37 = vpop.eup %7879  ;;  %7263 = vmatpush3.msra.mxu1 %v1917_v36  ;;  %7264 = vmatprep.mubr.msk.f32.mxu1 %vm8439_vm0, %v8438_v0  ;;  %v6870_v36 = vld [vmem:[%s9821_s21 + $0x28] sm:$0xff] }
 0x45f   : > { %v1915_v38 = vmul.f32 %v7880_v37, %v7876_v29  ;;  %7278 = vmatprep.subr.mxu1 %v8438_v0  ;;  %v6869_v37 = vld [vmem:[%s9821_s21 + $0x20] sm:$0xff]  ;;  %s9888_s21 = sld [smem:[#allocation54_spill]] }
 0x461   : > { %7265 = vmatmul.mubr.msk.f32.vlgmr.msra.gmra.mxu1 %vm1738_vm3, %v1915_v38 }
 0x462   : > { %7286 = vmatprep.mubr.msk.f32.mxu1 %vm8439_vm0, %v8438_v0  ;;  %7279 = vmatpush3.msra.mxu1 %v2110_v60 }
 0x463   : > { %7280 = vmatprep.subr.mxu1 %v8438_v0 }
 0x464   : > { %7281 = vmatpush3.msra.mxu1 %v2109_v61 }
 0x465   : > { %7282 = vmatprep.subr.mxu1 %v8438_v0 }
 0x466   : > { %7283 = vmatpush3.msra.mxu1 %v2108_v62 }
 0x467   : > { %7284 = vmatprep.subr.mxu1 %v8438_v0 }
 0x468   : > { %7285 = vmatpush3.msra.mxu1 %v2107_v63 }
 0x469   : > { %7308 = vmatprep.subr.mxu1 %v8438_v0 }
 0x51d   : > { %v1822_v43 = vpop.f32.mrf.mxu1 }
 0x51f   : > { %v7256_v44 = vpop.f32.mrf.mxu1 }
 0x520   : > { %v6868_v44 = vld [vmem:[%s9874_s15] ss:$0 sm:$0xff]  ;;  %s9879_s15 = smov 48  }
 0x521   : > { %v1988_v45 = vpop.f32.mrf.mxu1 }
 0x522   : > { %1993 = vrot.lane.b32.xlu1 %v1988_v45, %s9758_s7  ;;  %s9863_s7 = sld [smem:[#allocation47_spill]] }
 0x523   : > { %v7266_v46 = vpop.f32.mrf.mxu1 }
 0x528   : > { %s9864_s20 = smov %s9863_s7  ;;  %v2119_v1 = vld [vmem:[%s9863_s7 + $0x38] sm:$0xff]  ;;  %s9869_s7 = sld [smem:[#allocation46_spill]] }
 0x529   : > { %v2118_v2 = vld [vmem:[%s9864_s20 + $0x30] sm:$0xff]  ;;  %v2117_v3 = vld [vmem:[%s9864_s20 + $0x28] sm:$0xff]  ;;  %v2116_v4 = vld [vmem:[%s9864_s20 + $0x20] sm:$0xff] }
 0x52a   : > { %v2114_v15 = vld [vmem:[%s9864_s20 + $0x10] sm:$0xff]  ;;  %v2113_v16 = vld [vmem:[%s9864_s20 + $0x8] sm:$0xff]  ;;  %v2112_v17 = vld [vmem:[%s9864_s20] sm:$0xff] }
 0x52e   : > { %s9870_s17 = smov %s9869_s7  ;;  %v6863_v18 = vld [vmem:[%s9869_s7] ss:$0 sm:$0xff]  ;;  %s9876_s7 = smov 80  }
 0x594   : > { %v1994_v47 = vpop.permute.xlu1 %1993 }
 0x595   : > { %v1996_v48 = vsel %vm1662_vm2, %v1822_v43, %v1994_v47  ;;  %v6879_v47 = vld [vmem:[%s9858_s26 + $0x1] ss:$0 sm:$0xff] }
 0x596   : > { %7276 = vmatmul.mubr.msk.f32.vlgmr.msra.gmra.mxu0 %vm1585_vm1, %v1996_v48 }
 0x597   : > { %7305 = vmatprep.mubr.msk.f32.mxu0 %vm8439_vm0, %v8438_v0  ;;  %7290 = vmatpush3.msra.mxu0 %v2119_v1 }
 0x598   : > { %7291 = vmatprep.subr.mxu0 %v8438_v0 }
 0x599   : > { %7292 = vmatpush3.msra.mxu0 %v2118_v2 }
 0x59a   : > { %7293 = vmatprep.subr.mxu0 %v8438_v0 }
 0x59b   : > { %7294 = vmatpush3.msra.mxu0 %v2117_v3 }
 0x59c   : > { %7295 = vmatprep.subr.mxu0 %v8438_v0 }
 0x59d   : > { %7296 = vmatpush3.msra.mxu0 %v2116_v4 }
 0x59e   : > { %7297 = vmatprep.subr.mxu0 %v8438_v0 }
 0x656   : > { %v2072_v50 = vpop.f32.mrf.mxu0 }
 0x657   : > { %v2073_v51 = vadd.f32 %v6859_v49, %v2072_v50 }
 0x658   : > { %v7277_v52 = vpop.f32.mrf.mxu0 }
 0x659   : > { %v2076_v53 = vadd.f32 %v2073_v51, %v8903_v5  ;;  %v2115_v5 = vld [vmem:[%s9864_s20 + $0x18] sm:$0xff] }
 0x65a   : > { %7298 = vmatpush3.msra.mxu0 %v2115_v5 }
 0x65b   : > { %v2079_v54 = vsel %vm1585_vm1, %v2076_v53, 0.0  ;;  %7299 = vmatprep.subr.mxu0 %v8438_v0 }
 0x65c   : > { %2080 = vadd.xlane.f32.xlu0 %v2079_v54  ;;  %7300 = vmatpush3.msra.mxu0 %v2114_v15 }
 0x65d   : > { %7301 = vmatprep.subr.mxu0 %v8438_v0 }
 0x65e   : > { %7302 = vmatpush3.msra.mxu0 %v2113_v16 }
 0x65f   : > { %7303 = vmatprep.subr.mxu0 %v8438_v0 }
 0x660   : > { %7304 = vmatpush3.msra.mxu0 %v2112_v17  ;;  %v6877_v17 = vld [vmem:[%s9859_s16 + $0x38] sm:$0xff] }
 0x661   : > { %7329 = vmatprep.subr.mxu0 %v8438_v0 }
 0x6e5   : > { %v2081_v55 = vpop.xlane.xlu0 %2080 }
 0x6e6   : > { %v2083_v56 = vmul.f32 0.03125, %v2081_v55 }
 0x6e8   : > { %v2084_v57 = vsub.f32 %v2076_v53, %v2083_v56 }
 0x6ea   : > { %v2085_v58 = vmul.f32 %v2084_v57, %v2084_v57 }
 0x6ec   : > { %v2086_v59 = vsel %vm1585_vm1, %v2085_v58, 0.0 }
 0x6ed   : > { %2087 = vadd.xlane.f32.xlu1 %v2086_v59 }
 0x776   : > { %v2088_v6 = vpop.xlane.xlu1 %2087 }
 0x777   : > { %v2089_v7 = vmul.f32 0.03125, %v2088_v6 }
 0x779   : > { %v2090_v8 = vadd.f32 1e-05, %v2089_v7 }
 0x77b   : > { %7881 = vrsqrt.f32 %v2090_v8 }
 0x788   : > { %v7882_v9 = vpop.eup %7881 }
 0x789   : > { %v2092_v11 = vmul.f32 %v7882_v9, %v2084_v57 }
 0x78b   : > { %v2099_v13 = vmul.f32 %v6861_v10, %v2092_v11 }
 0x78d   : > { %v2106_v14 = vadd.f32 %v6862_v12, %v2099_v13 }
 0x78f   : > { %7287 = vmatmul.mubr.msk.f32.vlgmr.msra.gmra.mxu1 %vm1585_vm1, %v2106_v14 }
 0x790   : > { %7316 = vmatprep.mubr.msk.f32.mxu1 %vm8439_vm0, %v8438_v0  ;;  %7309 = vmatpush3.msra.mxu1 %v6872_v34 }
 0x791   : > { %7310 = vmatprep.subr.mxu1 %v8438_v0 }
 0x792   : > { %7311 = vmatpush3.msra.mxu1 %v6871_v35 }
 0x793   : > { %7312 = vmatprep.subr.mxu1 %v8438_v0 }
 0x794   : > { %7313 = vmatpush3.msra.mxu1 %v6870_v36 }
 0x795   : > { %7314 = vmatprep.subr.mxu1 %v8438_v0 }
 0x796   : > { %7315 = vmatpush3.msra.mxu1 %v6869_v37 }
 0x797   : > { %7319 = vmatprep.subr.mxu1 %v8438_v0 }
 0x84f   : > { %v2196_v19 = vpop.f32.mrf.mxu1 }
 0x850   : > { %v2197_v20 = vadd.f32 %v6863_v18, %v2196_v19  ;;  %v6876_v18 = vld [vmem:[%s9859_s16 + $0x30] sm:$0xff]  ;;  %v6875_v19 = vld [vmem:[%s9859_s16 + $0x28] sm:$0xff] }
 0x851   : > { %v7288_v21 = vpop.f32.mrf.mxu1 }
 0x852   : > { %v2200_v22 = vmax.f32 %v2197_v20, 0.0  ;;  %v6874_v20 = vld [vmem:[%s9859_s16 + $0x20] sm:$0xff]  ;;  %s7019_s16 = sshll.u32 %s8890_s2, 4 }
 0x854   : > { %7306 = vmatmul.mubr.msk.f32.vlgmr.msra.gmra.mxu0 %vm2207_vm4, %v2200_v22 }
 0x855   : > { %7331 = vmatprep.mubr.msk.f32.mxu0 %vm8439_vm0, %v8438_v0 }
 0x914   : > { %v2277_v24 = vpop.f32.mrf.mxu0 }
 0x915   : > { %v2278_v25 = vadd.f32 %v6865_v23, %v2277_v24 }
 0x916   : > { %v7307_v26 = vpop.f32.mrf.mxu0 }
 0x917   : > { %v2281_v27 = vadd.f32 %v2278_v25, %v2106_v14 }
 0x919   : > { %v2284_v28 = vsel %vm1585_vm1, %v2281_v27, 0.0 }
 0x91a   : > { %2285 = vadd.xlane.f32.xlu0 %v2284_v28 }
 0x9a3   : > { %v2286_v29 = vpop.xlane.xlu0 %2285 }
 0x9a4   : > { %v2287_v30 = vmul.f32 0.03125, %v2286_v29 }
 0x9a6   : > { %v2288_v31 = vsub.f32 %v2281_v27, %v2287_v30  ;;  %v6887_v27 = vld [vmem:[%s9861_s23 + $0x1] ss:$0 sm:$0xff] }
 0x9a8   : > { %v2289_v32 = vmul.f32 %v2288_v31, %v2288_v31 }
 0x9aa   : > { %v2290_v33 = vsel %vm1585_vm1, %v2289_v32, 0.0 }
 0x9ab   : > { %2291 = vadd.xlane.f32.xlu0 %v2290_v33 }
 0xa34   : > { %v2292_v38 = vpop.xlane.xlu0 %2291 }
 0xa35   : > { %v2293_v39 = vmul.f32 0.03125, %v2292_v38  ;;  %v6896_v38 = vld [vmem:[%s9862_s18 + $0x38] sm:$0xff] }
 0xa37   : > { %v2294_v40 = vadd.f32 1e-05, %v2293_v39  ;;  %v6895_v39 = vld [vmem:[%s9862_s18 + $0x30] sm:$0xff] }
 0xa39   : > { %7883 = vrsqrt.f32 %v2294_v40  ;;  %v6894_v40 = vld [vmem:[%s9862_s18 + $0x28] sm:$0xff] }
 0xa46   : > { %v7884_v41 = vpop.eup %7883 }
 0xa47   : > { %v2296_v43 = vmul.f32 %v7884_v41, %v2288_v31  ;;  %v6893_v41 = vld [vmem:[%s9862_s18 + $0x20] sm:$0xff] }
 0xa49   : > { %v2303_v45 = vmul.f32 %v6867_v42, %v2296_v43  ;;  %v6905_v42 = vld [vmem:[%s9864_s20 + $0x78] sm:$0xff]  ;;  %v6904_v43 = vld [vmem:[%s9864_s20 + $0x70] sm:$0xff] }
 0xa4b   : > { %v9002_v46 = vadd.f32 %v6868_v44, %v2303_v45  ;;  %v6903_v44 = vld [vmem:[%s9864_s20 + $0x68] sm:$0xff]  ;;  %v6902_v45 = vld [vmem:[%s9864_s20 + $0x60] sm:$0xff] }
 0xa4d   : > { %7317 = vmatmul.mubr.msk.f32.vlgmr.msra.gmra.mxu1 %vm1585_vm1, %v9002_v46 }
 0xa4e   : > { %7321 = vmatprep.mubr.msk.f32.mxu1 %vm8439_vm0, %v8438_v0 }
 0xb0d   : > { %v2400_v48 = vpop.f32.mrf.mxu1 }
 0xb0e   : > { %v2401_v49 = vadd.f32 %v6879_v47, %v2400_v48  ;;  %v6900_v47 = vld [vmem:[%s9864_s20 + $0x50] sm:$0xff] }
 0xb0f   : > { %v7318_v50 = vpop.f32.mrf.mxu1 }
 0xb10   : > { %2571 = vrot.lane.b32.xlu0 %v2401_v49, %s9876_s7  ;;  %2405 = vrot.lane.b32.xlu1 %v2401_v49, %s9877_s9 }
 0xb14   : > { %2569 = vrot.lane.b32.xlu1 %v2401_v49, %s9878_s11 }
 0xb82   : > { %v2572_v51 = vpop.permute.xlu0 %2571  ;;  %v2406_v52 = vpop.permute.xlu1 %2405 }
 0xb83   : > { %7320 = vmatpush3.xpose.msk.msra.mxu1 %vm1662_vm2, %v2406_v52  ;;  %7330 = vmatpush3.xpose.msk.msra.mxu0 %vm1662_vm2, %v2572_v51  ;;  %v6891_v52 = vld [vmem:[%s9866_s1 + $0x1] ss:$0 sm:$0xff]  ;;  %s9883_s1 = sld [smem:[#allocation37_spill]] }
 0xb84   : > { %7324 = vmatprep.subr.mxu1 %v8438_v0  ;;  %7339 = vmatprep.subr.mxu0 %v8438_v0 }
 0xb86   : > { %7322 = vmatmul.mubr.msk.f32.vlgmr.msra.gmra.mxu1 %vm1662_vm2, %v2401_v49  ;;  %v2570_v53 = vpop.permute.xlu1 %2569 }
 0xb87   : > { %7332 = vmatmul.mubr.msk.f32.vlgmr.msra.gmra.mxu0 %vm1662_vm2, %v2570_v53  ;;  %7326 = vmatprep.mubr.msk.f32.mxu1 %vm8439_vm0, %v8438_v0 }
 0xb88   : > { %7347 = vmatprep.mubr.msk.f32.mxu0 %vm8439_vm0, %v8438_v0  ;;  %7340 = vmatpush3.msra.mxu0 %v6877_v17 }
 0xb89   : > { %7341 = vmatprep.subr.mxu0 %v8438_v0  ;;  %s9095_s18 = scalar_lea.vmem %s9883_s1, %s7019_s16  ;;  %s9884_s1 = sld [smem:[#allocation38_spill]] }
 0xb8a   : > { %7342 = vmatpush3.msra.mxu0 %v6876_v18  ;;  %s9885_s16 = sld [smem:[#allocation51_spill]] }
 0xb8b   : > { %7343 = vmatprep.subr.mxu0 %v8438_v0 }
 0xb8c   : > { %7344 = vmatpush3.msra.mxu0 %v6875_v19 }
 0xb8d   : > { %7345 = vmatprep.subr.mxu0 %v8438_v0 }
 0xb8e   : > { %7346 = vmatpush3.msra.mxu0 %v6874_v20 }
 0xb8f   : > { %7361 = vmatprep.subr.mxu0 %v8438_v0 }
 0xc46   : > { %v2477_v54 = vpop.f32.mrf.mxu1 }
 0xc47   : > { %v2481_v55 = vmul.f32 0.25, %v2477_v54  ;;  %v2643_v56 = vpop.f32.mrf.mxu0  ;;  %v6892_v54 = vld [vmem:[%s9868_s22 + $0x1] ss:$0 sm:$0xff] }
 0xc48   : > { %v2647_v57 = vmul.f32 0.25, %v2643_v56  ;;  %v7323_v58 = vpop.f32.mrf.mxu1 }
 0xc49   : > { %v7333_v59 = vpop.f32.mrf.mxu0  ;;  %v2482_v60 = vsel %vm1738_vm3, %v2481_v55, -inf  ;;  %v6898_v58 = vld [vmem:[%s9864_s20 + $0x40] sm:$0xff] }
 0xc4a   : > { %2483 = vmax.xlane.f32.xlu1 %v2482_v60  ;;  %v2648_v61 = vsel %vm1738_vm3, %v2647_v57, -inf  ;;  %v6907_v59 = vld [vmem:[%s9870_s17 + $0x1] ss:$0 sm:$0xff]  ;;  %s9886_s17 = sld [smem:[#allocation36_spill]] }
 0xc4b   : > { %2649 = vmax.xlane.f32.xlu0 %v2648_v61 }
 0xc50   : > { %s1562_s19 = scalar_lea.vmem %s9886_s17, %s8890_s2  ;;  %s9777_s2 = smov 32  }
 0xc51   : > { %s9899_s17 = sld [smem:[#allocation59_spill]] }
 0xcd3   : > { %v2484_v62 = vpop.xlane.xlu1 %2483 }
 0xcd4   : > { %v2485_v63 = vsub.f32 %v2481_v55, %v2484_v62  ;;  %v2650_v1 = vpop.xlane.xlu0 %2649 }
 0xcd5   : > { %v2651_v2 = vsub.f32 %v2647_v57, %v2650_v1  ;;  %v6899_v57 = vld [vmem:[%s9864_s20 + $0x48] sm:$0xff]  ;;  %v3485_v1 = vld [vmem:[%s9882_s14 + $0x18] sm:$0xff] }
 0xcd6   : > { %v2486_v3 = vmul.f32 1.442695, %v2485_v63 }
 0xcd7   : > { %v2652_v4 = vmul.f32 1.442695, %v2651_v2  ;;  %v3484_v2 = vld [vmem:[%s9882_s14 + $0x10] sm:$0xff] }
 0xcd8   : > { %7885 = vpow2.f32 %v2486_v3  ;;  %v3483_v3 = vld [vmem:[%s9882_s14 + $0x8] sm:$0xff] }
 0xcd9   : > { %7887 = vpow2.f32 %v2652_v4  ;;  %v3482_v4 = vld [vmem:[%s9882_s14] sm:$0xff] }
 0xce5   : > { %v7886_v5 = vpop.eup %7885 }
 0xce6   : > { %v7888_v6 = vpop.eup %7887  ;;  %v2488_v7 = vsel %vm1738_vm3, %v7886_v5, 0.0 }
 0xce7   : > { %2489 = vadd.xlane.f32.xlu0 %v2488_v7  ;;  %v2654_v8 = vsel %vm1738_vm3, %v7888_v6, 0.0 }
 0xce8   : > { %2655 = vadd.xlane.f32.xlu1 %v2654_v8  ;;  %v6917_v8 = vld [vmem:[#allocation5] ss:$0 sm:$0xff] }
 0xcf9   : > { %2659 = vrot.lane.b32.xlu1 %v2401_v49, %s9879_s15 }
 0xcfd   : > { %2493 = vrot.lane.b32.xlu0 %v2401_v49, %s9880_s12 }
 0xd70   : > { %v2490_v9 = vpop.xlane.xlu0 %2489 }
 0xd71   : > { %7889 = vrcp.f32 %v2490_v9  ;;  %v2656_v10 = vpop.xlane.xlu1 %2655 }
 0xd72   : > { %7891 = vrcp.f32 %v2656_v10 }
 0xd74   : > { %v2494_v11 = vpop.permute.xlu0 %2493 }
 0xd75   : > { %7325 = vmatpush3.msra.mxu1 %v2494_v11  ;;  %v2660_v15 = vpop.permute.xlu1 %2659 }
 0xd76   : > { %7334 = vmatprep.subr.mxu1 %v8438_v0 }
 0xd7e   : > { %v7890_v12 = vpop.eup %7889 }
 0xd7f   : > { %v2492_v13 = vmul.f32 %v7890_v12, %v7886_v5  ;;  %v7892_v14 = vpop.eup %7891  ;;  %v9100_v5 = vld [vmem:[%s9095_s18] sm:$0xff] }
 0xd80   : > { %v2658_v16 = vmul.f32 %v7892_v14, %v7888_v6  ;;  %v3480_v14 = vld [vmem:[%s9884_s1] sm:$0xff] }
 0xd81   : > { %7327 = vmatmul.mubr.msk.f32.vlgmr.msra.gmra.mxu1 %vm1738_vm3, %v2492_v13 }
 0xd82   : > { %7335 = vmatpush3.msra.mxu1 %v2660_v15  ;;  %7336 = vmatprep.mubr.msk.f32.mxu1 %vm8439_vm0, %v8438_v0 }
 0xd83   : > { %7350 = vmatprep.subr.mxu1 %v8438_v0 }
 0xd85   : > { %7337 = vmatmul.mubr.msk.f32.vlgmr.msra.gmra.mxu1 %vm1738_vm3, %v2658_v16 }
 0xd86   : > { %7358 = vmatprep.mubr.msk.f32.mxu1 %vm8439_vm0, %v8438_v0  ;;  %7351 = vmatpush3.msra.mxu1 %v6896_v38 }
 0xd87   : > { %7352 = vmatprep.subr.mxu1 %v8438_v0 }
 0xd88   : > { %7353 = vmatpush3.msra.mxu1 %v6895_v39 }
 0xd89   : > { %7354 = vmatprep.subr.mxu1 %v8438_v0 }
 0xd8a   : > { %7355 = vmatpush3.msra.mxu1 %v6894_v40 }
 0xd8b   : > { %7356 = vmatprep.subr.mxu1 %v8438_v0 }
 0xd8c   : > { %7357 = vmatpush3.msra.mxu1 %v6893_v41  ;;  %v6909_v41 = vld [vmem:[%s9871_s4 + $0x1] ss:$0 sm:$0xff]  ;;  %s9889_s4 = sld [smem:[#allocation53_spill]] }
 0xd8d   : > { %7380 = vmatprep.subr.mxu1 %v8438_v0 }
 0xe41   : > { %v2565_v21 = vpop.f32.mrf.mxu1 }
 0xe43   : > { %v7328_v22 = vpop.f32.mrf.mxu1 }
 0xe45   : > { %v2731_v23 = vpop.f32.mrf.mxu1 }
 0xe46   : > { %2736 = vrot.lane.b32.xlu1 %v2731_v23, %s9881_s13 }
 0xe47   : > { %v7338_v24 = vpop.f32.mrf.mxu1 }
 0xeb8   : > { %v2737_v25 = vpop.permute.xlu1 %2736 }
 0xeb9   : > { %v2739_v26 = vsel %vm1662_vm2, %v2565_v21, %v2737_v25 }
 0xeba   : > { %7348 = vmatmul.mubr.msk.f32.vlgmr.msra.gmra.mxu0 %vm1585_vm1, %v2739_v26 }
 0xebb   : > { %7377 = vmatprep.mubr.msk.f32.mxu0 %vm8439_vm0, %v8438_v0  ;;  %7362 = vmatpush3.msra.mxu0 %v6905_v42 }
 0xebc   : > { %7363 = vmatprep.subr.mxu0 %v8438_v0 }
 0xebd   : > { %7364 = vmatpush3.msra.mxu0 %v6904_v43 }
 0xebe   : > { %7365 = vmatprep.subr.mxu0 %v8438_v0 }
 0xebf   : > { %7366 = vmatpush3.msra.mxu0 %v6903_v44 }
 0xec0   : > { %7367 = vmatprep.subr.mxu0 %v8438_v0 }
 0xec1   : > { %7368 = vmatpush3.msra.mxu0 %v6902_v45 }
 0xec2   : > { %7369 = vmatprep.subr.mxu0 %v8438_v0 }
 0xf7a   : > { %v2815_v28 = vpop.f32.mrf.mxu0 }
 0xf7b   : > { %v2816_v29 = vadd.f32 %v6887_v27, %v2815_v28 }
 0xf7c   : > { %v7349_v30 = vpop.f32.mrf.mxu0 }
 0xf7d   : > { %v2819_v31 = vadd.f32 %v2816_v29, %v9002_v46  ;;  %v6901_v46 = vld [vmem:[%s9864_s20 + $0x58] sm:$0xff]  ;;  %s9887_s20 = sld [smem:[#allocation52_spill]] }
 0xf7e   : > { %7370 = vmatpush3.msra.mxu0 %v6901_v46 }
 0xf7f   : > { %v2824_v32 = vsel %vm1585_vm1, %v2819_v31, 0.0  ;;  %7371 = vmatprep.subr.mxu0 %v8438_v0 }
 0xf80   : > { %2825 = vadd.xlane.f32.xlu0 %v2824_v32  ;;  %7372 = vmatpush3.msra.mxu0 %v6900_v47  ;;  %v3216_v47 = vld [vmem:[%s9885_s16] sm:$0xff]  ;;  %s9901_s16 = sld [smem:[#allocation62_spill]] }
 0xf81   : > { %7373 = vmatprep.subr.mxu0 %v8438_v0 }
 0xf82   : > { %7374 = vmatpush3.msra.mxu0 %v6899_v57 }
 0xf83   : > { %7375 = vmatprep.subr.mxu0 %v8438_v0  ;;  %v3217_v57 = vld [vmem:[%s9887_s20] sm:$0x1]  ;;  %s9900_s20 = sld [smem:[#allocation60_spill]] }
 0xf84   : > { %7376 = vmatpush3.msra.mxu0 %v6898_v58 }
 0xf85   : > { %7385 = vmatprep.subr.mxu0 %v8438_v0 }
0x1009   : > { %v2826_v33 = vpop.xlane.xlu0 %2825 }
0x100a   : > { %v2827_v34 = vmul.f32 0.03125, %v2826_v33 }
0x100c   : > { %v2828_v35 = vsub.f32 %v2819_v31, %v2827_v34 }
0x100e   : > { %v2829_v36 = vmul.f32 %v2828_v35, %v2828_v35 }
0x1010   : > { %v2830_v37 = vsel %vm1585_vm1, %v2829_v36, 0.0 }
0x1011   : > { %2831 = vadd.xlane.f32.xlu1 %v2830_v37 }
0x109a   : > { %v2832_v48 = vpop.xlane.xlu1 %2831 }
0x109b   : > { %v2833_v49 = vmul.f32 0.03125, %v2832_v48  ;;  %v3215_v48 = vld [vmem:[%s1562_s19] sm:$0x1]  ;;  %s9892_s19 = sld [smem:[#allocation57_spill]] }
0x109d   : > { %v2834_v50 = vadd.f32 1e-05, %v2833_v49 }
0x109f   : > { %7893 = vrsqrt.f32 %v2834_v50 }
0x10ac   : > { %v7894_v51 = vpop.eup %7893 }
0x10ad   : > { %v2836_v53 = vmul.f32 %v7894_v51, %v2828_v35 }
0x10af   : > { %v2843_v55 = vmul.f32 %v6891_v52, %v2836_v53 }
0x10b1   : > { %v9075_v56 = vadd.f32 %v6892_v54, %v2843_v55 }
0x10b3   : > { %7359 = vmatmul.mubr.msk.f32.vlgmr.msra.gmra.mxu1 %vm1585_vm1, %v9075_v56 }
0x10b4   : > { %7382 = vmatprep.mubr.msk.f32.mxu1 %vm8439_vm0, %v8438_v0  ;;  %7381 = vmatpush3.msra.mxu1 %v3216_v47 }
0x10b7   : > { %7383 = vmatmul.mubr.msk.f32.vlgmr.msra.gmra.mxu1 %vm1738_vm3, %v3215_v48 }
0x10b8   : > { %3361 = vmatprep.mubr.f32.mxu1 %v8438_v0 }
0x1173   : > { %v2944_v60 = vpop.f32.mrf.mxu1 }
0x1174   : > { %v2945_v61 = vadd.f32 %v6907_v59, %v2944_v60  ;;  %v3293_v59 = vld [vmem:[%s9888_s21 + $0x8] sm:$0xff]  ;;  %v3292_v60 = vld [vmem:[%s9888_s21] sm:$0xff] }
0x1175   : > { %v7360_v62 = vpop.f32.mrf.mxu1  ;;  %3327 = vmatprep.subr.mxu1 %v3293_v59 }
0x1176   : > { %v2948_v63 = vmax.f32 %v2945_v61, 0.0  ;;  %v3182_v62 = vld [vmem:[%s9889_s4 + $0xf8] sm:$0xff]  ;;  %3328 = vmatpush1.msra.mxu1 %v3292_v60 }
0x1177   : > { %v3287_v58 = vpop.f32.mrf.mxu1  ;;  %3379 = vmatprep.subr.mxu1 %v3182_v62  ;;  %v3214_v60 = vld [vmem:[%s9889_s4 + $0x1f8] sm:$0xff] }
0x1178   : > { %7378 = vmatmul.mubr.msk.f32.vlgmr.msra.gmra.mxu0 %vm2207_vm4, %v2948_v63  ;;  %v3288_v61 = vadd.f32 %v3287_v58, %v3217_v57  ;;  %v3151_v57 = vld [vmem:[%s9889_s4] sm:$0xff]  ;;  %v3490_v62 = vld [vmem:[%s9892_s19 + $0x18] sm:$0xff] }
0x1179   : > { %7386 = vmatpush3.msra.mxu0 %v3485_v1  ;;  %7393 = vmatprep.mubr.msk.f32.mxu0 %vm8439_vm0, %v8438_v0  ;;  %v7384_v63 = vpop.f32.mrf.mxu1 }
0x117a   : > { %7387 = vmatprep.subr.mxu0 %v8438_v0  ;;  %v3291_v1 = vmax.f32 %v3288_v61, 0.0  ;;  %v3213_v61 = vld [vmem:[%s9889_s4 + $0x1f0] sm:$0xff]  ;;  %v3212_v63 = vld [vmem:[%s9889_s4 + $0x1e8] sm:$0xff] }
0x117b   : > { %7388 = vmatpush3.msra.mxu0 %v3484_v2  ;;  %v3181_v2 = vld [vmem:[%s9889_s4 + $0xf0] sm:$0xff] }
0x117c   : > { %7389 = vmatprep.subr.mxu0 %v8438_v0  ;;  %6916 = vmatmul.mubr.msk.f32.vlgmr.msra.gmra.mxu1 %vm1738_vm3, %v3291_v1  ;;  %v3489_v1 = vld [vmem:[%s9892_s19 + $0x10] sm:$0xff] }
0x117d   : > { %7390 = vmatpush3.msra.mxu0 %v3483_v3  ;;  %v3180_v3 = vld [vmem:[%s9889_s4 + $0xe8] sm:$0xff]  ;;  %3380 = vmatpush1.msra.mxu1 %v3181_v2  ;;  %v3211_v2 = vld [vmem:[%s9889_s4 + $0x1e0] sm:$0xff] }
0x117e   : > { %7391 = vmatprep.subr.mxu0 %v8438_v0  ;;  %3381 = vmatprep.subr.mxu1 %v3180_v3 }
0x117f   : > { %7392 = vmatpush3.msra.mxu0 %v3482_v4  ;;  %v3179_v4 = vld [vmem:[%s9889_s4 + $0xe0] sm:$0xff] }
0x1180   : > { %7394 = vmatmul.mubr.msk.f32.vlgmr.msra.gmra.mxu0 %vm1585_vm1, %v9100_v5  ;;  %7396 = vmatprep.subr.mxu0 %v8438_v0 }
0x1181   : > { %7398 = vmatprep.mubr.msk.f32.mxu0 %vm8439_vm0, %v8438_v0  ;;  %3382 = vmatpush1.msra.mxu1 %v3179_v4  ;;  %v3210_v4 = vld [vmem:[%s9889_s4 + $0x1d8] sm:$0xff] }
0x1238   : > { %v3024_v6 = vpop.f32.mrf.mxu0 }
0x1239   : > { %v3025_v42 = vadd.f32 %v6909_v41, %v3024_v6  ;;  %v3178_v6 = vld [vmem:[%s9889_s4 + $0xd8] sm:$0xff]  ;;  %v3160_v41 = vld [vmem:[%s9889_s4 + $0x48] sm:$0xff] }
0x123a   : > { %v7379_v7 = vpop.f32.mrf.mxu0  ;;  %3383 = vmatprep.subr.mxu1 %v3178_v6  ;;  %v3209_v6 = vld [vmem:[%s9889_s4 + $0x1d0] sm:$0xff] }
0x123b   : > { %v3028_v45 = vadd.f32 %v3025_v42, %v9075_v56  ;;  %v3177_v7 = vld [vmem:[%s9889_s4 + $0xd0] sm:$0xff] }
0x123c   : > { %3384 = vmatpush1.msra.mxu1 %v3177_v7  ;;  %v3488_v7 = vld [vmem:[%s9892_s19 + $0x8] sm:$0xff] }
0x123d   : > { %v3033_v46 = vsel %vm1585_vm1, %v3028_v45, 0.0 }
0x1240   : > { %v3567_v9 = vpop.f32.mrf.mxu0 }
0x1241   : > { %v3568_v10 = vadd.f32 %v6917_v8, %v3567_v9  ;;  %v3176_v8 = vld [vmem:[%s9889_s4 + $0xc8] sm:$0xff]  ;;  %v3175_v9 = vld [vmem:[%s9889_s4 + $0xc0] sm:$0xff] }
0x1242   : > { %v7395_v11 = vpop.f32.mrf.mxu0  ;;  %3385 = vmatprep.subr.mxu1 %v3176_v8  ;;  %v3208_v8 = vld [vmem:[%s9889_s4 + $0x1c8] sm:$0xff] }
0x1243   : > { %3572 = vrot.lane.b32.xlu0 %v3568_v10, %s9877_s9  ;;  %v3173_v11 = vld [vmem:[%s9889_s4 + $0xb0] sm:$0xff]  ;;  %3386 = vmatpush1.msra.mxu1 %v3175_v9  ;;  %v3207_v9 = vld [vmem:[%s9889_s4 + $0x1c0] sm:$0xff] }
0x1247   : > { %3739 = vrot.lane.b32.xlu0 %v3568_v10, %s9876_s7 }
0x124b   : > { %3737 = vrot.lane.b32.xlu0 %v3568_v10, %s9878_s11 }
0x12b5   : > { %v3573_v12 = vpop.permute.xlu0 %3572 }
0x12b6   : > { %7397 = vmatpush3.xpose.msk.msra.mxu0 %vm1662_vm2, %v3573_v12  ;;  %v3172_v12 = vld [vmem:[%s9889_s4 + $0xa8] sm:$0xff] }
0x12b7   : > { %7401 = vmatprep.subr.mxu0 %v8438_v0 }
0x12b9   : > { %7399 = vmatmul.mubr.msk.f32.vlgmr.msra.gmra.mxu0 %vm1662_vm2, %v3568_v10  ;;  %v3740_v27 = vpop.permute.xlu0 %3739 }
0x12ba   : > { %7403 = vmatprep.mubr.msk.f32.mxu0 %vm8439_vm0, %v8438_v0 }
0x12bd   : > { %v3738_v29 = vpop.permute.xlu0 %3737 }
0x1379   : > { %v3644_v13 = vpop.f32.mrf.mxu0 }
0x137a   : > { %v3648_v15 = vmul.f32 0.25, %v3644_v13  ;;  %v3171_v13 = vld [vmem:[%s9889_s4 + $0xa0] sm:$0xff] }
0x137b   : > { %v7400_v16 = vpop.f32.mrf.mxu0 }
0x137c   : > { %v3649_v17 = vadd.f32 %v3648_v15, %v3480_v14  ;;  %v3169_v15 = vld [vmem:[%s9889_s4 + $0x90] sm:$0xff]  ;;  %v3168_v16 = vld [vmem:[%s9889_s4 + $0x88] sm:$0xff] }
0x137e   : > { %v3650_v18 = vsel %vm1738_vm3, %v3649_v17, -inf }
0x137f   : > { %3651 = vmax.xlane.f32.xlu1 %v3650_v18 }
0x1408   : > { %v3652_v19 = vpop.xlane.xlu1 %3651 }
0x1409   : > { %v3653_v20 = vsub.f32 %v3649_v17, %v3652_v19 }
0x140b   : > { %v3654_v21 = vmul.f32 1.442695, %v3653_v20  ;;  %v3060_v20 = vlaneseq }
0x140d   : > { %7895 = vpow2.f32 %v3654_v21  ;;  %v8446_v21 = vmov 1966171168   ;;  %vm9179_vm5 = vcmp.lt.s32.totalorder %v3060_v20, 32  ;;  %vm3091_vm6 = vcmp.ge.s32.totalorder %v3060_v20, 32 }
0x140e   : > { %vm3092_vm7 = vcmp.lt.s32.totalorder %v3060_v20, 64  ;;  %vm3099_vm9 = vcmp.ge.s32.totalorder %v3060_v20, 64  ;;  %vm3100_vm10 = vcmp.lt.s32.totalorder %v3060_v20, 96  ;;  %vm3107_vm12 = vcmp.ge.s32.totalorder %v3060_v20, 96 }
0x140f   : > { %vm9266_vm8 = vmand %vm3091_vm6, %vm3092_vm7  ;;  %vm3108_vm13 = vcmp.lt.s32.totalorder %v3060_v20, 128 }
0x1410   : > { %vm9276_vm11 = vmand %vm3099_vm9, %vm3100_vm10 }
0x1411   : > { %vm9284_vm14 = vmand %vm3107_vm12, %vm3108_vm13 }
0x141a   : > { %v7896_v22 = vpop.eup %7895 }
0x141b   : > { %v3656_v23 = vsel %vm1738_vm3, %v7896_v22, 0.0 }
0x141c   : > { %3657 = vadd.xlane.f32.xlu1 %v3656_v23  ;;  %v6913_v23 = vld [vmem:[%s9873_s6 + $0x1] ss:$0 sm:$0xff] }
0x142d   : > { %3661 = vrot.lane.b32.xlu1 %v3568_v10, %s9880_s12 }
0x14a5   : > { %v3658_v24 = vpop.xlane.xlu1 %3657 }
0x14a6   : > { %7897 = vrcp.f32 %v3658_v24 }
0x14a9   : > { %v3662_v25 = vpop.permute.xlu1 %3661 }
0x14aa   : > { %7402 = vmatpush3.msra.mxu0 %v3662_v25  ;;  %v9168_v25 = vshrl.u32 %v3060_v20, 7 }
0x14ab   : > { %7406 = vmatprep.subr.mxu0 %v8438_v0 }
0x14b3   : > { %v7898_v26 = vpop.eup %7897 }
0x14b4   : > { %v3660_v28 = vmul.f32 %v7898_v26, %v7896_v22  ;;  %v3067_v22 = vunpack.c.l.s4 %v8446_v21  ;;  %v3198_v21 = vld [vmem:[%s9889_s4 + $0x178] sm:$0xff] }
0x14b6   : > { %7404 = vmatmul.mubr.msk.f32.vlgmr.msra.gmra.mxu0 %vm1738_vm3, %v3660_v28  ;;  %v3068_v24 = vunpack.c.0.s8 %v3067_v22  ;;  %v3166_v28 = vld [vmem:[%s9889_s4 + $0x78] sm:$0xff]  ;;  %v3197_v22 = vld [vmem:[%s9889_s4 + $0x170] sm:$0xff] }
0x14b7   : > { %7407 = vmatpush3.xpose.msk.msra.mxu0 %vm1662_vm2, %v3740_v27  ;;  %7408 = vmatprep.mubr.msk.f32.mxu0 %vm8439_vm0, %v8438_v0  ;;  %v3167_v27 = vld [vmem:[%s9889_s4 + $0x80] sm:$0xff] }
0x14b8   : > { %7411 = vmatprep.subr.mxu0 %v8438_v0 }
0x14ba   : > { %7409 = vmatmul.mubr.msk.f32.vlgmr.msra.gmra.mxu0 %vm1662_vm2, %v3738_v29  ;;  %v3165_v29 = vld [vmem:[%s9889_s4 + $0x70] sm:$0xff] }
0x14bb   : > { %7413 = vmatprep.mubr.msk.f32.mxu0 %vm8439_vm0, %v8438_v0 }
0x1576   : > { %v9129_v30 = vpop.f32.mrf.mxu0 }
0x1578   : > { %v7405_v31 = vpop.f32.mrf.mxu0 }
0x157a   : > { %v3811_v32 = vpop.f32.mrf.mxu0 }
0x157b   : > { %v3815_v33 = vmul.f32 0.25, %v3811_v32  ;;  %v3164_v32 = vld [vmem:[%s9889_s4 + $0x68] sm:$0xff] }
0x157c   : > { %v7410_v34 = vpop.f32.mrf.mxu0 }
0x157d   : > { %v3816_v35 = vadd.f32 %v3815_v33, %v3480_v14  ;;  %v3170_v14 = vld [vmem:[%s9889_s4 + $0x98] sm:$0xff]  ;;  %v6914_v33 = vld [vmem:[%s9875_s8 + $0x1] ss:$0 sm:$0xff] }
0x157f   : > { %v3817_v36 = vsel %vm1738_vm3, %v3816_v35, -inf }
0x1580   : > { %3818 = vmax.xlane.f32.xlu0 %v3817_v36 }
0x1596   : > { %3828 = vrot.lane.b32.xlu0 %v3568_v10, %s9879_s15  ;;  %v3174_v10 = vld [vmem:[%s9889_s4 + $0xb8] sm:$0xff] }
0x1597   : > { %3387 = vmatprep.subr.mxu1 %v3174_v10 }
0x1598   : > { %3388 = vmatpush1.msra.mxu1 %v3173_v11  ;;  %v3206_v11 = vld [vmem:[%s9889_s4 + $0x1b8] sm:$0xff] }
0x1599   : > { %3389 = vmatprep.subr.mxu1 %v3172_v12  ;;  %v3205_v12 = vld [vmem:[%s9889_s4 + $0x1b0] sm:$0xff] }
0x159a   : > { %3390 = vmatpush1.msra.mxu1 %v3171_v13  ;;  %v3204_v13 = vld [vmem:[%s9889_s4 + $0x1a8] sm:$0xff] }
0x159b   : > { %3391 = vmatprep.subr.mxu1 %v3170_v14  ;;  %v3203_v14 = vld [vmem:[%s9889_s4 + $0x1a0] sm:$0xff] }
0x159c   : > { %3392 = vmatpush1.msra.mxu1 %v3169_v15  ;;  %v3202_v15 = vld [vmem:[%s9889_s4 + $0x198] sm:$0xff] }
0x159d   : > { %3393 = vmatprep.subr.mxu1 %v3168_v16  ;;  %v3201_v16 = vld [vmem:[%s9889_s4 + $0x190] sm:$0xff] }
0x159e   : > { %3394 = vmatpush1.msra.mxu1 %v3167_v27  ;;  %v3193_v27 = vld [vmem:[%s9889_s4 + $0x150] sm:$0xff] }
0x159f   : > { %3395 = vmatprep.subr.mxu1 %v3166_v28  ;;  %v3192_v28 = vld [vmem:[%s9889_s4 + $0x148] sm:$0xff] }
0x15a0   : > { %3396 = vmatpush1.msra.mxu1 %v3165_v29  ;;  %v3191_v29 = vld [vmem:[%s9889_s4 + $0x140] sm:$0xff] }
0x15a1   : > { %3397 = vmatprep.subr.mxu1 %v3164_v32  ;;  %v3189_v32 = vld [vmem:[%s9889_s4 + $0x130] sm:$0xff] }
0x1609   : > { %v3819_v37 = vpop.xlane.xlu0 %3818 }
0x160a   : > { %v3820_v38 = vsub.f32 %v3816_v35, %v3819_v37  ;;  %v9176_v35 = vsub.s32 %v3068_v24, %v9168_v25  ;;  %v3163_v37 = vld [vmem:[%s9889_s4 + $0x60] sm:$0xff] }
0x160b   : > { %3398 = vmatpush1.msra.mxu1 %v3163_v37  ;;  %v3195_v24 = vld [vmem:[%s9889_s4 + $0x160] sm:$0xff] }
0x160c   : > { %v3821_v39 = vmul.f32 1.442695, %v3820_v38  ;;  %v3162_v38 = vld [vmem:[%s9889_s4 + $0x58] sm:$0xff]  ;;  %v3187_v37 = vld [vmem:[%s9889_s4 + $0x120] sm:$0xff] }
0x160d   : > { %v3829_v40 = vpop.permute.xlu0 %3828  ;;  %3399 = vmatprep.subr.mxu1 %v3162_v38  ;;  %v3186_v38 = vld [vmem:[%s9889_s4 + $0x118] sm:$0xff] }
0x160e   : > { %7899 = vpow2.f32 %v3821_v39  ;;  %7412 = vmatpush3.msra.mxu0 %v3829_v40  ;;  %v3161_v39 = vld [vmem:[%s9889_s4 + $0x50] sm:$0xff] }
0x160f   : > { %7416 = vmatprep.subr.mxu0 %v8438_v0  ;;  %3400 = vmatpush1.msra.mxu1 %v3161_v39 }
0x1610   : > { %3401 = vmatprep.subr.mxu1 %v3160_v41 }
0x161b   : > { %v7900_v43 = vpop.eup %7899 }
0x161c   : > { %v3823_v44 = vsel %vm1738_vm3, %v7900_v43, 0.0 }
0x161d   : > { %3824 = vadd.xlane.f32.xlu1 %v3823_v44  ;;  %v3159_v44 = vld [vmem:[%s9889_s4 + $0x40] sm:$0xff] }
0x161e   : > { %3402 = vmatpush1.msra.mxu1 %v3159_v44 }
0x1621   : > { %3034 = vadd.xlane.f32.xlu1 %v3033_v46  ;;  %v3157_v46 = vld [vmem:[%s9889_s4 + $0x30] sm:$0xff] }
0x16a6   : > { %v3825_v49 = vpop.xlane.xlu1 %3824 }
0x16a7   : > { %7901 = vrcp.f32 %v3825_v49  ;;  %v3156_v49 = vld [vmem:[%s9889_s4 + $0x28] sm:$0xff] }
0x16aa   : > { %v3035_v50 = vpop.xlane.xlu1 %3034 }
0x16ab   : > { %v3036_v51 = vmul.f32 0.03125, %v3035_v50 }
0x16ad   : > { %v3037_v52 = vsub.f32 %v3028_v45, %v3036_v51  ;;  %v3158_v45 = vld [vmem:[%s9889_s4 + $0x38] sm:$0xff] }
0x16ae   : > { %3403 = vmatprep.subr.mxu1 %v3158_v45 }
0x16af   : > { %v3038_v53 = vmul.f32 %v3037_v52, %v3037_v52  ;;  %3404 = vmatpush1.msra.mxu1 %v3157_v46 }
0x16b0   : > { %3405 = vmatprep.subr.mxu1 %v3156_v49 }
0x16b1   : > { %v3039_v54 = vsel %vm1585_vm1, %v3038_v53, 0.0  ;;  %v3155_v53 = vld [vmem:[%s9889_s4 + $0x20] sm:$0xff] }
0x16b2   : > { %3040 = vadd.xlane.f32.xlu1 %v3039_v54  ;;  %v3154_v54 = vld [vmem:[%s9889_s4 + $0x18] sm:$0xff]  ;;  %3406 = vmatpush1.msra.mxu1 %v3155_v53 }
0x16b3   : > { %3407 = vmatprep.subr.mxu1 %v3154_v54 }
0x16b4   : > { %v7902_v55 = vpop.eup %7901 }
0x16b5   : > { %v3827_v56 = vmul.f32 %v7902_v55, %v7900_v43  ;;  %v3153_v55 = vld [vmem:[%s9889_s4 + $0x10] sm:$0xff] }
0x16b6   : > { %3408 = vmatpush1.msra.mxu1 %v3153_v55 }
0x16b7   : > { %7414 = vmatmul.mubr.msk.f32.vlgmr.msra.gmra.mxu0 %vm1738_vm3, %v3827_v56  ;;  %v3152_v56 = vld [vmem:[%s9889_s4 + $0x8] sm:$0xff] }
0x16b8   : > { %7424 = vmatprep.mubr.msk.f32.mxu0 %vm8439_vm0, %v8438_v0  ;;  %3409 = vmatprep.subr.mxu1 %v3152_v56  ;;  %v9300_v56 = vsub.s32 0, %v9168_v25 }
0x16b9   : > { %3410 = vmatpush1.msra.mxu1 %v3151_v57  ;;  %7417 = vmatpush3.msra.mxu0 %v3490_v62  ;;  %v9303_v57 = vsub.s32 1, %v9168_v25  ;;  %v3363_v25 = vpop.f32.mrf.mxu1 }
0x16ba   : > { %3411 = vmatprep.subr.mxu1 %v3214_v60  ;;  %7418 = vmatprep.subr.mxu0 %v8438_v0  ;;  %v6925_v60 = vld [vmem:[#allocation8] ss:$0 sm:$0xff] }
0x16bb   : > { %3412 = vmatpush2.msra.mxu1 %v3213_v61  ;;  %7419 = vmatpush3.msra.mxu0 %v3489_v1 }
0x16bc   : > { %3413 = vmatprep.subr.mxu1 %v3212_v63  ;;  %7420 = vmatprep.subr.mxu0 %v8438_v0 }
0x16bd   : > { %3414 = vmatpush2.msra.mxu1 %v3211_v2  ;;  %7421 = vmatpush3.msra.mxu0 %v3488_v7 }
0x16be   : > { %3415 = vmatprep.subr.mxu1 %v3210_v4  ;;  %7422 = vmatprep.subr.mxu0 %v8438_v0 }
0x16bf   : > { %3416 = vmatpush2.msra.mxu1 %v3209_v6 }
0x16c0   : > { %3417 = vmatprep.subr.mxu1 %v3208_v8 }
0x16c1   : > { %3418 = vmatpush2.msra.mxu1 %v3207_v9 }
0x16c2   : > { %3419 = vmatprep.subr.mxu1 %v3206_v11 }
0x16c3   : > { %3420 = vmatpush2.msra.mxu1 %v3205_v12 }
0x16c4   : > { %3421 = vmatprep.subr.mxu1 %v3204_v13 }
0x16c5   : > { %3422 = vmatpush2.msra.mxu1 %v3203_v14 }
0x16c6   : > { %3423 = vmatprep.subr.mxu1 %v3202_v15 }
0x16c7   : > { %3424 = vmatpush2.msra.mxu1 %v3201_v16 }
0x173b   : > { %v3041_v17 = vpop.xlane.xlu1 %3040 }
0x173c   : > { %v3042_v18 = vmul.f32 0.03125, %v3041_v17  ;;  %v3487_v17 = vld [vmem:[%s9892_s19] sm:$0xff] }
0x173d   : > { %7423 = vmatpush3.msra.mxu0 %v3487_v17 }
0x173e   : > { %v3043_v19 = vadd.f32 1e-05, %v3042_v18  ;;  %v3200_v18 = vld [vmem:[%s9889_s4 + $0x188] sm:$0xff]  ;;  %7427 = vmatprep.subr.mxu0 %v8438_v0 }
0x173f   : > { %3425 = vmatprep.subr.mxu1 %v3200_v18  ;;  %v4021_v18 = vld [vmem:[%s9899_s17 + $0x18] sm:$0xff] }
0x1740   : > { %7903 = vrsqrt.f32 %v3043_v19  ;;  %v3199_v19 = vld [vmem:[%s9889_s4 + $0x180] sm:$0xff] }
0x1741   : > { %3426 = vmatpush2.msra.mxu1 %v3199_v19  ;;  %v4020_v19 = vld [vmem:[%s9899_s17 + $0x10] sm:$0xff] }
0x1742   : > { %3427 = vmatprep.subr.mxu1 %v3198_v21  ;;  %v4019_v21 = vld [vmem:[%s9899_s17 + $0x8] sm:$0xff] }
0x1743   : > { %3428 = vmatpush2.msra.mxu1 %v3197_v22  ;;  %v4018_v22 = vld [vmem:[%s9899_s17] sm:$0xff] }
0x174d   : > { %v7904_v26 = vpop.eup %7903 }
0x174e   : > { %v3045_v31 = vmul.f32 %v7904_v26, %v3037_v52  ;;  %v3194_v26 = vld [vmem:[%s9889_s4 + $0x158] sm:$0xff] }
0x1750   : > { %v3052_v34 = vmul.f32 %v6913_v23, %v3045_v31  ;;  %v3196_v23 = vld [vmem:[%s9889_s4 + $0x168] sm:$0xff]  ;;  %v3190_v31 = vld [vmem:[%s9889_s4 + $0x138] sm:$0xff] }
0x1751   : > { %3429 = vmatprep.subr.mxu1 %v3196_v23 }
0x1752   : > { %v3059_v40 = vadd.f32 %v6914_v33, %v3052_v34  ;;  %3430 = vmatpush2.msra.mxu1 %v3195_v24  ;;  %v3188_v33 = vld [vmem:[%s9889_s4 + $0x128] sm:$0xff] }
0x1753   : > { %3431 = vmatprep.subr.mxu1 %v3194_v26 }
0x1754   : > { %v3072_v42 = vrot.slane %v3059_v40, %v9176_v35  ;;  %v3111_v43 = vcombine.high %v3059_v40, %v3059_v40  ;;  %3064 = vst.msk [vmem:[#allocation2] sm:$0x1] %vm9179_vm5, %v3059_v40  ;;  %3432 = vmatpush2.msra.mxu1 %v3193_v27  ;;  %v3185_v40 = vld [vmem:[%s9889_s4 + $0x110] sm:$0xff] }
0x1755   : > { %3433 = vmatprep.subr.mxu1 %v3192_v28 }
0x1756   : > { %v3073_v47 = vcombine.high %v3072_v42, %v3072_v42  ;;  %v3118_v48 = vrot.slane %v3111_v43, %v9176_v35  ;;  %v3080_v59 = vrot.slane %v3072_v42, %v9176_v35  ;;  %3434 = vmatpush2.msra.mxu1 %v3191_v29  ;;  %v3184_v42 = vld [vmem:[%s9889_s4 + $0x108] sm:$0xff]  ;;  %v3183_v43 = vld [vmem:[%s9889_s4 + $0x100] sm:$0xff]  ;;  %v6927_v29 = vld [vmem:[#allocation14] ss:$0 sm:$0xff]  ;;  %s9903_s4 = sld [smem:[#allocation71_spill]] }
0x1757   : > { %3435 = vmatprep.subr.mxu1 %v3190_v31 }
0x1758   : > { %v3087_v50 = vrot.slane %v3073_v47, %v9176_v35  ;;  %v3128_v51 = vcombine.high %v3118_v48, %v3118_v48  ;;  %v9197_v52 = vrot.slane %v3118_v48, %v9176_v35  ;;  %v3095_v3 = vcombine.high %v3080_v59, %v3080_v59  ;;  %3436 = vmatpush2.msra.mxu1 %v3189_v32  ;;  %v6928_v32 = vld [vmem:[#allocation16] ss:$0 sm:$0xff]  ;;  %v6381_v48 = vld [vmem:[%s8667_s3 + $0xf0] sm:$0xff] }
0x1759   : > { %3437 = vmatprep.subr.mxu1 %v3188_v33 }
0x175a   : > { %3088 = vrot.lane.b32.xlu0 %v3087_v50, %s9777_s2  ;;  %3127 = vst.msk [vmem:[#allocation2 + $0x1] sm:$0x1] %vm9179_vm5, %v9197_v52  ;;  %v9209_v58 = vrot.slane %v3128_v51, %v9176_v35  ;;  %v3103_v10 = vcombine.high %v3087_v50, %v3087_v50  ;;  %v3140_v41 = vcombine.high %v9197_v52, %v9197_v52 }
0x175b   : > { %3438 = vmatpush2.msra.mxu1 %v3187_v37  ;;  %v4026_v37 = vld [vmem:[%s9900_s20 + $0x18] sm:$0xff] }
0x175c   : > { %3439 = vmatprep.subr.mxu1 %v3186_v38  ;;  %v3145_v44 = vcombine.high %v9209_v58, %v9209_v58  ;;  %v4025_v38 = vld [vmem:[%s9900_s20 + $0x10] sm:$0xff] }
0x175d   : > { %3440 = vmatpush2.msra.mxu1 %v3185_v40  ;;  %v4023_v40 = vld [vmem:[%s9900_s20] sm:$0xff] }
0x175e   : > { %3136 = vrot.lane.b32.xlu0 %v9209_v58, %s9777_s2  ;;  %3441 = vmatprep.subr.mxu1 %v3184_v42 }
0x175f   : > { %3442 = vmatpush2.msra.mxu1 %v3183_v43 }
0x1760   : > { %7464 = vmatprep.subr.mxu1 %v8438_v0 }
0x1762   : > { %3096 = vrot.lane.b32.xlu0 %v3095_v3, %s9880_s12  ;;  %v3365_v3 = vpop.f32.mrf.mxu1 }
0x1766   : > { %3104 = vrot.lane.b32.xlu0 %v3103_v10, %s9877_s9 }
0x1777   : > { %v3900_v34 = vpop.f32.mrf.mxu0 }
0x1778   : > { %3905 = vrot.lane.b32.xlu1 %v3900_v34, %s9881_s13 }
0x1779   : > { %v7415_v39 = vpop.f32.mrf.mxu0 }
0x177a   : > { %v4024_v39 = vld [vmem:[%s9900_s20 + $0x8] sm:$0xff] }
0x177c   : > { %3141 = vrot.lane.b32.xlu1 %v3140_v41, %s9880_s12 }
0x1780   : > { %3146 = vrot.lane.b32.xlu1 %v3145_v44, %s9877_s9  ;;  %v6931_v44 = vld [vmem:[#allocation11] ss:$0 sm:$0xff] }
0x17cc   : > { %v3089_v46 = vpop.permute.xlu0 %3088 }
0x17cd   : > { %3094 = vst.msk [vmem:[#allocation2] sm:$0x1] %vm9266_vm8, %v3089_v46 }
0x17d0   : > { %v3137_v47 = vpop.permute.xlu0 %3136 }
0x17d1   : > { %3139 = vst.msk [vmem:[#allocation2 + $0x1] sm:$0x1] %vm9266_vm8, %v3137_v47  ;;  %v6929_v47 = vld [vmem:[#allocation10] ss:$0 sm:$0xff] }
0x17d4   : > { %v3097_v49 = vpop.permute.xlu0 %3096 }
0x17d5   : > { %3102 = vst.msk [vmem:[#allocation2] sm:$0x1] %vm9276_vm11, %v3097_v49 }
0x17d8   : > { %v3105_v51 = vpop.permute.xlu0 %3104 }
0x17d9   : > { %3110 = vst.msk [vmem:[#allocation2] sm:$0x1] %vm9284_vm14, %v3105_v51 }
0x17ea   : > { %v3906_v52 = vpop.permute.xlu1 %3905 }
0x17eb   : > { %v3908_v53 = vsel %vm1662_vm2, %v9129_v30, %v3906_v52 }
0x17ec   : > { %7425 = vmatmul.mubr.msk.f32.vlgmr.msra.gmra.mxu0 %vm1585_vm1, %v3908_v53 }
0x17ed   : > { %7435 = vmatprep.mubr.msk.f32.mxu0 %vm8439_vm0, %v8438_v0  ;;  %7428 = vmatpush3.msra.mxu0 %v4021_v18 }
0x17ee   : > { %v3142_v54 = vpop.permute.xlu1 %3141  ;;  %7429 = vmatprep.subr.mxu0 %v8438_v0 }
0x17ef   : > { %3144 = vst.msk [vmem:[#allocation2 + $0x1] sm:$0x1] %vm9276_vm11, %v3142_v54  ;;  %7430 = vmatpush3.msra.mxu0 %v4020_v19 }
0x17f0   : > { %7431 = vmatprep.subr.mxu0 %v8438_v0 }
0x17f1   : > { %7432 = vmatpush3.msra.mxu0 %v4019_v21  ;;  %v4031_v21 = vld [vmem:[%s9901_s16 + $0x18] sm:$0xff] }
0x17f2   : > { %v3147_v55 = vpop.permute.xlu1 %3146  ;;  %7433 = vmatprep.subr.mxu0 %v8438_v0 }
0x17f3   : > { %3149 = vst.msk [vmem:[#allocation2 + $0x1] sm:$0x1] %vm9284_vm14, %v3147_v55  ;;  %7434 = vmatpush3.msra.mxu0 %v4018_v22  ;;  %v4030_v22 = vld [vmem:[%s9901_s16 + $0x10] sm:$0xff] }
0x17f4   : > { %7438 = vmatprep.subr.mxu0 %v8438_v0 }
0x17fa   : > { %v3150_v30 = vld [vmem:[#allocation2] sm:$0x3] }
0x17fb   : > { %v3372_v58 = vrot.slane %v3150_v30, %v9300_v56  ;;  %v3376_v59 = vrot.slane %v3150_v30, %v9303_v57 }
0x17fd   : > { %3443 = vmatprep.mubr.f32.mxu1 %v3376_v59 }
0x17fe   : > { %3444 = vmatmul.mubr.f32.vlgmr.msra.gmra.mxu1 %v3372_v58 }
0x17ff   : > { %7466 = vmatprep.mubr.msk.f32.mxu1 %vm8439_vm0, %v8438_v0 }
0x18ac   : > { %v3984_v61 = vpop.f32.mrf.mxu0 }
0x18ad   : > { %v3985_v62 = vadd.f32 %v6925_v60, %v3984_v61 }
0x18ae   : > { %v7426_v63 = vpop.f32.mrf.mxu0 }
0x18af   : > { %v3988_v1 = vadd.f32 %v3985_v62, %v9100_v5 }
0x18b1   : > { %v3991_v2 = vsel %vm1585_vm1, %v3988_v1, 0.0 }
0x18b2   : > { %3992 = vadd.xlane.f32.xlu0 %v3991_v2 }
0x18be   : > { %v3445_v4 = vpop.f32.mrf.mxu1 }
0x18bf   : > { %v3446_v6 = vadd.f32 %v3445_v4, %v3363_v25 }
0x18c0   : > { %v3447_v7 = vpop.f32.mrf.mxu1 }
0x18c1   : > { %3451 = vst.msk [vmem:[#allocation4] sm:$0x1] %vm3450_vm15, %v3446_v6  ;;  %v3448_v8 = vadd.f32 %v3447_v7, %v3365_v3  ;;  %3457 = vrot.lane.b32.xlu1 %v3446_v6, %s9880_s12 }
0x18c3   : > { %3465 = vst.msk [vmem:[#allocation4 + $0x4] sm:$0x1] %vm3450_vm15, %v3448_v8 }
0x18c5   : > { %3467 = vrot.lane.b32.xlu1 %v3448_v8, %s9877_s9 }
0x18c8   : > { %3453 = vrot.lane.b32.xlu0 %v3446_v6, %s9877_s9 }
0x18cc   : > { %3461 = vrot.lane.b32.xlu0 %v3446_v6, %s9777_s2 }
0x18d0   : > { %3471 = vrot.lane.b32.xlu0 %v3448_v8, %s9880_s12 }
0x1933   : > { %v3458_v5 = vpop.permute.xlu1 %3457 }
0x1934   : > { %3460 = vst.msk [vmem:[#allocation4 + $0x2] sm:$0x1] %vm3450_vm15, %v3458_v5 }
0x1937   : > { %v3468_v9 = vpop.permute.xlu1 %3467 }
0x1938   : > { %3470 = vst.msk [vmem:[#allocation4 + $0x5] sm:$0x1] %vm3450_vm15, %v3468_v9 }
0x193b   : > { %v3993_v10 = vpop.xlane.xlu0 %3992 }
0x193c   : > { %v3994_v11 = vmul.f32 0.03125, %v3993_v10 }
0x193e   : > { %v3995_v12 = vsub.f32 %v3988_v1, %v3994_v11 }
0x193f   : > { %v3454_v13 = vpop.permute.xlu0 %3453 }
0x1940   : > { %3456 = vst.msk [vmem:[#allocation4 + $0x1] sm:$0x1] %vm3450_vm15, %v3454_v13  ;;  %v3996_v14 = vmul.f32 %v3995_v12, %v3995_v12 }
0x1942   : > { %v3997_v15 = vsel %vm1585_vm1, %v3996_v14, 0.0 }
0x1943   : > { %3998 = vadd.xlane.f32.xlu1 %v3997_v15  ;;  %v3462_v16 = vpop.permute.xlu0 %3461 }
0x1944   : > { %3464 = vst.msk [vmem:[#allocation4 + $0x3] sm:$0x1] %vm3450_vm15, %v3462_v16 }
0x1947   : > { %v3472_v17 = vpop.permute.xlu0 %3471 }
0x1948   : > { %3474 = vst.msk [vmem:[#allocation4 + $0x6] sm:$0x1] %vm3450_vm15, %v3472_v17 }
0x1954   : > { %3475 = vrot.lane.b32.xlu1 %v3448_v8, %s9777_s2  ;;  %s9902_s2 = sld [smem:[#allocation69_spill]] }
0x19cc   : > { %v3999_v23 = vpop.xlane.xlu1 %3998 }
0x19cd   : > { %v4000_v24 = vmul.f32 0.03125, %v3999_v23  ;;  %v4029_v23 = vld [vmem:[%s9901_s16 + $0x8] sm:$0xff] }
0x19cf   : > { %v4001_v26 = vadd.f32 1e-05, %v4000_v24  ;;  %v4028_v24 = vld [vmem:[%s9901_s16] sm:$0xff] }
0x19d0   : > { %v3476_v27 = vpop.permute.xlu1 %3475 }
0x19d1   : > { %7905 = vrsqrt.f32 %v4001_v26  ;;  %3478 = vst.msk [vmem:[#allocation4 + $0x7] sm:$0x1] %vm3450_vm15, %v3476_v27 }
0x19d8   : > { %v9347_v41 = vld [vmem:[#allocation4] sm:$0xff] }
0x19de   : > { %v7906_v28 = vpop.eup %7905 }
0x19df   : > { %v4003_v31 = vmul.f32 %v7906_v28, %v3995_v12 }
0x19e1   : > { %v4010_v33 = vmul.f32 %v6927_v29, %v4003_v31  ;;  %v6939_v31 = vld [vmem:[#allocation13] ss:$0 sm:$0xff] }
0x19e3   : > { %v9334_v34 = vadd.f32 %v6928_v32, %v4010_v33 }
0x19e5   : > { %7436 = vmatmul.mubr.msk.f32.vlgmr.msra.gmra.mxu0 %vm1585_vm1, %v9334_v34 }
0x19e6   : > { %7439 = vmatpush3.msra.mxu0 %v4026_v37  ;;  %7446 = vmatprep.mubr.msk.f32.mxu0 %vm8439_vm0, %v8438_v0 }
0x19e7   : > { %7440 = vmatprep.subr.mxu0 %v8438_v0 }
0x19e8   : > { %7441 = vmatpush3.msra.mxu0 %v4025_v38 }
0x19e9   : > { %7442 = vmatprep.subr.mxu0 %v8438_v0 }
0x19ea   : > { %7443 = vmatpush3.msra.mxu0 %v4024_v39 }
0x19eb   : > { %7444 = vmatprep.subr.mxu0 %v8438_v0 }
0x19ec   : > { %7445 = vmatpush3.msra.mxu0 %v4023_v40 }
0x19ed   : > { %7447 = vmatmul.mubr.msk.f32.vlgmr.msra.gmra.mxu0 %vm1585_vm1, %v9347_v41  ;;  %7449 = vmatprep.subr.mxu0 %v8438_v0 }
0x19ee   : > { %7451 = vmatprep.mubr.msk.f32.mxu0 %vm8439_vm0, %v8438_v0 }
0x1aa5   : > { %v4108_v42 = vpop.f32.mrf.mxu0 }
0x1aa6   : > { %v4109_v52 = vadd.f32 %v6929_v47, %v4108_v42  ;;  %v4638_v47 = vld [vmem:[%s9902_s2 + $0x18] sm:$0xff] }
0x1aa7   : > { %v7437_v43 = vpop.f32.mrf.mxu0 }
0x1aad   : > { %v4187_v46 = vpop.f32.mrf.mxu0 }
0x1aae   : > { %v4188_v49 = vadd.f32 %v6931_v44, %v4187_v46 }
0x1aaf   : > { %v7448_v51 = vpop.f32.mrf.mxu0 }
0x1ab0   : > { %7450 = vmatpush3.xpose.msk.msra.mxu0 %vm1662_vm2, %v4188_v49  ;;  %v4635_v51 = vld [vmem:[%s9902_s2] sm:$0xff] }
0x1ab1   : > { %7454 = vmatprep.subr.mxu0 %v8438_v0 }
0x1ab3   : > { %7452 = vmatmul.mubr.msk.f32.vlgmr.msra.gmra.mxu0 %vm1662_vm2, %v4109_v52 }
0x1ab4   : > { %7456 = vmatprep.mubr.msk.f32.mxu0 %vm8439_vm0, %v8438_v0 }
0x1b73   : > { %v4263_v53 = vpop.f32.mrf.mxu0 }
0x1b74   : > { %v4267_v54 = vmul.f32 0.25, %v4263_v53  ;;  %v4646_v53 = vld [vmem:[%s9903_s4 + $0x30] sm:$0xff] }
0x1b75   : > { %v7453_v55 = vpop.f32.mrf.mxu0 }
0x1b76   : > { %v4268_v30 = vsel %vm1738_vm3, %v4267_v54, -inf  ;;  %v4644_v55 = vld [vmem:[%s9903_s4 + $0x20] sm:$0xff] }
0x1b77   : > { %4269 = vmax.xlane.f32.xlu0 %v4268_v30  ;;  %v4643_v30 = vld [vmem:[%s9903_s4 + $0x18] sm:$0xff] }
0x1b8d   : > { %4279 = vrot.lane.b32.xlu0 %v4188_v49, %s9877_s9 }
0x1b91   : > { %4355 = vrot.lane.b32.xlu0 %v4109_v52, %s9878_s11  ;;  %v4647_v52 = vld [vmem:[%s9903_s4 + $0x38] sm:$0xff] }
0x1c00   : > { %v4270_v58 = vpop.xlane.xlu0 %4269 }
0x1c01   : > { %v4271_v59 = vsub.f32 %v4267_v54, %v4270_v58  ;;  %v4645_v54 = vld [vmem:[%s9903_s4 + $0x28] sm:$0xff] }
0x1c03   : > { %v4272_v60 = vmul.f32 1.442695, %v4271_v59 }
0x1c04   : > { %v4280_v61 = vpop.permute.xlu0 %4279 }
0x1c05   : > { %7907 = vpow2.f32 %v4272_v60  ;;  %7455 = vmatpush3.msra.mxu0 %v4280_v61 }
0x1c06   : > { %7459 = vmatprep.subr.mxu0 %v8438_v0 }
0x1c08   : > { %v4356_v4 = vpop.permute.xlu0 %4355 }
0x1c12   : > { %v7908_v62 = vpop.eup %7907 }
0x1c13   : > { %v4274_v63 = vsel %vm1738_vm3, %v7908_v62, 0.0 }
0x1c14   : > { %4275 = vadd.xlane.f32.xlu1 %v4274_v63 }
0x1c25   : > { %4357 = vrot.lane.b32.xlu1 %v4188_v49, %s9878_s11 }
0x1c9d   : > { %v4276_v1 = vpop.xlane.xlu1 %4275 }
0x1c9e   : > { %7909 = vrcp.f32 %v4276_v1  ;;  %v6942_v1 = vld [vmem:[#allocation19] ss:$0 sm:$0xff] }
0x1ca1   : > { %v4358_v3 = vpop.permute.xlu1 %4357 }
0x1cab   : > { %v7910_v2 = vpop.eup %7909 }
0x1cac   : > { %v4278_v25 = vmul.f32 %v7910_v2, %v7908_v62  ;;  %v6941_v62 = vld [vmem:[#allocation17] ss:$0 sm:$0xff] }
0x1cae   : > { %7457 = vmatmul.mubr.msk.f32.vlgmr.msra.gmra.mxu0 %vm1738_vm3, %v4278_v25 }
0x1caf   : > { %7460 = vmatpush3.xpose.msk.msra.mxu0 %vm1662_vm2, %v4358_v3  ;;  %7461 = vmatprep.mubr.msk.f32.mxu0 %vm8439_vm0, %v8438_v0  ;;  %v6953_v3 = vld [vmem:[%s9882_s14 + $0x38] sm:$0xff] }
0x1cb0   : > { %7469 = vmatprep.subr.mxu0 %v8438_v0 }
0x1cb2   : > { %7462 = vmatmul.mubr.msk.f32.vlgmr.msra.gmra.mxu0 %vm1662_vm2, %v4356_v4  ;;  %v6952_v4 = vld [vmem:[%s9882_s14 + $0x30] sm:$0xff] }
0x1cb3   : > { %7477 = vmatprep.mubr.msk.f32.mxu0 %vm8439_vm0, %v8438_v0  ;;  %7470 = vmatpush3.msra.mxu0 %v4031_v21 }
0x1cb4   : > { %7471 = vmatprep.subr.mxu0 %v8438_v0 }
0x1cb5   : > { %7472 = vmatpush3.msra.mxu0 %v4030_v22 }
0x1cb6   : > { %7473 = vmatprep.subr.mxu0 %v8438_v0 }
0x1cb7   : > { %7474 = vmatpush3.msra.mxu0 %v4029_v23 }
0x1cb8   : > { %7475 = vmatprep.subr.mxu0 %v8438_v0 }
0x1cb9   : > { %7476 = vmatpush3.msra.mxu0 %v4028_v24 }
0x1cba   : > { %7491 = vmatprep.subr.mxu0 %v8438_v0 }
0x1d6e   : > { %v4351_v6 = vpop.f32.mrf.mxu0 }
0x1d70   : > { %v7458_v7 = vpop.f32.mrf.mxu0 }
0x1d71   : > { %v6950_v7 = vld [vmem:[%s9882_s14 + $0x20] sm:$0xff] }
0x1d72   : > { %v4429_v8 = vpop.f32.mrf.mxu0 }
0x1d73   : > { %v4433_v5 = vmul.f32 0.25, %v4429_v8  ;;  %v9427_v8 = vld [vmem:[%s9095_s18 + $0x8] sm:$0xff]  ;;  %s1554_s18 = sand.u32 1, %s8368_s10  }
0x1d74   : > { %v7463_v9 = vpop.f32.mrf.mxu0 }
0x1d75   : > { %v4434_v10 = vsel %vm1738_vm3, %v4433_v5, -inf  ;;  %v4641_v9 = vld [vmem:[%s9903_s4 + $0x8] sm:$0xff] }
0x1d76   : > { %4435 = vmax.xlane.f32.xlu1 %v4434_v10  ;;  %v4640_v10 = vld [vmem:[%s9903_s4] sm:$0xff] }
0x1dff   : > { %v4436_v11 = vpop.xlane.xlu1 %4435 }
0x1e00   : > { %v4437_v12 = vsub.f32 %v4433_v5, %v4436_v11  ;;  %v4642_v5 = vld [vmem:[%s9903_s4 + $0x10] sm:$0xff]  ;;  %v6943_v11 = vld [vmem:[#allocation23] ss:$0 sm:$0xff] }
0x1e02   : > { %v4438_v13 = vmul.f32 1.442695, %v4437_v12 }
0x1e04   : > { %7911 = vpow2.f32 %v4438_v13 }
0x1e11   : > { %v7912_v14 = vpop.eup %7911 }
0x1e12   : > { %v4440_v15 = vsel %vm1738_vm3, %v7912_v14, 0.0 }
0x1e13   : > { %4441 = vadd.xlane.f32.xlu0 %v4440_v15 }
0x1e29   : > { %4445 = vrot.lane.b32.xlu0 %v4188_v49, %s9876_s7  ;;  %v4637_v49 = vld [vmem:[%s9902_s2 + $0x10] sm:$0xff] }
0x1e9c   : > { %v4442_v16 = vpop.xlane.xlu0 %4441 }
0x1e9d   : > { %7913 = vrcp.f32 %v4442_v16  ;;  %v6958_v16 = vld [vmem:[#allocation5 + $0x1] ss:$0 sm:$0xff] }
0x1ea0   : > { %v4446_v17 = vpop.permute.xlu0 %4445 }
0x1ea1   : > { %7465 = vmatpush3.msra.mxu1 %v4446_v17 }
0x1ea2   : > { %7480 = vmatprep.subr.mxu1 %v8438_v0 }
0x1eaa   : > { %v7914_v18 = vpop.eup %7913 }
0x1eab   : > { %v4444_v19 = vmul.f32 %v7914_v18, %v7912_v14 }
0x1ead   : > { %7467 = vmatmul.mubr.msk.f32.vlgmr.msra.gmra.mxu1 %vm1738_vm3, %v4444_v19 }
0x1eae   : > { %7488 = vmatprep.mubr.msk.f32.mxu1 %vm8439_vm0, %v8438_v0  ;;  %7481 = vmatpush3.msra.mxu1 %v4638_v47 }
0x1eaf   : > { %7482 = vmatprep.subr.mxu1 %v8438_v0 }
0x1eb0   : > { %7483 = vmatpush3.msra.mxu1 %v4637_v49 }
0x1eb1   : > { %7484 = vmatprep.subr.mxu1 %v8438_v0 }
0x1f6d   : > { %v4517_v26 = vpop.f32.mrf.mxu1 }
0x1f6e   : > { %4522 = vrot.lane.b32.xlu1 %v4517_v26, %s9881_s13 }
0x1f6f   : > { %v7468_v27 = vpop.f32.mrf.mxu1 }
0x1fe0   : > { %v4523_v28 = vpop.permute.xlu1 %4522 }
0x1fe1   : > { %v4525_v29 = vsel %vm1662_vm2, %v4351_v6, %v4523_v28  ;;  %v6951_v6 = vld [vmem:[%s9882_s14 + $0x28] sm:$0xff] }
0x1fe2   : > { %7478 = vmatmul.mubr.msk.f32.vlgmr.msra.gmra.mxu0 %vm1585_vm1, %v4525_v29 }
0x1fe3   : > { %7507 = vmatprep.mubr.msk.f32.mxu0 %vm8439_vm0, %v8438_v0  ;;  %7492 = vmatpush3.msra.mxu0 %v4647_v52 }
0x1fe4   : > { %7493 = vmatprep.subr.mxu0 %v8438_v0 }
0x1fe5   : > { %7494 = vmatpush3.msra.mxu0 %v4646_v53 }
0x1fe6   : > { %7495 = vmatprep.subr.mxu0 %v8438_v0 }
0x1fe7   : > { %7496 = vmatpush3.msra.mxu0 %v4645_v54 }
0x1fe8   : > { %7497 = vmatprep.subr.mxu0 %v8438_v0 }
0x1fe9   : > { %7498 = vmatpush3.msra.mxu0 %v4644_v55 }
0x1fea   : > { %7499 = vmatprep.subr.mxu0 %v8438_v0 }
0x1feb   : > { %7500 = vmatpush3.msra.mxu0 %v4643_v30 }
0x1fec   : > { %7501 = vmatprep.subr.mxu0 %v8438_v0 }
0x1fed   : > { %7502 = vmatpush3.msra.mxu0 %v4642_v5 }
0x1fee   : > { %7503 = vmatprep.subr.mxu0 %v8438_v0 }
0x1fef   : > { %7504 = vmatpush3.msra.mxu0 %v4641_v9 }
0x1ff0   : > { %7505 = vmatprep.subr.mxu0 %v8438_v0 }
0x1ff1   : > { %7506 = vmatpush3.msra.mxu0 %v4640_v10 }
0x1ff2   : > { %7531 = vmatprep.subr.mxu0 %v8438_v0 }
0x20a2   : > { %v4601_v32 = vpop.f32.mrf.mxu0 }
0x20a3   : > { %v4602_v33 = vadd.f32 %v6939_v31, %v4601_v32 }
0x20a4   : > { %v7479_v37 = vpop.f32.mrf.mxu0 }
0x20a5   : > { %v4605_v38 = vadd.f32 %v4602_v33, %v9334_v34  ;;  %v4636_v34 = vld [vmem:[%s9902_s2 + $0x8] sm:$0xff]  ;;  %v7949_v37 = vld [vmem:[%s9884_s1] sm:$0xff]  ;;  %s8448_s1 = smov [#allocation26]  }
0x20a6   : > { %7485 = vmatpush3.msra.mxu1 %v4636_v34 }
0x20a7   : > { %v4608_v39 = vsel %vm1585_vm1, %v4605_v38, 0.0  ;;  %7486 = vmatprep.subr.mxu1 %v8438_v0 }
0x20a8   : > { %4609 = vadd.xlane.f32.xlu1 %v4608_v39  ;;  %7487 = vmatpush3.msra.mxu1 %v4635_v51 }
0x20a9   : > { %7510 = vmatprep.subr.mxu1 %v8438_v0 }
0x2131   : > { %v4610_v40 = vpop.xlane.xlu1 %4609 }
0x2132   : > { %v4611_v42 = vmul.f32 0.03125, %v4610_v40 }
0x2134   : > { %v4612_v43 = vsub.f32 %v4605_v38, %v4611_v42 }
0x2136   : > { %v4613_v44 = vmul.f32 %v4612_v43, %v4612_v43 }
0x2138   : > { %v4614_v46 = vsel %vm1585_vm1, %v4613_v44, 0.0 }
0x2139   : > { %4615 = vadd.xlane.f32.xlu0 %v4614_v46 }
0x21c2   : > { %v4616_v58 = vpop.xlane.xlu0 %4615 }
0x21c3   : > { %v4617_v59 = vmul.f32 0.03125, %v4616_v58 }
0x21c5   : > { %v4618_v60 = vadd.f32 1e-05, %v4617_v59 }
0x21c7   : > { %7915 = vrsqrt.f32 %v4618_v60 }
0x21d4   : > { %v7916_v61 = vpop.eup %7915 }
0x21d5   : > { %v4620_v63 = vmul.f32 %v7916_v61, %v4612_v43 }
0x21d7   : > { %v4627_v2 = vmul.f32 %v6941_v62, %v4620_v63 }
0x21d9   : > { %v9414_v25 = vadd.f32 %v6942_v1, %v4627_v2  ;;  %v6957_v1 = vld [vmem:[%s9892_s19 + $0x38] sm:$0xff]  ;;  %v6956_v2 = vld [vmem:[%s9892_s19 + $0x30] sm:$0xff] }
0x21db   : > { %7489 = vmatmul.mubr.msk.f32.vlgmr.msra.gmra.mxu1 %vm1585_vm1, %v9414_v25 }
0x21dc   : > { %7511 = vmatpush3.msra.mxu1 %v6953_v3  ;;  %7518 = vmatprep.mubr.msk.f32.mxu1 %vm8439_vm0, %v8438_v0  ;;  %v6955_v3 = vld [vmem:[%s9892_s19 + $0x28] sm:$0xff] }
0x21dd   : > { %7512 = vmatprep.subr.mxu1 %v8438_v0 }
0x21de   : > { %7513 = vmatpush3.msra.mxu1 %v6952_v4  ;;  %v6954_v4 = vld [vmem:[%s9892_s19 + $0x20] sm:$0xff] }
0x21df   : > { %7514 = vmatprep.subr.mxu1 %v8438_v0 }
0x21e0   : > { %7515 = vmatpush3.msra.mxu1 %v6951_v6 }
0x21e1   : > { %7516 = vmatprep.subr.mxu1 %v8438_v0 }
0x21e2   : > { %7517 = vmatpush3.msra.mxu1 %v6950_v7 }
0x21e3   : > { %7519 = vmatmul.mubr.msk.f32.vlgmr.msra.gmra.mxu1 %vm1585_vm1, %v9427_v8  ;;  %7521 = vmatprep.subr.mxu1 %v8438_v0 }
0x21e4   : > { %7523 = vmatprep.mubr.msk.f32.mxu1 %vm8439_vm0, %v8438_v0 }
0x229b   : > { %v4724_v12 = vpop.f32.mrf.mxu1 }
0x229c   : > { %v4725_v13 = vadd.f32 %v6943_v11, %v4724_v12  ;;  %v6977_v11 = vld [vmem:[%s9900_s20 + $0x38] sm:$0xff] }
0x229d   : > { %v7490_v14 = vpop.f32.mrf.mxu1 }
0x229e   : > { %v4728_v15 = vmax.f32 %v4725_v13, 0.0  ;;  %v6976_v13 = vld [vmem:[%s9900_s20 + $0x30] sm:$0xff]  ;;  %v6975_v14 = vld [vmem:[%s9900_s20 + $0x28] sm:$0xff] }
0x22a0   : > { %7508 = vmatmul.mubr.msk.f32.vlgmr.msra.gmra.mxu0 %vm2207_vm4, %v4728_v15  ;;  %v6974_v15 = vld [vmem:[%s9900_s20 + $0x20] sm:$0xff] }
0x22a1   : > { %7533 = vmatprep.mubr.msk.f32.mxu0 %vm8439_vm0, %v8438_v0 }
0x22a3   : > { %v4930_v17 = vpop.f32.mrf.mxu1 }
0x22a4   : > { %v4931_v18 = vadd.f32 %v6958_v16, %v4930_v17  ;;  %v6966_v16 = vld [vmem:[#allocation8 + $0x1] ss:$0 sm:$0xff] }
0x22a5   : > { %v7520_v19 = vpop.f32.mrf.mxu1 }
0x22a6   : > { %5102 = vrot.lane.b32.xlu1 %v4931_v18, %s9876_s7  ;;  %4935 = vrot.lane.b32.xlu0 %v4931_v18, %s9877_s9 }
0x22aa   : > { %5100 = vrot.lane.b32.xlu1 %v4931_v18, %s9878_s11 }
0x2318   : > { %v5103_v21 = vpop.permute.xlu1 %5102  ;;  %v4936_v22 = vpop.permute.xlu0 %4935 }
0x2319   : > { %7522 = vmatpush3.xpose.msk.msra.mxu1 %vm1662_vm2, %v4936_v22  ;;  %7532 = vmatpush3.xpose.msk.msra.mxu0 %vm1662_vm2, %v5103_v21 }
0x231a   : > { %7526 = vmatprep.subr.mxu1 %v8438_v0  ;;  %7541 = vmatprep.subr.mxu0 %v8438_v0 }
0x231c   : > { %v5101_v23 = vpop.permute.xlu1 %5100  ;;  %7524 = vmatmul.mubr.msk.f32.vlgmr.msra.gmra.mxu1 %vm1662_vm2, %v4931_v18 }
0x231d   : > { %7534 = vmatmul.mubr.msk.f32.vlgmr.msra.gmra.mxu0 %vm1662_vm2, %v5101_v23  ;;  %7528 = vmatprep.mubr.msk.f32.mxu1 %vm8439_vm0, %v8438_v0 }
0x231e   : > { %7549 = vmatprep.mubr.msk.f32.mxu0 %vm8439_vm0, %v8438_v0  ;;  %7542 = vmatpush3.msra.mxu0 %v6957_v1 }
0x231f   : > { %7543 = vmatprep.subr.mxu0 %v8438_v0 }
0x2320   : > { %7544 = vmatpush3.msra.mxu0 %v6956_v2 }
0x2321   : > { %7545 = vmatprep.subr.mxu0 %v8438_v0 }
0x2322   : > { %7546 = vmatpush3.msra.mxu0 %v6955_v3 }
0x2323   : > { %7547 = vmatprep.subr.mxu0 %v8438_v0 }
0x2324   : > { %7548 = vmatpush3.msra.mxu0 %v6954_v4 }
0x2325   : > { %7563 = vmatprep.subr.mxu0 %v8438_v0 }
0x2360   : > { %v9457_v24 = vpop.f32.mrf.mxu0 }
0x2362   : > { %v7509_v26 = vpop.f32.mrf.mxu0 }
0x23dc   : > { %v5007_v27 = vpop.f32.mrf.mxu1 }
0x23dd   : > { %v5011_v28 = vmul.f32 0.25, %v5007_v27  ;;  %v5174_v29 = vpop.f32.mrf.mxu0 }
0x23de   : > { %v5178_v31 = vmul.f32 0.25, %v5174_v29  ;;  %v7525_v32 = vpop.f32.mrf.mxu1 }
0x23df   : > { %v7535_v33 = vpop.f32.mrf.mxu0  ;;  %v5012_v38 = vadd.f32 %v7949_v37, %v5011_v28 }
0x23e0   : > { %v5179_v39 = vadd.f32 %v7949_v37, %v5178_v31  ;;  %v6984_v33 = vld [vmem:[#allocation11 + $0x1] ss:$0 sm:$0xff] }
0x23e1   : > { %v5013_v40 = vsel %vm1738_vm3, %v5012_v38, -inf }
0x23e2   : > { %5014 = vmax.xlane.f32.xlu0 %v5013_v40  ;;  %v5180_v42 = vsel %vm1738_vm3, %v5179_v39, -inf  ;;  %v6970_v40 = vld [vmem:[%s9899_s17 + $0x20] sm:$0xff] }
0x23e3   : > { %5181 = vmax.xlane.f32.xlu1 %v5180_v42 }
0x23f4   : > { %5024 = vrot.lane.b32.xlu1 %v4931_v18, %s9880_s12 }
0x246b   : > { %v5015_v43 = vpop.xlane.xlu0 %5014 }
0x246c   : > { %v5016_v44 = vsub.f32 %v5012_v38, %v5015_v43  ;;  %v5182_v46 = vpop.xlane.xlu1 %5181  ;;  %v6972_v38 = vld [vmem:[%s9899_s17 + $0x30] sm:$0xff] }
0x246d   : > { %v5183_v47 = vsub.f32 %v5179_v39, %v5182_v46  ;;  %v6971_v39 = vld [vmem:[%s9899_s17 + $0x28] sm:$0xff] }
0x246e   : > { %v5017_v49 = vmul.f32 1.442695, %v5016_v44 }
0x246f   : > { %v5184_v34 = vmul.f32 1.442695, %v5183_v47 }
0x2470   : > { %7917 = vpow2.f32 %v5017_v49  ;;  %v5025_v51 = vpop.permute.xlu1 %5024  ;;  %v6968_v49 = vld [vmem:[#allocation14 + $0x1] ss:$0 sm:$0xff] }
0x2471   : > { %7527 = vmatpush3.msra.mxu1 %v5025_v51  ;;  %7919 = vpow2.f32 %v5184_v34  ;;  %v6969_v51 = vld [vmem:[#allocation16 + $0x1] ss:$0 sm:$0xff] }
0x2472   : > { %7536 = vmatprep.subr.mxu1 %v8438_v0 }
0x247d   : > { %v7918_v52 = vpop.eup %7917 }
0x247e   : > { %v5019_v53 = vsel %vm1738_vm3, %v7918_v52, 0.0  ;;  %v7920_v54 = vpop.eup %7919 }
0x247f   : > { %5020 = vadd.xlane.f32.xlu0 %v5019_v53  ;;  %v5186_v55 = vsel %vm1738_vm3, %v7920_v54, 0.0 }
0x2483   : > { %5187 = vadd.xlane.f32.xlu0 %v5186_v55 }
0x2499   : > { %5191 = vrot.lane.b32.xlu0 %v4931_v18, %s9879_s15 }
0x2508   : > { %v5021_v30 = vpop.xlane.xlu0 %5020 }
0x2509   : > { %7921 = vrcp.f32 %v5021_v30 }
0x250c   : > { %v5188_v58 = vpop.xlane.xlu0 %5187 }
0x250d   : > { %7923 = vrcp.f32 %v5188_v58 }
0x2510   : > { %v5192_v61 = vpop.permute.xlu0 %5191 }
0x2516   : > { %v7922_v59 = vpop.eup %7921 }
0x2517   : > { %v5023_v60 = vmul.f32 %v7922_v59, %v7918_v52 }
0x2519   : > { %7529 = vmatmul.mubr.msk.f32.vlgmr.msra.gmra.mxu1 %vm1738_vm3, %v5023_v60 }
0x251a   : > { %v7924_v62 = vpop.eup %7923  ;;  %7537 = vmatpush3.msra.mxu1 %v5192_v61  ;;  %7538 = vmatprep.mubr.msk.f32.mxu1 %vm8439_vm0, %v8438_v0 }
0x251b   : > { %v5190_v63 = vmul.f32 %v7924_v62, %v7920_v54  ;;  %7552 = vmatprep.subr.mxu1 %v8438_v0  ;;  %v6982_v54 = vld [vmem:[#allocation10 + $0x1] ss:$0 sm:$0xff] }
0x251d   : > { %7539 = vmatmul.mubr.msk.f32.vlgmr.msra.gmra.mxu1 %vm1738_vm3, %v5190_v63 }
0x251e   : > { %7560 = vmatprep.mubr.msk.f32.mxu1 %vm8439_vm0, %v8438_v0 }
0x25d9   : > { %v5096_v6 = vpop.f32.mrf.mxu1 }
0x25db   : > { %v7530_v7 = vpop.f32.mrf.mxu1 }
0x25dd   : > { %v5263_v5 = vpop.f32.mrf.mxu1 }
0x25de   : > { %5268 = vrot.lane.b32.xlu1 %v5263_v5, %s9881_s13 }
0x25df   : > { %v7540_v9 = vpop.f32.mrf.mxu1 }
0x2650   : > { %v5269_v10 = vpop.permute.xlu1 %5268 }
0x2651   : > { %v5271_v12 = vsel %vm1662_vm2, %v5096_v6, %v5269_v10 }
0x2652   : > { %7550 = vmatmul.mubr.msk.f32.vlgmr.msra.gmra.mxu0 %vm1585_vm1, %v5271_v12 }
0x2653   : > { %7564 = vmatpush3.msra.mxu0 %v6977_v11  ;;  %7571 = vmatprep.mubr.msk.f32.mxu0 %vm8439_vm0, %v8438_v0 }
0x2654   : > { %7565 = vmatprep.subr.mxu0 %v8438_v0 }
0x2655   : > { %7566 = vmatpush3.msra.mxu0 %v6976_v13 }
0x2656   : > { %7567 = vmatprep.subr.mxu0 %v8438_v0 }
0x2657   : > { %7568 = vmatpush3.msra.mxu0 %v6975_v14 }
0x2658   : > { %7569 = vmatprep.subr.mxu0 %v8438_v0 }
0x2659   : > { %7570 = vmatpush3.msra.mxu0 %v6974_v15 }
0x265a   : > { %7572 = vmatmul.mubr.msk.f32.vlgmr.msra.gmra.mxu0 %vm1585_vm1, %v9347_v41  ;;  %7584 = vmatprep.subr.mxu0 %v8438_v0 }
0x265b   : > { %7586 = vmatprep.mubr.msk.f32.mxu0 %vm8439_vm0, %v8438_v0 }
0x2712   : > { %v5347_v17 = vpop.f32.mrf.mxu0 }
0x2713   : > { %v5348_v18 = vadd.f32 %v6966_v16, %v5347_v17 }
0x2714   : > { %v7551_v19 = vpop.f32.mrf.mxu0 }
0x2715   : > { %v5351_v21 = vadd.f32 %v9427_v8, %v5348_v18  ;;  %v6973_v8 = vld [vmem:[%s9899_s17 + $0x38] sm:$0xff] }
0x2716   : > { %7553 = vmatpush3.msra.mxu1 %v6973_v8 }
0x2717   : > { %v5356_v22 = vsel %vm1585_vm1, %v5351_v21, 0.0  ;;  %7554 = vmatprep.subr.mxu1 %v8438_v0 }
0x2718   : > { %5357 = vadd.xlane.f32.xlu1 %v5356_v22  ;;  %7555 = vmatpush3.msra.mxu1 %v6972_v38 }
0x2719   : > { %7556 = vmatprep.subr.mxu1 %v8438_v0 }
0x271a   : > { %v5555_v23 = vpop.f32.mrf.mxu0  ;;  %7557 = vmatpush3.msra.mxu1 %v6971_v39 }
0x271b   : > { %v9502_v37 = vadd.f32 %v6984_v33, %v5555_v23  ;;  %7558 = vmatprep.subr.mxu1 %v8438_v0  ;;  %v6978_v33 = vld [vmem:[%s9901_s16 + $0x20] sm:$0xff] }
0x271c   : > { %v7573_v26 = vpop.f32.mrf.mxu0  ;;  %7559 = vmatpush3.msra.mxu1 %v6970_v40  ;;  %v6945_v40 = vld [vmem:[#allocation25] ss:$0 sm:$0xff] }
0x271d   : > { %7574 = vmatprep.subr.mxu1 %v8438_v0 }
0x27a1   : > { %v5358_v27 = vpop.xlane.xlu1 %5357 }
0x27a2   : > { %v5359_v28 = vmul.f32 0.03125, %v5358_v27  ;;  %v6981_v27 = vld [vmem:[%s9901_s16 + $0x38] sm:$0xff] }
0x27a4   : > { %v5360_v29 = vsub.f32 %v5351_v21, %v5359_v28  ;;  %v6980_v28 = vld [vmem:[%s9901_s16 + $0x30] sm:$0xff] }
0x27a6   : > { %v5361_v31 = vmul.f32 %v5360_v29, %v5360_v29 }
0x27a8   : > { %v5362_v32 = vsel %vm1585_vm1, %v5361_v31, 0.0 }
0x27a9   : > { %5363 = vadd.xlane.f32.xlu0 %v5362_v32 }
0x27bf   : > { %5725 = vrot.lane.b32.xlu0 %v9502_v37, %s9878_s11 }
0x2832   : > { %v5364_v42 = vpop.xlane.xlu0 %5363 }
0x2833   : > { %v5365_v43 = vmul.f32 0.03125, %v5364_v42  ;;  %v6992_v42 = vld [vmem:[#allocation13 + $0x1] ss:$0 sm:$0xff] }
0x2835   : > { %v5366_v44 = vadd.f32 1e-05, %v5365_v43 }
0x2836   : > { %v5726_v46 = vpop.permute.xlu0 %5725 }
0x2837   : > { %7925 = vrsqrt.f32 %v5366_v44  ;;  %7585 = vmatpush3.xpose.msk.msra.mxu0 %vm1662_vm2, %v5726_v46  ;;  %v4805_v44 = vadd.f32 %v6945_v40, %v9457_v24 }
0x2838   : > { %7594 = vmatprep.subr.mxu0 %v8438_v0 }
0x2844   : > { %v7926_v47 = vpop.eup %7925 }
0x2845   : > { %v5368_v34 = vmul.f32 %v7926_v47, %v5360_v29  ;;  %v6979_v29 = vld [vmem:[%s9901_s16 + $0x28] sm:$0xff] }
0x2847   : > { %v5375_v52 = vmul.f32 %v6968_v49, %v5368_v34 }
0x2849   : > { %v9516_v53 = vadd.f32 %v6969_v51, %v5375_v52  ;;  %v4808_v51 = vadd.f32 %v4805_v44, %v9414_v25 }
0x284b   : > { %7561 = vmatmul.mubr.msk.f32.vlgmr.msra.gmra.mxu1 %vm1585_vm1, %v9516_v53  ;;  %v4811_v52 = vsel %vm1585_vm1, %v4808_v51, 0.0 }
0x284c   : > { %7575 = vmatpush3.xpose.msk.msra.mxu1 %vm1662_vm2, %v9502_v37  ;;  %7576 = vmatprep.mubr.msk.f32.mxu1 %vm8439_vm0, %v8438_v0 }
0x284d   : > { %7579 = vmatprep.subr.mxu1 %v8438_v0 }
0x290b   : > { %v5479_v55 = vpop.f32.mrf.mxu1 }
0x290c   : > { %v5480_v30 = vadd.f32 %v6982_v54, %v5479_v55 }
0x290d   : > { %v7562_v58 = vpop.f32.mrf.mxu1 }
0x290e   : > { %5723 = vrot.lane.b32.xlu1 %v5480_v30, %s9878_s11  ;;  %7577 = vmatmul.mubr.msk.f32.vlgmr.msra.gmra.mxu1 %vm1662_vm2, %v5480_v30  ;;  %s1555_s11 = scalar_lea.vmem [#allocation26], %s1554_s18 }
0x290f   : > { %7581 = vmatprep.mubr.msk.f32.mxu1 %vm8439_vm0, %v8438_v0  ;;  %s6571_s15 = sshll.u32 %s1555_s11, 4  ;;  %s6572_s15 = int_to_ptr.vmem [resolvable:$true] %s6571_s15 }
0x2980   : > { %v5724_v59 = vpop.permute.xlu1 %5723 }
0x2981   : > { %7587 = vmatmul.mubr.msk.f32.vlgmr.msra.gmra.mxu0 %vm1662_vm2, %v5724_v59 }
0x2982   : > { %7602 = vmatprep.mubr.msk.f32.mxu0 %vm8439_vm0, %v8438_v0  ;;  %7595 = vmatpush3.msra.mxu0 %v6981_v27 }
0x2983   : > { %7596 = vmatprep.subr.mxu0 %v8438_v0 }
0x2984   : > { %7597 = vmatpush3.msra.mxu0 %v6980_v28 }
0x2985   : > { %7598 = vmatprep.subr.mxu0 %v8438_v0 }
0x2986   : > { %7599 = vmatpush3.msra.mxu0 %v6979_v29  ;;  %v7010_v29 = vld [vmem:[#allocation25 + $0x1] ss:$0 sm:$0xff] }
0x2987   : > { %7600 = vmatprep.subr.mxu0 %v8438_v0 }
0x2988   : > { %7601 = vmatpush3.msra.mxu0 %v6978_v33 }
0x2989   : > { %7616 = vmatprep.subr.mxu0 %v8438_v0 }
0x29ce   : > { %v5631_v60 = vpop.f32.mrf.mxu1 }
0x29cf   : > { %v5635_v61 = vmul.f32 0.25, %v5631_v60 }
0x29d0   : > { %v7578_v62 = vpop.f32.mrf.mxu1 }
0x29d1   : > { %v5636_v63 = vsel %vm1738_vm3, %v5635_v61, -inf  ;;  %v6999_v62 = vld [vmem:[%s9902_s2 + $0x38] sm:$0xff] }
0x29d2   : > { %5637 = vmax.xlane.f32.xlu1 %v5636_v63  ;;  %v6998_v63 = vld [vmem:[%s9902_s2 + $0x30] sm:$0xff] }
0x2a41   : > { %v5797_v1 = vpop.f32.mrf.mxu0 }
0x2a42   : > { %v5801_v2 = vmul.f32 0.25, %v5797_v1  ;;  %v6997_v1 = vld [vmem:[%s9902_s2 + $0x28] sm:$0xff] }
0x2a43   : > { %v7588_v3 = vpop.f32.mrf.mxu0 }
0x2a44   : > { %v5802_v4 = vsel %vm1738_vm3, %v5801_v2, -inf  ;;  %v7007_v3 = vld [vmem:[%s9903_s4 + $0x78] sm:$0xff] }
0x2a45   : > { %5803 = vmax.xlane.f32.xlu0 %v5802_v4  ;;  %v7006_v4 = vld [vmem:[%s9903_s4 + $0x70] sm:$0xff] }
0x2a5b   : > { %v5638_v6 = vpop.xlane.xlu1 %5637 }
0x2a5c   : > { %v5639_v7 = vsub.f32 %v5635_v61, %v5638_v6  ;;  %v7005_v6 = vld [vmem:[%s9903_s4 + $0x68] sm:$0xff] }
0x2a5e   : > { %v5640_v5 = vmul.f32 1.442695, %v5639_v7  ;;  %v7004_v7 = vld [vmem:[%s9903_s4 + $0x60] sm:$0xff] }
0x2a60   : > { %7927 = vpow2.f32 %v5640_v5  ;;  %v7003_v5 = vld [vmem:[%s9903_s4 + $0x58] sm:$0xff] }
0x2a6d   : > { %v7928_v9 = vpop.eup %7927 }
0x2a6e   : > { %v5642_v10 = vsel %vm1738_vm3, %v7928_v9, 0.0 }
0x2a6f   : > { %5643 = vadd.xlane.f32.xlu0 %v5642_v10 }
0x2a85   : > { %5647 = vrot.lane.b32.xlu0 %v9502_v37, %s9877_s9 }
0x2ace   : > { %v5804_v11 = vpop.xlane.xlu0 %5803 }
0x2acf   : > { %v5805_v12 = vsub.f32 %v5801_v2, %v5804_v11  ;;  %v6996_v2 = vld [vmem:[%s9902_s2 + $0x20] sm:$0xff]  ;;  %s8292_s2 = sshll.u32 %s8448_s1, 4  ;;  %s8293_s2 = int_to_ptr.vmem [resolvable:$false] %s8292_s2 }
0x2ad0   : > { %p8295_p12 = scmp.lt.s32.totalorder %s6572_s15, %s8293_s2 }
0x2ad1   : > { %v5806_v13 = vmul.f32 1.442695, %v5805_v12 }
0x2ad3   : > { %7929 = vpow2.f32 %v5806_v13  ;;  %v6994_v13 = vld [vmem:[#allocation17 + $0x1] ss:$0 sm:$0xff] }
0x2ae0   : > { %v7930_v14 = vpop.eup %7929 }
0x2ae1   : > { %v5808_v15 = vsel %vm1738_vm3, %v7930_v14, 0.0 }
0x2ae2   : > { %5809 = vadd.xlane.f32.xlu1 %v5808_v15  ;;  %v6995_v15 = vld [vmem:[#allocation19 + $0x1] ss:$0 sm:$0xff] }
0x2af3   : > { %5813 = vrot.lane.b32.xlu1 %v9502_v37, %s9876_s7  ;;  %s7016_s7 = sshll.u32 %s8705_s0, 4  ;;  %s8294_s0 = scalar_lea.vmem %s8293_s2, 32 }
0x2af8   : > { %v5644_v16 = vpop.xlane.xlu0 %5643 }
0x2af9   : > { %7931 = vrcp.f32 %v5644_v16 }
0x2afc   : > { %v5648_v17 = vpop.permute.xlu0 %5647 }
0x2afd   : > { %7580 = vmatpush3.msra.mxu1 %v5648_v17 }
0x2afe   : > { %7589 = vmatprep.subr.mxu1 %v8438_v0 }
0x2b06   : > { %v7932_v18 = vpop.eup %7931 }
0x2b07   : > { %v5646_v19 = vmul.f32 %v7932_v18, %v7928_v9  ;;  %v7002_v18 = vld [vmem:[%s9903_s4 + $0x50] sm:$0xff] }
0x2b09   : > { %7582 = vmatmul.mubr.msk.f32.vlgmr.msra.gmra.mxu1 %vm1738_vm3, %v5646_v19  ;;  %v7001_v19 = vld [vmem:[%s9903_s4 + $0x48] sm:$0xff] }
0x2b0a   : > { %7591 = vmatprep.mubr.msk.f32.mxu1 %vm8439_vm0, %v8438_v0 }
0x2b6b   : > { %v5810_v21 = vpop.xlane.xlu1 %5809 }
0x2b6c   : > { %7933 = vrcp.f32 %v5810_v21  ;;  %v7000_v21 = vld [vmem:[%s9903_s4 + $0x40] sm:$0xff] }
0x2b6f   : > { %v5814_v22 = vpop.permute.xlu1 %5813 }
0x2b70   : > { %7590 = vmatpush3.msra.mxu1 %v5814_v22  ;;  %v7008_v22 = vld [vmem:[#allocation23 + $0x1] ss:$0 sm:$0xff] }
0x2b71   : > { %7605 = vmatprep.subr.mxu1 %v8438_v0 }
0x2b79   : > { %v7934_v23 = vpop.eup %7933 }
0x2b7a   : > { %v5812_v26 = vmul.f32 %v7934_v23, %v7930_v14 }
0x2b7c   : > { %7592 = vmatmul.mubr.msk.f32.vlgmr.msra.gmra.mxu1 %vm1738_vm3, %v5812_v26 }
0x2b7d   : > { %7613 = vmatprep.mubr.msk.f32.mxu1 %vm8439_vm0, %v8438_v0  ;;  %7606 = vmatpush3.msra.mxu1 %v6999_v62 }
0x2b7e   : > { %7607 = vmatprep.subr.mxu1 %v8438_v0 }
0x2b7f   : > { %7608 = vmatpush3.msra.mxu1 %v6998_v63 }
0x2b80   : > { %7609 = vmatprep.subr.mxu1 %v8438_v0 }
0x2b81   : > { %7610 = vmatpush3.msra.mxu1 %v6997_v1 }
0x2b82   : > { %7611 = vmatprep.subr.mxu1 %v8438_v0 }
0x2b83   : > { %7612 = vmatpush3.msra.mxu1 %v6996_v2 }
0x2bc9   : > { %v5719_v31 = vpop.f32.mrf.mxu1 }
0x2bcb   : > { %v7583_v32 = vpop.f32.mrf.mxu1 }
0x2c3c   : > { %v5885_v37 = vpop.f32.mrf.mxu1 }
0x2c3d   : > { %5890 = vrot.lane.b32.xlu1 %v5885_v37, %s9881_s13  ;;  %s9904_s13 = smov 32  }
0x2c3e   : > { %v7593_v8 = vpop.f32.mrf.mxu1 }
0x2caf   : > { %v5891_v38 = vpop.permute.xlu1 %5890 }
0x2cb0   : > { %v5893_v39 = vsel %vm1662_vm2, %v5719_v31, %v5891_v38 }
0x2cb1   : > { %7603 = vmatmul.mubr.msk.f32.vlgmr.msra.gmra.mxu0 %vm1585_vm1, %v5893_v39 }
0x2cb2   : > { %7632 = vmatprep.mubr.msk.f32.mxu0 %vm8439_vm0, %v8438_v0  ;;  %7617 = vmatpush3.msra.mxu0 %v7007_v3 }
0x2cb3   : > { %7618 = vmatprep.subr.mxu0 %v8438_v0 }
0x2cb4   : > { %7619 = vmatpush3.msra.mxu0 %v7006_v4 }
0x2cb5   : > { %7620 = vmatprep.subr.mxu0 %v8438_v0 }
0x2cb6   : > { %7621 = vmatpush3.msra.mxu0 %v7005_v6 }
0x2cb7   : > { %7622 = vmatprep.subr.mxu0 %v8438_v0 }
0x2cb8   : > { %7623 = vmatpush3.msra.mxu0 %v7004_v7 }
0x2cb9   : > { %7624 = vmatprep.subr.mxu0 %v8438_v0 }
0x2cba   : > { %7625 = vmatpush3.msra.mxu0 %v7003_v5 }
0x2cbb   : > { %7626 = vmatprep.subr.mxu0 %v8438_v0 }
0x2cbc   : > { %7627 = vmatpush3.msra.mxu0 %v7002_v18 }
0x2cbd   : > { %7628 = vmatprep.subr.mxu0 %v8438_v0 }
0x2cbe   : > { %7629 = vmatpush3.msra.mxu0 %v7001_v19 }
0x2cbf   : > { %7630 = vmatprep.subr.mxu0 %v8438_v0 }
0x2cc0   : > { %7631 = vmatpush3.msra.mxu0 %v7000_v21 }
0x2cc1   : > { %7635 = vmatprep.subr.mxu0 %v8438_v0 }
0x2d71   : > { %v5969_v43 = vpop.f32.mrf.mxu0 }
0x2d72   : > { %v5970_v46 = vadd.f32 %v6992_v42, %v5969_v43 }
0x2d73   : > { %v7604_v47 = vpop.f32.mrf.mxu0 }
0x2d74   : > { %v5973_v49 = vadd.f32 %v5970_v46, %v9516_v53 }
0x2d76   : > { %v5978_v34 = vsel %vm1585_vm1, %v5973_v49, 0.0 }
0x2d77   : > { %5979 = vadd.xlane.f32.xlu0 %v5978_v34 }
0x2d7b   : > { %4812 = vadd.xlane.f32.xlu0 %v4811_v52 }
0x2e00   : > { %v5980_v54 = vpop.xlane.xlu0 %5979 }
0x2e01   : > { %v5981_v55 = vmul.f32 0.03125, %v5980_v54 }
0x2e03   : > { %v5982_v30 = vsub.f32 %v5973_v49, %v5981_v55  ;;  %v6947_v55 = vld [vmem:[#allocation20] ss:$0 sm:$0xff] }
0x2e04   : > { %v4813_v58 = vpop.xlane.xlu0 %4812 }
0x2e05   : > { %v4814_v24 = vmul.f32 0.03125, %v4813_v58  ;;  %v5983_v59 = vmul.f32 %v5982_v30, %v5982_v30  ;;  %v7012_v58 = vld [vmem:[#allocation20 + $0x1] ss:$0 sm:$0xff] }
0x2e07   : > { %v9566_v60 = vsub.f32 %v4808_v51, %v4814_v24  ;;  %v5984_v53 = vsel %vm1585_vm1, %v5983_v59, 0.0 }
0x2e08   : > { %5985 = vadd.xlane.f32.xlu1 %v5984_v53  ;;  %v6948_v53 = vld [vmem:[#allocation22] ss:$0 sm:$0xff] }
0x2e09   : > { %v4816_v25 = vmul.f32 %v9566_v60, %v9566_v60 }
0x2e0b   : > { %v4817_v61 = vsel %vm1585_vm1, %v4816_v25, 0.0  ;;  %v7013_v25 = vld [vmem:[#allocation22 + $0x1] ss:$0 sm:$0xff] }
0x2e0c   : > { %4818 = vadd.xlane.f32.xlu1 %v4817_v61 }
0x2e91   : > { %v5986_v9 = vpop.xlane.xlu1 %5985 }
0x2e92   : > { %v5987_v10 = vmul.f32 0.03125, %v5986_v9 }
0x2e94   : > { %v5988_v11 = vadd.f32 1e-05, %v5987_v10 }
0x2e95   : > { %v4819_v44 = vpop.xlane.xlu1 %4818 }
0x2e96   : > { %7935 = vrsqrt.f32 %v5988_v11  ;;  %v4820_v46 = vmul.f32 0.03125, %v4819_v44  ;;  %v6364_v44 = vld [vmem:[%s8667_s3 + $0x68] sm:$0xff] }
0x2e98   : > { %v4821_v47 = vadd.f32 1e-05, %v4820_v46  ;;  %v6379_v46 = vld [vmem:[%s8667_s3 + $0xe0] sm:$0xff] }
0x2e9a   : > { %7937 = vrsqrt.f32 %v4821_v47  ;;  %v6363_v47 = vld [vmem:[%s8667_s3 + $0x60] sm:$0xff] }
0x2ea3   : > { %v7936_v12 = vpop.eup %7935 }
0x2ea4   : > { %v5990_v14 = vmul.f32 %v7936_v12, %v5982_v30 }
0x2ea6   : > { %v5997_v16 = vmul.f32 %v6994_v13, %v5990_v14 }
0x2ea7   : > { %v7938_v52 = vpop.eup %7937 }
0x2ea8   : > { %v6004_v17 = vadd.f32 %v6995_v15, %v5997_v16  ;;  %v4823_v54 = vmul.f32 %v7938_v52, %v9566_v60  ;;  %v6361_v52 = vld [vmem:[%s8667_s3 + $0x50] sm:$0xff] }
0x2eaa   : > { %7614 = vmatmul.mubr.msk.f32.vlgmr.msra.gmra.mxu1 %vm1585_vm1, %v6004_v17  ;;  %v4830_v24 = vmul.f32 %v6947_v55, %v4823_v54  ;;  %v6376_v54 = vld [vmem:[%s8667_s3 + $0xc8] sm:$0xff] }
0x2eab   : > { %v6360_v55 = vld [vmem:[%s8667_s3 + $0x48] sm:$0xff] }
0x2eac   : > { %v4837_v62 = vadd.f32 %v6948_v53, %v4830_v24  ;;  %v6374_v24 = vld [vmem:[%s8667_s3 + $0xb8] sm:$0xff]  ;;  %v6373_v53 = vld [vmem:[%s8667_s3 + $0xb0] sm:$0xff] }
0x2f6a   : > { %v6098_v23 = vpop.f32.mrf.mxu1 }
0x2f6b   : > { %v6099_v26 = vadd.f32 %v7008_v22, %v6098_v23 }
0x2f6c   : > { %v7615_v27 = vpop.f32.mrf.mxu1 }
0x2f6d   : > { %v6102_v28 = vmax.f32 %v6099_v26, 0.0  ;;  %v6382_v27 = vld [vmem:[%s8667_s3 + $0xf8] sm:$0xff] }
0x2f6e   : > { %7196 = vmatprep.subr.mxu1 %v6382_v27 }
0x2f6f   : > { %7633 = vmatmul.mubr.msk.f32.vlgmr.msra.gmra.mxu0 %vm2207_vm4, %v6102_v28  ;;  %v6366_v28 = vld [vmem:[%s8667_s3 + $0x78] sm:$0xff] }
0x2f70   : > { %7643 = vmatprep.mubr.msk.f32.mxu0 %vm8439_vm0, %v8438_v0  ;;  %vm6307_vm0 = vcmask 1040384   ;;  %7197 = vmatpush3.msra.mxu1 %v6366_v28 }
0x2f71   : > { %7198 = vmatprep.subr.mxu1 %v6381_v48 }
0x302f   : > { %v6178_v31 = vpop.f32.mrf.mxu0 }
0x3030   : > { %v6179_v32 = vadd.f32 %v7010_v29, %v6178_v31 }
0x3031   : > { %v7634_v33 = vpop.f32.mrf.mxu0 }
0x3032   : > { %v6182_v37 = vadd.f32 %v6179_v32, %v6004_v17 }
0x3034   : > { %v6187_v8 = vsel %vm1585_vm1, %v6182_v37, 0.0 }
0x3035   : > { %6188 = vadd.xlane.f32.xlu0 %v6187_v8 }
0x30be   : > { %v6189_v38 = vpop.xlane.xlu0 %6188 }
0x30bf   : > { %v6190_v39 = vmul.f32 0.03125, %v6189_v38 }
0x30c1   : > { %v6191_v40 = vsub.f32 %v6182_v37, %v6190_v39 }
0x30c3   : > { %v6192_v42 = vmul.f32 %v6191_v40, %v6191_v40 }
0x30c5   : > { %v6193_v43 = vsel %vm1585_vm1, %v6192_v42, 0.0  ;;  %v6365_v42 = vld [vmem:[%s8667_s3 + $0x70] sm:$0xff] }
0x30c6   : > { %6194 = vadd.xlane.f32.xlu0 %v6193_v43  ;;  %7199 = vmatpush3.msra.mxu1 %v6365_v42  ;;  %v6380_v43 = vld [vmem:[%s8667_s3 + $0xe8] sm:$0xff] }
0x30c7   : > { %7200 = vmatprep.subr.mxu1 %v6380_v43 }
0x30c8   : > { %7201 = vmatpush3.msra.mxu1 %v6364_v44 }
0x30c9   : > { %7202 = vmatprep.subr.mxu1 %v6379_v46 }
0x30ca   : > { %7203 = vmatpush3.msra.mxu1 %v6363_v47 }
0x314f   : > { %v6195_v49 = vpop.xlane.xlu0 %6194 }
0x3150   : > { %v6196_v34 = vmul.f32 0.03125, %v6195_v49  ;;  %v6378_v49 = vld [vmem:[%s8667_s3 + $0xd8] sm:$0xff] }
0x3151   : > { %7204 = vmatprep.subr.mxu1 %v6378_v49 }
0x3152   : > { %v6197_v51 = vadd.f32 1e-05, %v6196_v34  ;;  %v6362_v34 = vld [vmem:[%s8667_s3 + $0x58] sm:$0xff] }
0x3153   : > { %7205 = vmatpush3.msra.mxu1 %v6362_v34 }
0x3154   : > { %7939 = vrsqrt.f32 %v6197_v51  ;;  %v6377_v51 = vld [vmem:[%s8667_s3 + $0xd0] sm:$0xff] }
0x3155   : > { %7206 = vmatprep.subr.mxu1 %v6377_v51 }
0x3156   : > { %7207 = vmatpush3.msra.mxu1 %v6361_v52 }
0x3157   : > { %7208 = vmatprep.subr.mxu1 %v6376_v54 }
0x3158   : > { %7209 = vmatpush3.msra.mxu1 %v6360_v55 }
0x3161   : > { %v7940_v30 = vpop.eup %7939 }
0x3162   : > { %v6199_v59 = vmul.f32 %v7940_v30, %v6191_v40  ;;  %v6375_v30 = vld [vmem:[%s8667_s3 + $0xc0] sm:$0xff] }
0x3163   : > { %7210 = vmatprep.subr.mxu1 %v6375_v30 }
0x3164   : > { %v6206_v61 = vmul.f32 %v7012_v58, %v6199_v59  ;;  %v6359_v58 = vld [vmem:[%s8667_s3 + $0x40] sm:$0xff]  ;;  %v6358_v59 = vld [vmem:[%s8667_s3 + $0x38] sm:$0xff] }
0x3165   : > { %7211 = vmatpush3.msra.mxu1 %v6359_v58 }
0x3166   : > { %v6213_v63 = vadd.f32 %v7013_v25, %v6206_v61  ;;  %7212 = vmatprep.subr.mxu1 %v6374_v24  ;;  %v6357_v25 = vld [vmem:[%s8667_s3 + $0x30] sm:$0xff]  ;;  %v6372_v61 = vld [vmem:[%s8667_s3 + $0xa8] sm:$0xff] }
0x3167   : > { %7213 = vmatpush3.msra.mxu1 %v6358_v59 }
0x3168   : > { %v6214_v1 = vadd.f32 %v6213_v63, %v4837_v62  ;;  %7214 = vmatprep.subr.mxu1 %v6373_v53  ;;  %v6356_v62 = vld [vmem:[%s8667_s3 + $0x28] sm:$0xff]  ;;  %v6371_v63 = vld [vmem:[%s8667_s3 + $0xa0] sm:$0xff] }
0x3169   : > { %7215 = vmatpush3.msra.mxu1 %v6357_v25 }
0x316a   : > { %v6215_v2 = vadd.f32 %v6214_v1, %v9347_v41  ;;  %7216 = vmatprep.subr.mxu1 %v6372_v61  ;;  %v6355_v1 = vld [vmem:[%s8667_s3 + $0x20] sm:$0xff] }
0x316b   : > { %7217 = vmatpush3.msra.mxu1 %v6356_v62 }
0x316c   : > { %v6224_v3 = vrot.slane %v6215_v2, %v9176_v35  ;;  %6216 = vst.msk [vmem:[#allocation3] sm:$0x1] %vm9179_vm5, %v6215_v2  ;;  %v6254_v4 = vcombine.high %v6215_v2, %v6215_v2  ;;  %v6370_v2 = vld [vmem:[%s8667_s3 + $0x98] sm:$0xff]  ;;  %7218 = vmatprep.subr.mxu1 %v6371_v63 }
0x316d   : > { %7219 = vmatpush3.msra.mxu1 %v6355_v1 }
0x316e   : > { %v6225_v60 = vcombine.high %v6224_v3, %v6224_v3  ;;  %v6261_v6 = vrot.slane %v6254_v4, %v9176_v35  ;;  %v6232_v9 = vrot.slane %v6224_v3, %v9176_v35  ;;  %v6354_v3 = vld [vmem:[%s8667_s3 + $0x18] sm:$0xff]  ;;  %v6369_v4 = vld [vmem:[%s8667_s3 + $0x90] sm:$0xff]  ;;  %7220 = vmatprep.subr.mxu1 %v6370_v2 }
0x316f   : > { %7221 = vmatpush3.msra.mxu1 %v6354_v3 }
0x3170   : > { %v6239_v7 = vrot.slane %v6225_v60, %v9176_v35  ;;  %v6271_v5 = vcombine.high %v6261_v6, %v6261_v6  ;;  %v6268_v10 = vrot.slane %v6261_v6, %v9176_v35  ;;  %v6244_v11 = vcombine.high %v6232_v9, %v6232_v9  ;;  %v6353_v60 = vld [vmem:[%s8667_s3 + $0x10] sm:$0xff]  ;;  %v6368_v6 = vld [vmem:[%s8667_s3 + $0x88] sm:$0xff]  ;;  %7222 = vmatprep.subr.mxu1 %v6369_v4  ;;  %v6351_v9 = vld [vmem:[%s8667_s3] sm:$0xff] }
0x3171   : > { %7223 = vmatpush3.msra.mxu1 %v6353_v60 }
0x3172   : > { %6240 = vrot.lane.b32.xlu1 %v6239_v7, %s9904_s13  ;;  %v6278_v41 = vrot.slane %v6271_v5, %v9176_v35  ;;  %6270 = vst.msk [vmem:[#allocation3 + $0x1] sm:$0x1] %vm9179_vm5, %v6268_v10  ;;  %v6249_v12 = vcombine.high %v6239_v7, %v6239_v7  ;;  %v6283_v13 = vcombine.high %v6268_v10, %v6268_v10  ;;  %v6352_v7 = vld [vmem:[%s8667_s3 + $0x8] sm:$0xff]  ;;  %v6367_v5 = vld [vmem:[%s8667_s3 + $0x80] sm:$0xff] }
0x3173   : > { %7224 = vmatprep.subr.mxu1 %v6368_v6 }
0x3174   : > { %6279 = vrot.lane.b32.xlu0 %v6278_v41, %s9904_s13  ;;  %v6288_v14 = vcombine.high %v6278_v41, %v6278_v41  ;;  %7225 = vmatpush3.msra.mxu1 %v6352_v7  ;;  %s9696_s13 = scalar_lea.hbm %s8682_s25, %s7016_s7 }
0x3175   : > { %7226 = vmatprep.subr.mxu1 %v6367_v5 }
0x3176   : > { %6245 = vrot.lane.b32.xlu1 %v6244_v11, %s9880_s12  ;;  %7227 = vmatpush3.msra.mxu1 %v6351_v9 }
0x3178   : > { %6250 = vrot.lane.b32.xlu0 %v6249_v12, %s9877_s9 }
0x317a   : > { %6284 = vrot.lane.b32.xlu1 %v6283_v13, %s9880_s12  ;;  %s9906_s12 = sld [smem:[#allocation73_spill]] }
0x317e   : > { %6289 = vrot.lane.b32.xlu1 %v6288_v14, %s9877_s9  ;;  %s9905_s9 = sld [smem:[#allocation72_spill]] }
0x3184   : > { %v6294_v14 = vld [vmem:[%s9905_s9] sm:$0x3]  ;;  %s6559_s9 = scalar_lea.sflag [#allocation7], %s1554_s18 }
0x31e4   : > { %v6241_v15 = vpop.permute.xlu1 %6240 }
0x31e5   : > { %6243 = vst.msk [vmem:[#allocation3] sm:$0x1] %vm9266_vm8, %v6241_v15 }
0x31e6   : > { %v6280_v35 = vpop.permute.xlu0 %6279 }
0x31e7   : > { %6282 = vst.msk [vmem:[#allocation3 + $0x1] sm:$0x1] %vm9266_vm8, %v6280_v35  ;;  %v6295_v35 = vld [vmem:[%s9906_s12] sm:$0x3]  ;;  %s8288_s12 = scalar_lea.vmem %s6572_s15, 16 }
0x31e8   : > { %v6246_v36 = vpop.permute.xlu1 %6245  ;;  %p8289_p13 = scmp.ne.s32.totalorder %s6572_s15, %s8288_s12  ;;  %p8296_p10 = scmp.lt.s32.totalorder %s8294_s0, %s8288_s12 }
0x31e9   : > { %6248 = vst.msk [vmem:[#allocation3] sm:$0x1] %vm9276_vm11, %v6246_v36 }
0x31ea   : > { %v6251_v16 = vpop.permute.xlu0 %6250  ;;  %p8290_p4 = pnand %p8289_p13, %p9907_p7  ;;  %p8297_p0 = por %p8296_p10, %p8295_p12 }
0x31eb   : > { %6253 = vst.msk [vmem:[#allocation3] sm:$0x1] %vm9284_vm14, %v6251_v16 }
0x31ec   : > { %v6285_v17 = vpop.permute.xlu1 %6284  ;;  %p8291_p8 = pneg %p8290_p4 }
0x31ed   : > { %6287 = vst.msk [vmem:[#allocation3 + $0x1] sm:$0x1] %vm9276_vm11, %v6285_v17 }
0x31ee   : > { %p8298_p11 = pnand %p8297_p0, %p8291_p8 }
0x31f0   : > { %v6290_v18 = vpop.permute.xlu1 %6289 }
0x31f1   : > { %6292 = vst.msk [vmem:[#allocation3 + $0x1] sm:$0x1] %vm9284_vm14, %v6290_v18 }
0x31f8   : > { %v6293_v45 = vld [vmem:[#allocation3] sm:$0x3] }
0x31f9   : > { %v6300_v19 = vrot.slane %v6293_v45, %v9300_v56  ;;  %v6304_v21 = vrot.slane %v6293_v45, %v9303_v57 }
0x31fb   : > { %v6308_v22 = vsel %vm6307_vm0, %v6300_v19, 0.0  ;;  %v6309_v23 = vsel %vm6307_vm0, %v6304_v21, 0.0  ;;  %v6468_v19 = vld [vmem:[%s8677_s30 + $0x10] sm:$0xff]  ;;  %v6467_v21 = vld [vmem:[%s8677_s30 + $0x8] sm:$0xff] }
0x31fc   : > { %v6310_v26 = vadd.f32 %v6309_v23, %v6308_v22  ;;  %v6466_v22 = vld [vmem:[%s8677_s30] sm:$0xff] }
0x31fd   : > { %v6383_v23 = vld [vmem:[%s8672_s5] sm:$0x1] }
0x31fe   : > { %6311 = vadd.xlane.f32.xlu0 %v6310_v26 }
0x3287   : > { %v6312_v50 = vpop.xlane.xlu0 %6311 }
0x3288   : > { %v6314_v29 = vmul.f32 0.00390625, %v6312_v50 }
0x328a   : > { %v6319_v31 = vrot.slane %v6314_v29, %v9300_v56 }
0x328c   : > { %v9639_v32 = vsub.f32 %v6293_v45, %v6319_v31  ;;  %v6469_v45 = vld [vmem:[%s8677_s30 + $0x18] sm:$0xff]  ;;  %v6544_v31 = vand.u32 127, %v3060_v20 }
0x328d   : > { %7636 = vmatpush3.msra.mxu0 %v6469_v45 }
0x328e   : > { %v6322_v33 = vmul.f32 %v9639_v32, %v9639_v32  ;;  %7637 = vmatprep.subr.mxu0 %v8438_v0  ;;  %vm6545_vm2 = vcmp.lt.s32.totalorder %v6544_v31, 8 }
0x328f   : > { %7638 = vmatpush3.msra.mxu0 %v6468_v19 }
0x3290   : > { %v6327_v37 = vrot.slane %v6322_v33, %v9300_v56  ;;  %v6331_v8 = vrot.slane %v6322_v33, %v9303_v57  ;;  %7639 = vmatprep.subr.mxu0 %v8438_v0 }
0x3291   : > { %7640 = vmatpush3.msra.mxu0 %v6467_v21 }
0x3292   : > { %v6334_v38 = vsel %vm6307_vm0, %v6327_v37, 0.0  ;;  %v6335_v39 = vsel %vm6307_vm0, %v6331_v8, 0.0  ;;  %7641 = vmatprep.subr.mxu0 %v8438_v0 }
0x3293   : > { %v6336_v40 = vadd.f32 %v6335_v39, %v6334_v38  ;;  %7642 = vmatpush3.msra.mxu0 %v6466_v22 }
0x3295   : > { %6337 = vadd.xlane.f32.xlu1 %v6336_v40 }
0x331e   : > { %v6338_v10 = vpop.xlane.xlu1 %6337 }
0x331f   : > { %v6339_v41 = vmul.f32 0.00390625, %v6338_v10 }
0x3321   : > { %v6340_v11 = vadd.f32 1e-05, %v6339_v41 }
0x3323   : > { %7941 = vrsqrt.f32 %v6340_v11 }
0x3330   : > { %v7942_v12 = vpop.eup %7941 }
0x3331   : > { %v6346_v13 = vrot.slane %v7942_v12, %v9300_v56 }
0x3333   : > { %v6348_v15 = vmul.f32 %v6346_v13, %v9639_v32 }
0x3335   : > { %v6349_v36 = vmul.f32 %v6348_v15, %v6294_v14 }
0x3337   : > { %v6350_v16 = vadd.f32 %v6349_v36, %v6295_v35 }
0x3339   : > { %v6392_v17 = vrot.slane %v6350_v16, %v9303_v57  ;;  %v6388_v18 = vrot.slane %v6350_v16, %v9300_v56 }
0x333b   : > { %6459 = vmatprep.mubr.f32.mxu1 %v6392_v17 }
0x333c   : > { %6460 = vmatmul.mubr.f32.vlgmr.msra.gmra.mxu1 %v6388_v18 }
0x33fc   : > { %v7228_v57 = vpop.f32.mrf.mxu1 }
0x33fe   : > { %v7229_v26 = vpop.f32.mrf.mxu1 }
0x33ff   : > { %v7230_v56 = vadd.f32 %v7229_v26, %v7228_v57 }
0x3401   : > { %v6462_v27 = vadd.f32 %v7230_v56, %v6383_v23 }
0x3403   : > { %v6465_v28 = vmax.f32 %v6462_v27, 0.0 }
0x3405   : > { %7644 = vmatmul.mubr.msk.f32.vlgmr.msra.gmra.mxu0 %vm1585_vm1, %v6465_v28  ;;  %vm6556_vm1 = vcmask 73728  }
0x34c5   : > { %v6539_v48 = vpop.f32.mrf.mxu0 }
0x34c6   : > { %v7015_v50 = vmul.f32 -1.442695, %v6539_v48  ;;  %v6546_v0 = vsel %vm6545_vm2, 0.0, %v6539_v48 }
0x34c7   : > { %v7645_v29 = vpop.f32.mrf.mxu0  ;;  %v6547_v32 = vmul.f32 1.442695, %v6546_v0 }
0x34c8   : > { %7943 = vpow2.f32 %v7015_v50 }
0x34c9   : > { %7945 = vpow2.f32 %v6547_v32 }
0x34d5   : > { %v7944_v33 = vpop.eup %7943 }
0x34d6   : > { %v6552_v37 = vadd.f32 1.0, %v7944_v33  ;;  %v7946_v8 = vpop.eup %7945 }
0x34d8   : > { %7947 = vrcp.f32 %v6552_v37 }
0x34e5   : > { %v7948_v38 = vpop.eup %7947 }
0x34e6   : > { %v6555_v20 = vsel %vm6545_vm2, %v7948_v38, %v7946_v8 }
0x34e7   : > { %6557 = vst.msk [vmem:[%s1555_s11] sm:$0x1] %vm6556_vm1, %v6555_v20 }
0x34e8   : > { %8301 = shalt.err (!%p8298_p11)
}
0x34e9   : > { %s8302_s18 = scalar_lea.hbm %s9696_s13, 16  ;;  %s8306_s7 = scalar_lea.hbm %s8682_s25, 32 }
0x34ea   : > { %p8303_p6 = scmp.ne.s32.totalorder %s9696_s13, %s8302_s18  ;;  %p8307_p5 = scmp.lt.s32.totalorder %s9696_s13, %s8682_s25 }
0x34eb   : > { %p8308_p2 = scmp.lt.s32.totalorder %s8306_s7, %s8302_s18 }
0x34ec   : > { %p8304_p1 = pnand %p8303_p6, %p9907_p7 }
0x34ed   : > { %p8309_p3 = por %p8308_p2, %p8307_p5 }
0x34ee   : > { %p8305_p9 = pneg %p8304_p1 }
0x34f0   : > { %p8310_p13 = pnand %p8309_p3, %p8305_p9 }
0x34f2   : > { %8313 = shalt.err (!%p8310_p13)
}
0x34f3   : > { %7698 = dma.vmem_to_hbm [thread:$0]  (%p9907_p7), %s6572_s15, 16, %s9696_s13, %s6559_s9  }
0x34f4 PF: > { %s9908_s1 = sld [smem:[#allocation76_spill]] }
0x34f5   : > { %s9909_s2 = sld [smem:[#allocation74_spill]] }
0x34f6   : > { %s9910_s11 = sld [smem:[#allocation79_spill]] }
0x34fa   : > { %p7770_p4 = scmp.ge.s32.totalorder %s9908_s1, 2 }
0x34fb   : > { %s6583_s12 = sand.u32 1, %s9909_s2  }
0x34fc   : > { %p9911_p8 = scmp.ne.s32.totalorder %s9910_s11, 0  ;;  %s6584_s0 = scalar_lea.sflag [#allocation7], %s6583_s12 }
0x34fe   : > { %p7741_p12 = pnand %p7770_p4, %p9911_p8 }
0x3500   : > { %p7742_p10 = pneg %p7741_p12 }
0x3502   : > { %8359 = dma.done.wait (%p7742_p10), %s6584_s0, 16  }
0x3503   : > { %8361 = vsyncadd (%p7742_p10), %s6584_s0, 4294967280  ;;  %s9912_s15 = sld [smem:[#allocation77_spill]]  ;;  %s9915_s7 = smov %s8368_s10 }
0x3504   : > { %s9913_s18 = sld [smem:[#allocation75_spill]] }
0x3505   : > { %s9914_s11 = sld [smem:[#allocation78_spill]] }
0x3509   : > { %p108_p0 = scmp.ge.s32.totalorder %s9912_s15, 4  }
0x350a   : > { %s9916_s10 = smov %s9913_s18 }
0x350b   :  { %110 = sbr.rel (!%p108_p0) target bundleno = 99 (0x63), region = 372 }
0x3510   :  { %6588 = vsyncpa [#allocation6], 1 }
0x3511   :  { %6590 = vsyncpa [#allocation6 + $0x1], 1 }
0x3512   :  { %6591 = vsyncpa [#allocation9], 1 }
0x3513   :  { %6592 = vsyncpa [#allocation12], 1 }
0x3514   :  { %6593 = vsyncpa [#allocation15], 1 }
0x3515   :  { %6594 = vsyncpa [#allocation18], 1 }
0x3516   :  { %6595 = vsyncpa [#allocation21], 1 }
0x3517   :  { %6596 = vsyncpa [#allocation24], 1 }
0x3518   :  { %6597 = vsyncpa [#allocation7], 1 }
0x3519   :  { %6599 = vsyncpa [#allocation7 + $0x1], 1 }

</bundles_post_ra>
